<compile_context>
chip_gen: v6e
topology: v6e:2x2x1
jax: 0.10.0
libtpu: 0.0.40
codegen_flags: <defaults>
</compile_context>

<pallas_src>
import jax
import jax.numpy as jnp
from jax.experimental import pallas as pl
from jax.experimental.pallas import tpu as pltpu

H = 512          # hidden width
NEG_SLOPE = 0.2  # LeakyReLU slope
LANE = 128


def discriminator_kernel(x_ref, w1i_ref, w1l_ref, b1_ref,
                         w2_ref, b2_ref, w3_ref, b3_ref,
                         w4_ref, b4_ref, out_ref):
    """One lane-tile of the batch, computed in transposed (feature, batch) layout.

    x_ref   : (2, TN) f32   row 0 = flattened img, row 1 = label (fused concat)
    w1i/w1l : (H, 1) f32    columns of the Linear(2,H) weight
    b1..b3  : (H, 1) f32
    w2, w3  : (H, H) bf16   torch (out,in) layout; y^T = W @ x^T
    w4      : (H, 1) f32    Linear(H,1) weight stored as a column
    b4      : (1, 1) f32    scalar bias, SMEM
    out_ref : (1, TN) f32   lane-dense validity row
    """
    neg = jnp.float32(NEG_SLOPE)

    def leaky(v):
        return jnp.where(v > 0, v, neg * v)

    img = x_ref[0:1, :]          # (1, TN)
    lab = x_ref[1:2, :]          # (1, TN)

    # --- Layer 1: Linear(2, H) as two VPU outer-product broadcasts (K=2 is
    # far too small for the MXU). ------------------------------------------
    h = leaky(w1i_ref[...] * img + w1l_ref[...] * lab + b1_ref[...])  # (H, TN)

    # --- Layer 2: Linear(H, H) on the MXU, bf16 inputs, f32 accumulation.
    # Dropout(0.4) == identity in eval mode. ---------------------------------
    h = leaky(jnp.dot(w2_ref[...], h.astype(jnp.bfloat16),
                      preferred_element_type=jnp.float32) + b2_ref[...])

    # --- Layer 3: Linear(H, H); Dropout identity in eval. -------------------
    h = leaky(jnp.dot(w3_ref[...], h.astype(jnp.bfloat16),
                      preferred_element_type=jnp.float32) + b3_ref[...])

    # --- Layer 4: Linear(H, 1) as VPU multiply + feature (sublane) reduction;
    # result is already lane-dense (1, TN), so the store is unmasked. --------
    out = jnp.sum(w4_ref[...] * h, axis=0, keepdims=True)            # (1, TN)
    out_ref[...] = out + b4_ref[0, 0]


def discriminator_forward(img, labels, params):
    """img: (B, C, Hi, Wi) float32 with C*Hi*Wi == 1; labels: (B,) float-castable."""
    B = img.shape[0]
    img_flat = img.reshape(B, -1).astype(jnp.float32)         # (B, 1)
    assert img_flat.shape[1] == 1, "flattened image must be a single scalar"

    # Fused concat, lane-dense: one packed (2, B) input (img row, label row).
    x = jnp.concatenate(
        [img_flat.reshape(1, B), labels.reshape(1, B).astype(jnp.float32)],
        axis=0)                                                # (2, B)

    w1, b1, w2, b2, w3, b3, w4, b4 = params
    w1_img = w1[:, 0:1]                                        # (H, 1)
    w1_lab = w1[:, 1:2]                                        # (H, 1)

    # ---- batch tiling (lane dimension) -------------------------------------
    b_pad = pl.cdiv(B, LANE) * LANE
    if b_pad <= 256:
        tn = b_pad                     # single lane-dense tile
    else:
        # >= 2 tiles (so v7x's two TensorCores both get work), tile width a
        # multiple of 256 (full MXU passes on v6e/v7x, 128-aligned for v5e),
        # capped at 1024 lanes (~10 MiB working set << 32 MiB VMEM limit).
        tn = min(1024, pl.cdiv(pl.cdiv(b_pad, 2), 256) * 256)
        b_pad = pl.cdiv(b_pad, tn) * tn
    if b_pad != B:
        x = jnp.pad(x, ((0, 0), (0, b_pad - B)))
    grid = (b_pad // tn,)

    x_spec = pl.BlockSpec((2, tn), lambda i: (0, i))
    out_spec = pl.BlockSpec((1, tn), lambda i: (0, i))

    def resident(shape):
        # Constant index map -> block stays VMEM-resident across grid steps
        # (never re-fetched from HBM).
        return pl.BlockSpec(shape, lambda i: (0, 0))

    flops = 2 * b_pad * H * (2 + H + H + 1)
    param_bytes = (2 * H * H * 2                       # w2, w3 in bf16
                   + 4 * (2 * H + 3 * H + H + 1))      # w1, b1..b3, w4, b4 f32
    bytes_accessed = param_bytes + 4 * 2 * b_pad + 4 * b_pad

    out = pl.pallas_call(
        discriminator_kernel,
        out_shape=jax.ShapeDtypeStruct((1, b_pad), jnp.float32),
        grid=grid,
        in_specs=[
            x_spec,                    # packed img/label rows
            resident((H, 1)),          # w1[:, 0]
            resident((H, 1)),          # w1[:, 1]
            resident((H, 1)),          # b1
            resident((H, H)),          # w2 (bf16)
            resident((H, 1)),          # b2
            resident((H, H)),          # w3 (bf16)
            resident((H, 1)),          # b3
            resident((H, 1)),          # w4 column
            pl.BlockSpec((1, 1), lambda i: (0, 0),
                         memory_space=pltpu.MemorySpace.SMEM),   # b4 scalar
        ],
        out_specs=out_spec,
        compiler_params=pltpu.CompilerParams(
            dimension_semantics=("parallel",),
            vmem_limit_bytes=32 * 1024 * 1024),
        cost_estimate=pl.CostEstimate(
            flops=flops, transcendentals=0, bytes_accessed=bytes_accessed),
    )(x, w1_img, w1_lab, b1, w2, b2, w3, b3, w4, b4)

    return out[:, :B].reshape(B, 1)


def init_params(key):
    """PyTorch nn.Linear-style init (U(-1/sqrt(fan_in), 1/sqrt(fan_in))),
    stored in kernel-friendly layouts:

      w1       : (H, 2) f32   torch (out_features, in_features) layout
      b1,b2,b3 : (H, 1) f32
      w2, w3   : (H, H) bf16  torch (out, in) layout (MXU bf16 path)
      w4       : (H, 1) f32   torch (1, H) stored transposed as a column
      b4       : (1, 1) f32
    """
    def uniform(k, shape, fan_in):
        bound = 1.0 / (fan_in ** 0.5)
        return jax.random.uniform(k, shape, jnp.float32, -bound, bound)

    ks = jax.random.split(key, 8)
    w1 = uniform(ks[0], (H, 2), 2)
    b1 = uniform(ks[1], (H, 1), 2)
    w2 = uniform(ks[2], (H, H), H).astype(jnp.bfloat16)
    b2 = uniform(ks[3], (H, 1), H)
    w3 = uniform(ks[4], (H, H), H).astype(jnp.bfloat16)
    b3 = uniform(ks[5], (H, 1), H)
    w4 = uniform(ks[6], (H, 1), H)
    b4 = uniform(ks[7], (1, 1), H)
    return (w1, b1, w2, b2, w3, b3, w4, b4)


def ref_forward(img, labels, params):
    """Pure-JAX reference of the same math (concat + 4 Linear + LeakyReLU;
    Dropout identity in eval).  Weights are used exactly as stored (bf16 w2/w3
    upcast to f32), so the only kernel/ref delta is in-kernel bf16 rounding of
    the activations fed to the MXU."""
    w1, b1, w2, b2, w3, b3, w4, b4 = params
    x = jnp.concatenate(
        [img.reshape(img.shape[0], -1),
         labels.reshape(-1, 1)], axis=-1).astype(jnp.float32)          # (B, 2)

    def leaky(v):
        return jnp.where(v > 0, v, NEG_SLOPE * v)

    h = leaky(x @ w1.T + b1.T)
    h = leaky(h @ w2.astype(jnp.float32).T + b2.T)
    h = leaky(h @ w3.astype(jnp.float32).T + b3.T)
    return h @ w4 + b4                                                 # (B, 1)


if __name__ == "__main__":
    key = jax.random.PRNGKey(0)
    kp, ki = jax.random.split(key)

    params = init_params(kp)

    B = 8
    # img is NCHW with a single scalar per sample (flatten -> (B, 1), cat with
    # labels -> (B, 2), matching Linear(2, 512)).
    img = jax.random.normal(ki, (B, 1, 1, 1), jnp.float32)
    # n_classes == 1, so integer class labels are all zero; cast to float.
    labels = jnp.zeros((B,), jnp.float32)

    validity = discriminator_forward(img, labels, params)
    validity = jax.block_until_ready(validity)

    assert validity.shape == (B, 1)
    assert validity.dtype == jnp.float32

    ref = ref_forward(img, labels, params)
    # Tolerance loosened vs. a pure-f32 kernel to cover bf16 rounding of the
    # activations on the two MXU layers (f32 accumulation is kept).
    assert jnp.allclose(validity, ref, atol=2e-2, rtol=2e-2), (
        float(jnp.max(jnp.abs(validity - ref))))

    # TODO(synk): training-mode Dropout(0.4) would need pltpu.prng_seed /
    # prng_random_bits; eval-mode (identity) semantics are implemented here.

    print("KERNEL_OK")
</pallas_src>

<mosaic_0001>
module attributes {stable_mosaic.version = 11 : i64} {
  func.func @discriminator_kernel(%arg0: i32, %arg1: memref<2x128xf32, #tpu.memory_space<vmem>>, %arg2: memref<512x1xf32, #tpu.memory_space<vmem>>, %arg3: memref<512x1xf32, #tpu.memory_space<vmem>>, %arg4: memref<512x1xf32, #tpu.memory_space<vmem>>, %arg5: memref<512x512xbf16, #tpu.memory_space<vmem>>, %arg6: memref<512x1xf32, #tpu.memory_space<vmem>>, %arg7: memref<512x512xbf16, #tpu.memory_space<vmem>>, %arg8: memref<512x1xf32, #tpu.memory_space<vmem>>, %arg9: memref<512x1xf32, #tpu.memory_space<vmem>>, %arg10: memref<1x1xf32, #tpu.memory_space<smem>>, %arg11: memref<1x128xf32, #tpu.memory_space<vmem>>) attributes {dimension_semantics = [#tpu.dimension_semantics<parallel>], iteration_bounds = array<i64: 1>, scalar_prefetch = 0 : i64, scratch_operands = 0 : i64, tpu.core_type = #tpu.core_type<tc>, window_params = [{transform_indices = @transform_0, window_bounds = array<i64: 2, 128>}, {pipeline_mode = #tpu.pipeline_mode<synchronous>, transform_indices = @transform_1, window_bounds = array<i64: 512, 1>}, {pipeline_mode = #tpu.pipeline_mode<synchronous>, transform_indices = @transform_2, window_bounds = array<i64: 512, 1>}, {pipeline_mode = #tpu.pipeline_mode<synchronous>, transform_indices = @transform_3, window_bounds = array<i64: 512, 1>}, {pipeline_mode = #tpu.pipeline_mode<synchronous>, transform_indices = @transform_4, window_bounds = array<i64: 512, 512>}, {pipeline_mode = #tpu.pipeline_mode<synchronous>, transform_indices = @transform_5, window_bounds = array<i64: 512, 1>}, {pipeline_mode = #tpu.pipeline_mode<synchronous>, transform_indices = @transform_6, window_bounds = array<i64: 512, 512>}, {pipeline_mode = #tpu.pipeline_mode<synchronous>, transform_indices = @transform_7, window_bounds = array<i64: 512, 1>}, {pipeline_mode = #tpu.pipeline_mode<synchronous>, transform_indices = @transform_8, window_bounds = array<i64: 512, 1>}, {transform_indices = @transform_9, window_bounds = array<i64: 1, 1>}, {transform_indices = @transform_10, window_bounds = array<i64: 1, 128>}]} {
    %c0 = arith.constant 0 : index
    %c0_0 = arith.constant 0 : index
    %0 = vector.load %arg1[%c0, %c0_0] : memref<2x128xf32, #tpu.memory_space<vmem>>, vector<1x128xf32>
    %c1 = arith.constant 1 : index
    %c0_1 = arith.constant 0 : index
    %1 = vector.load %arg1[%c1, %c0_1] : memref<2x128xf32, #tpu.memory_space<vmem>>, vector<1x128xf32>
    %c0_2 = arith.constant 0 : index
    %c0_3 = arith.constant 0 : index
    %2 = vector.load %arg2[%c0_2, %c0_3] : memref<512x1xf32, #tpu.memory_space<vmem>>, vector<512x1xf32>
    %3 = vector.broadcast %2 : vector<512x1xf32> to vector<512x128xf32>
    %4 = vector.broadcast %0 : vector<1x128xf32> to vector<512x128xf32>
    %5 = arith.mulf %3, %4 : vector<512x128xf32>
    %c0_4 = arith.constant 0 : index
    %c0_5 = arith.constant 0 : index
    %6 = vector.load %arg3[%c0_4, %c0_5] : memref<512x1xf32, #tpu.memory_space<vmem>>, vector<512x1xf32>
    %7 = vector.broadcast %6 : vector<512x1xf32> to vector<512x128xf32>
    %8 = vector.broadcast %1 : vector<1x128xf32> to vector<512x128xf32>
    %9 = arith.mulf %7, %8 : vector<512x128xf32>
    %10 = arith.addf %5, %9 : vector<512x128xf32>
    %c0_6 = arith.constant 0 : index
    %c0_7 = arith.constant 0 : index
    %11 = vector.load %arg4[%c0_6, %c0_7] : memref<512x1xf32, #tpu.memory_space<vmem>>, vector<512x1xf32>
    %12 = vector.broadcast %11 : vector<512x1xf32> to vector<512x128xf32>
    %13 = arith.addf %10, %12 : vector<512x128xf32>
    %cst = arith.constant 0.000000e+00 : f32
    %14 = vector.broadcast %cst : f32 to vector<512x128xf32>
    %15 = arith.cmpf ogt, %13, %14 : vector<512x128xf32>
    %cst_8 = arith.constant 2.000000e-01 : f32
    %16 = vector.broadcast %cst_8 : f32 to vector<512x128xf32>
    %17 = arith.mulf %16, %13 : vector<512x128xf32>
    %18 = arith.select %15, %13, %17 : vector<512x128xi1>, vector<512x128xf32>
    %c0_9 = arith.constant 0 : index
    %c0_10 = arith.constant 0 : index
    %19 = vector.load %arg5[%c0_9, %c0_10] : memref<512x512xbf16, #tpu.memory_space<vmem>>, vector<512x512xbf16>
    %20 = arith.truncf %18 : vector<512x128xf32> to vector<512x128xbf16>
    %cst_11 = arith.constant dense<0.000000e+00> : vector<512x128xf32>
    %21 = tpu.matmul %19, %20, %cst_11 {dimension_numbers = #tpu.dot_dimension_numbers<[1], [0], [0], [1], [0, 0, 1, 1], [], []>} : vector<512x512xbf16>, vector<512x128xbf16>, vector<512x128xf32> -> vector<512x128xf32>
    %c0_12 = arith.constant 0 : index
    %c0_13 = arith.constant 0 : index
    %22 = vector.load %arg6[%c0_12, %c0_13] : memref<512x1xf32, #tpu.memory_space<vmem>>, vector<512x1xf32>
    %23 = vector.broadcast %22 : vector<512x1xf32> to vector<512x128xf32>
    %24 = arith.addf %21, %23 : vector<512x128xf32>
    %cst_14 = arith.constant 0.000000e+00 : f32
    %25 = vector.broadcast %cst_14 : f32 to vector<512x128xf32>
    %26 = arith.cmpf ogt, %24, %25 : vector<512x128xf32>
    %cst_15 = arith.constant 2.000000e-01 : f32
    %27 = vector.broadcast %cst_15 : f32 to vector<512x128xf32>
    %28 = arith.mulf %27, %24 : vector<512x128xf32>
    %29 = arith.select %26, %24, %28 : vector<512x128xi1>, vector<512x128xf32>
    %c0_16 = arith.constant 0 : index
    %c0_17 = arith.constant 0 : index
    %30 = vector.load %arg7[%c0_16, %c0_17] : memref<512x512xbf16, #tpu.memory_space<vmem>>, vector<512x512xbf16>
    %31 = arith.truncf %29 : vector<512x128xf32> to vector<512x128xbf16>
    %cst_18 = arith.constant dense<0.000000e+00> : vector<512x128xf32>
    %32 = tpu.matmul %30, %31, %cst_18 {dimension_numbers = #tpu.dot_dimension_numbers<[1], [0], [0], [1], [0, 0, 1, 1], [], []>} : vector<512x512xbf16>, vector<512x128xbf16>, vector<512x128xf32> -> vector<512x128xf32>
    %c0_19 = arith.constant 0 : index
    %c0_20 = arith.constant 0 : index
    %33 = vector.load %arg8[%c0_19, %c0_20] : memref<512x1xf32, #tpu.memory_space<vmem>>, vector<512x1xf32>
    %34 = vector.broadcast %33 : vector<512x1xf32> to vector<512x128xf32>
    %35 = arith.addf %32, %34 : vector<512x128xf32>
    %cst_21 = arith.constant 0.000000e+00 : f32
    %36 = vector.broadcast %cst_21 : f32 to vector<512x128xf32>
    %37 = arith.cmpf ogt, %35, %36 : vector<512x128xf32>
    %cst_22 = arith.constant 2.000000e-01 : f32
    %38 = vector.broadcast %cst_22 : f32 to vector<512x128xf32>
    %39 = arith.mulf %38, %35 : vector<512x128xf32>
    %40 = arith.select %37, %35, %39 : vector<512x128xi1>, vector<512x128xf32>
    %c0_23 = arith.constant 0 : index
    %c0_24 = arith.constant 0 : index
    %41 = vector.load %arg9[%c0_23, %c0_24] : memref<512x1xf32, #tpu.memory_space<vmem>>, vector<512x1xf32>
    %42 = vector.broadcast %41 : vector<512x1xf32> to vector<512x128xf32>
    %43 = arith.mulf %42, %40 : vector<512x128xf32>
    %cst_25 = arith.constant dense<0.000000e+00> : vector<128xf32>
    %44 = vector.multi_reduction <add>, %43, %cst_25 [0] : vector<512x128xf32> to vector<128xf32>
    %45 = vector.shape_cast %44 : vector<128xf32> to vector<1x128xf32>
    %c0_26 = arith.constant 0 : index
    %c0_27 = arith.constant 0 : index
    %46 = memref.load %arg10[%c0_26, %c0_27] : memref<1x1xf32, #tpu.memory_space<smem>>
    %47 = vector.broadcast %46 : f32 to vector<1x128xf32>
    %48 = arith.addf %45, %47 : vector<1x128xf32>
    %c0_28 = arith.constant 0 : index
    %c0_29 = arith.constant 0 : index
    %49 = vector.load %arg11[%c0_28, %c0_29] : memref<1x128xf32, #tpu.memory_space<vmem>>, vector<1x128xf32>
    tpu.vector_store %arg11[%c0_28, %c0_29], %48 {strides = array<i32>} : memref<1x128xf32, #tpu.memory_space<vmem>>, vector<1x128xf32>,
    return
  }
  func.func @transform_0(%arg0: i32) -> (i32, i32) {
    %c0_i32 = arith.constant 0 : i32
    %c0_i32_0 = arith.constant 0 : i32
    return %c0_i32, %arg0 : i32, i32
  }
  func.func @transform_1(%arg0: i32) -> (i32, i32) {
    %c0_i32 = arith.constant 0 : i32
    %c0_i32_0 = arith.constant 0 : i32
    %c0_i32_1 = arith.constant 0 : i32
    return %c0_i32, %c0_i32_0 : i32, i32
  }
  func.func @transform_2(%arg0: i32) -> (i32, i32) {
    %c0_i32 = arith.constant 0 : i32
    %c0_i32_0 = arith.constant 0 : i32
    %c0_i32_1 = arith.constant 0 : i32
    return %c0_i32, %c0_i32_0 : i32, i32
  }
  func.func @transform_3(%arg0: i32) -> (i32, i32) {
    %c0_i32 = arith.constant 0 : i32
    %c0_i32_0 = arith.constant 0 : i32
    %c0_i32_1 = arith.constant 0 : i32
    return %c0_i32, %c0_i32_0 : i32, i32
  }
  func.func @transform_4(%arg0: i32) -> (i32, i32) {
    %c0_i32 = arith.constant 0 : i32
    %c0_i32_0 = arith.constant 0 : i32
    %c0_i32_1 = arith.constant 0 : i32
    return %c0_i32, %c0_i32_0 : i32, i32
  }
  func.func @transform_5(%arg0: i32) -> (i32, i32) {
    %c0_i32 = arith.constant 0 : i32
    %c0_i32_0 = arith.constant 0 : i32
    %c0_i32_1 = arith.constant 0 : i32
    return %c0_i32, %c0_i32_0 : i32, i32
  }
  func.func @transform_6(%arg0: i32) -> (i32, i32) {
    %c0_i32 = arith.constant 0 : i32
    %c0_i32_0 = arith.constant 0 : i32
    %c0_i32_1 = arith.constant 0 : i32
    return %c0_i32, %c0_i32_0 : i32, i32
  }
  func.func @transform_7(%arg0: i32) -> (i32, i32) {
    %c0_i32 = arith.constant 0 : i32
    %c0_i32_0 = arith.constant 0 : i32
    %c0_i32_1 = arith.constant 0 : i32
    return %c0_i32, %c0_i32_0 : i32, i32
  }
  func.func @transform_8(%arg0: i32) -> (i32, i32) {
    %c0_i32 = arith.constant 0 : i32
    %c0_i32_0 = arith.constant 0 : i32
    %c0_i32_1 = arith.constant 0 : i32
    return %c0_i32, %c0_i32_0 : i32, i32
  }
  func.func @transform_9(%arg0: i32) -> (i32, i32) {
    %c0_i32 = arith.constant 0 : i32
    %c0_i32_0 = arith.constant 0 : i32
    %c0_i32_1 = arith.constant 0 : i32
    return %c0_i32, %c0_i32_0 : i32, i32
  }
  func.func @transform_10(%arg0: i32) -> (i32, i32) {
    %c0_i32 = arith.constant 0 : i32
    %c0_i32_0 = arith.constant 0 : i32
    return %c0_i32, %arg0 : i32, i32
  }
}

</mosaic_0001>

<bundles_post_ra>
// kernel: tpu_custom_call.1
= control target key start
LH: loop header
LB: loop body
LE: loop exit
PB: predicated region body
PF: predicated region fallthrough
CT: control target
= control target key end

     0   :  { %v10113_v2 = vmov 0   ;;  %s10102_s0 = inlined_call_operand.vmem [shape: f32[2,128], index: 0, kind: input, shape index: {}]   ;;  %s10103_s1 = inlined_call_operand.vmem [shape: f32[512,1], index: 1, kind: input, shape index: {}]   ;;  %s10104_s2 = inlined_call_operand.vmem [shape: f32[512,1], index: 2, kind: input, shape index: {}]   ;;  %s10105_s3 = inlined_call_operand.vmem [shape: f32[512,1], index: 3, kind: input, shape index: {}]   ;;  %s10106_s4 = inlined_call_operand.vmem [shape: bf16[512,512], index: 4, kind: input, shape index: {}]   ;;  %s10107_s5 = inlined_call_operand.vmem [shape: f32[512,1], index: 5, kind: input, shape index: {}]   ;;  %s10108_s6 = inlined_call_operand.vmem [shape: bf16[512,512], index: 6, kind: input, shape index: {}]   ;;  %s10109_s7 = inlined_call_operand.vmem [shape: f32[512,1], index: 7, kind: input, shape index: {}]   ;;  %s10110_s8 = inlined_call_operand.vmem [shape: f32[512,1], index: 8, kind: input, shape index: {}]   ;;  %s10111_s9 = inlined_call_operand.<no memory space> [shape: f32[1,1], index: 9, kind: input, shape index: {}]   ;;  %s10112_s10 = inlined_call_operand.hbm [shape: f32[1,128], index: 10, kind: output, shape index: {}]  }
   0x1   :  { %v42_v0 = vld [vmem:[%s10103_s1 + $0x10] sm:$0xff]  ;;  %v40_v1 = vld [vmem:[%s10103_s1] sm:$0xff]  ;;  %6352 = vset.pattern.permute.xlu1 %v10113_v2  ;;  %6351 = vset.pattern.permute.xlu0 %v10113_v2  ;;  %v43_v3 = vld [vmem:[%s10103_s1 + $0x18] sm:$0xff] }
   0x2   :  { %116 = vperm.xlu1 %6352, %v42_v0   ;;  %106 = vperm.xlu0 %6351, %v40_v1   ;;  %v41_v4 = vld [vmem:[%s10103_s1 + $0x8] sm:$0xff]  ;;  %v44_v6 = vld [vmem:[%s10103_s1 + $0x20] sm:$0xff]  ;;  %v47_v7 = vld [vmem:[%s10103_s1 + $0x38] sm:$0xff] }
   0x3   :  { %2832 = vmatprep.subr.bf16.mxu0 %v10113_v2  ;;  %3121 = vmatprep.subr.bf16.mxu1 %v10113_v2  ;;  %v45_v5 = vld [vmem:[%s10103_s1 + $0x28] sm:$0xff]  ;;  %v46_v8 = vld [vmem:[%s10103_s1 + $0x30] sm:$0xff]  ;;  %v48_v10 = vld [vmem:[%s10103_s1 + $0x40] sm:$0xff] }
   0x4   :  { %v49_v9 = vld [vmem:[%s10103_s1 + $0x48] sm:$0xff]  ;;  %v51_v11 = vld [vmem:[%s10103_s1 + $0x58] sm:$0xff]  ;;  %v50_v12 = vld [vmem:[%s10103_s1 + $0x50] sm:$0xff] }
   0x5   :  { %v53_v13 = vld [vmem:[%s10103_s1 + $0x68] sm:$0xff]  ;;  %v52_v14 = vld [vmem:[%s10103_s1 + $0x60] sm:$0xff]  ;;  %v55_v15 = vld [vmem:[%s10103_s1 + $0x78] sm:$0xff] }
   0x6   :  { %121 = vperm.xlu1 %6352, %v43_v3   ;;  %111 = vperm.xlu0 %6351, %v41_v4   ;;  %v54_v16 = vld [vmem:[%s10103_s1 + $0x70] sm:$0xff]  ;;  %v57_v17 = vld [vmem:[%s10103_s1 + $0x88] sm:$0xff]  ;;  %v56_v18 = vld [vmem:[%s10103_s1 + $0x80] sm:$0xff] }
   0x7   :  { %v59_v19 = vld [vmem:[%s10103_s1 + $0x98] sm:$0xff]  ;;  %v58_v20 = vld [vmem:[%s10103_s1 + $0x90] sm:$0xff]  ;;  %v61_v21 = vld [vmem:[%s10103_s1 + $0xa8] sm:$0xff] }
   0x8   :  { %v60_v22 = vld [vmem:[%s10103_s1 + $0xa0] sm:$0xff]  ;;  %v63_v23 = vld [vmem:[%s10103_s1 + $0xb8] sm:$0xff]  ;;  %v62_v24 = vld [vmem:[%s10103_s1 + $0xb0] sm:$0xff] }
   0x9   :  { %v65_v25 = vld [vmem:[%s10103_s1 + $0xc8] sm:$0xff]  ;;  %v64_v26 = vld [vmem:[%s10103_s1 + $0xc0] sm:$0xff]  ;;  %v67_v27 = vld [vmem:[%s10103_s1 + $0xd8] sm:$0xff] }
   0xa   :  { %131 = vperm.xlu1 %6352, %v45_v5   ;;  %126 = vperm.xlu0 %6351, %v44_v6   ;;  %v66_v28 = vld [vmem:[%s10103_s1 + $0xd0] sm:$0xff]  ;;  %v69_v29 = vld [vmem:[%s10103_s1 + $0xe8] sm:$0xff]  ;;  %v68_v30 = vld [vmem:[%s10103_s1 + $0xe0] sm:$0xff] }
   0xb   :  { %v71_v31 = vld [vmem:[%s10103_s1 + $0xf8] sm:$0xff]  ;;  %v70_v32 = vld [vmem:[%s10103_s1 + $0xf0] sm:$0xff]  ;;  %v73_v33 = vld [vmem:[%s10103_s1 + $0x108] sm:$0xff] }
   0xc   :  { %v72_v34 = vld [vmem:[%s10103_s1 + $0x100] sm:$0xff]  ;;  %v75_v35 = vld [vmem:[%s10103_s1 + $0x118] sm:$0xff]  ;;  %v74_v36 = vld [vmem:[%s10103_s1 + $0x110] sm:$0xff] }
   0xd   :  { %v77_v37 = vld [vmem:[%s10103_s1 + $0x128] sm:$0xff]  ;;  %v76_v38 = vld [vmem:[%s10103_s1 + $0x120] sm:$0xff]  ;;  %v79_v39 = vld [vmem:[%s10103_s1 + $0x138] sm:$0xff] }
   0xe   :  { %141 = vperm.xlu1 %6352, %v47_v7   ;;  %136 = vperm.xlu0 %6351, %v46_v8   ;;  %v78_v40 = vld [vmem:[%s10103_s1 + $0x130] sm:$0xff]  ;;  %v81_v41 = vld [vmem:[%s10103_s1 + $0x148] sm:$0xff]  ;;  %v80_v42 = vld [vmem:[%s10103_s1 + $0x140] sm:$0xff] }
   0xf   :  { %v83_v43 = vld [vmem:[%s10103_s1 + $0x158] sm:$0xff]  ;;  %v82_v44 = vld [vmem:[%s10103_s1 + $0x150] sm:$0xff]  ;;  %v85_v45 = vld [vmem:[%s10103_s1 + $0x168] sm:$0xff] }
  0x10   :  { %v84_v46 = vld [vmem:[%s10103_s1 + $0x160] sm:$0xff]  ;;  %v87_v47 = vld [vmem:[%s10103_s1 + $0x178] sm:$0xff]  ;;  %v86_v48 = vld [vmem:[%s10103_s1 + $0x170] sm:$0xff] }
  0x11   :  { %v89_v49 = vld [vmem:[%s10103_s1 + $0x188] sm:$0xff]  ;;  %v88_v50 = vld [vmem:[%s10103_s1 + $0x180] sm:$0xff]  ;;  %v91_v51 = vld [vmem:[%s10103_s1 + $0x198] sm:$0xff] }
  0x12   :  { %151 = vperm.xlu1 %6352, %v49_v9   ;;  %146 = vperm.xlu0 %6351, %v48_v10   ;;  %v90_v52 = vld [vmem:[%s10103_s1 + $0x190] sm:$0xff]  ;;  %v93_v53 = vld [vmem:[%s10103_s1 + $0x1a8] sm:$0xff]  ;;  %v92_v54 = vld [vmem:[%s10103_s1 + $0x1a0] sm:$0xff] }
  0x13   :  { %v95_v55 = vld [vmem:[%s10103_s1 + $0x1b8] sm:$0xff]  ;;  %v94_v56 = vld [vmem:[%s10103_s1 + $0x1b0] sm:$0xff]  ;;  %v97_v57 = vld [vmem:[%s10103_s1 + $0x1c8] sm:$0xff] }
  0x14   :  { %v96_v58 = vld [vmem:[%s10103_s1 + $0x1c0] sm:$0xff]  ;;  %v99_v59 = vld [vmem:[%s10103_s1 + $0x1d8] sm:$0xff]  ;;  %v98_v60 = vld [vmem:[%s10103_s1 + $0x1d0] sm:$0xff] }
  0x15   :  { %v101_v61 = vld [vmem:[%s10103_s1 + $0x1e8] sm:$0xff]  ;;  %v100_v62 = vld [vmem:[%s10103_s1 + $0x1e0] sm:$0xff]  ;;  %v103_v63 = vld [vmem:[%s10103_s1 + $0x1f8] sm:$0xff] }
  0x16   :  { %161 = vperm.xlu1 %6352, %v51_v11   ;;  %156 = vperm.xlu0 %6351, %v50_v12   ;;  %v102_v0 = vld [vmem:[%s10103_s1 + $0x1f0] sm:$0xff]  ;;  %v493_v4 = vld [vmem:[%s10104_s2 + $0x8] sm:$0xff]  ;;  %v492_v5 = vld [vmem:[%s10104_s2] sm:$0xff] }
  0x1a   :  { %171 = vperm.xlu1 %6352, %v53_v13   ;;  %166 = vperm.xlu0 %6351, %v52_v14  }
  0x1e   :  { %181 = vperm.xlu1 %6352, %v55_v15   ;;  %176 = vperm.xlu0 %6351, %v54_v16  }
  0x22   :  { %191 = vperm.xlu1 %6352, %v57_v17   ;;  %186 = vperm.xlu0 %6351, %v56_v18  }
  0x26   :  { %201 = vperm.xlu1 %6352, %v59_v19   ;;  %196 = vperm.xlu0 %6351, %v58_v20  }
  0x2a   :  { %211 = vperm.xlu1 %6352, %v61_v21   ;;  %206 = vperm.xlu0 %6351, %v60_v22  }
  0x2e   :  { %221 = vperm.xlu1 %6352, %v63_v23   ;;  %216 = vperm.xlu0 %6351, %v62_v24  }
  0x32   :  { %231 = vperm.xlu1 %6352, %v65_v25   ;;  %226 = vperm.xlu0 %6351, %v64_v26  }
  0x36   :  { %241 = vperm.xlu1 %6352, %v67_v27   ;;  %236 = vperm.xlu0 %6351, %v66_v28  }
  0x3a   :  { %251 = vperm.xlu1 %6352, %v69_v29   ;;  %246 = vperm.xlu0 %6351, %v68_v30  }
  0x3e   :  { %261 = vperm.xlu1 %6352, %v71_v31   ;;  %256 = vperm.xlu0 %6351, %v70_v32  }
  0x42   :  { %271 = vperm.xlu1 %6352, %v73_v33   ;;  %266 = vperm.xlu0 %6351, %v72_v34  }
  0x46   :  { %281 = vperm.xlu1 %6352, %v75_v35   ;;  %276 = vperm.xlu0 %6351, %v74_v36  }
  0x4a   :  { %291 = vperm.xlu1 %6352, %v77_v37   ;;  %286 = vperm.xlu0 %6351, %v76_v38  }
  0x4e   :  { %301 = vperm.xlu1 %6352, %v79_v39   ;;  %296 = vperm.xlu0 %6351, %v78_v40  }
  0x52   :  { %311 = vperm.xlu1 %6352, %v81_v41   ;;  %306 = vperm.xlu0 %6351, %v80_v42  }
  0x56   :  { %321 = vperm.xlu1 %6352, %v83_v43   ;;  %316 = vperm.xlu0 %6351, %v82_v44  }
  0x5a   :  { %331 = vperm.xlu1 %6352, %v85_v45   ;;  %326 = vperm.xlu0 %6351, %v84_v46  }
  0x5e   :  { %341 = vperm.xlu1 %6352, %v87_v47   ;;  %336 = vperm.xlu0 %6351, %v86_v48  }
  0x62   :  { %351 = vperm.xlu1 %6352, %v89_v49   ;;  %346 = vperm.xlu0 %6351, %v88_v50  }
  0x66   :  { %361 = vperm.xlu1 %6352, %v91_v51   ;;  %356 = vperm.xlu0 %6351, %v90_v52  }
  0x6a   :  { %371 = vperm.xlu1 %6352, %v93_v53   ;;  %366 = vperm.xlu0 %6351, %v92_v54  }
  0x6e   :  { %381 = vperm.xlu1 %6352, %v95_v55   ;;  %376 = vperm.xlu0 %6351, %v94_v56  }
  0x72   :  { %391 = vperm.xlu1 %6352, %v97_v57   ;;  %386 = vperm.xlu0 %6351, %v96_v58  }
  0x76   :  { %401 = vperm.xlu1 %6352, %v99_v59   ;;  %396 = vperm.xlu0 %6351, %v98_v60  }
  0x7a   :  { %411 = vperm.xlu1 %6352, %v101_v61   ;;  %406 = vperm.xlu0 %6351, %v100_v62  }
  0x7d   :  { %v7014_v1 = vpop.permute.xlu1 %116  ;;  %v7016_v3 = vpop.permute.xlu0 %106 }
  0x7e   :  { %10115 = vst [vmem:[#allocation6_spill] sm:$0xff] %v7016_v3  ;;  %421 = vperm.xlu1 %6352, %v103_v63   ;;  %416 = vperm.xlu0 %6351, %v102_v0  }
  0x7f   :  { %16 = vsyncpa [#allocation4], 0  ;;  %v495_v8 = vld [vmem:[%s10104_s2 + $0x18] sm:$0xff]  ;;  %v494_v9 = vld [vmem:[%s10104_s2 + $0x10] sm:$0xff]  ;;  %s6762_s24 = smov [#allocation3]  }
  0x80   :  { %v497_v12 = vld [vmem:[%s10104_s2 + $0x28] sm:$0xff]  ;;  %v496_v13 = vld [vmem:[%s10104_s2 + $0x20] sm:$0xff]  ;;  %v499_v16 = vld [vmem:[%s10104_s2 + $0x38] sm:$0xff] }
  0x81   :  { %v7024_v6 = vpop.permute.xlu1 %121  ;;  %v7026_v7 = vpop.permute.xlu0 %111  ;;  %v498_v17 = vld [vmem:[%s10104_s2 + $0x30] sm:$0xff]  ;;  %v501_v20 = vld [vmem:[%s10104_s2 + $0x48] sm:$0xff]  ;;  %v500_v21 = vld [vmem:[%s10104_s2 + $0x40] sm:$0xff] }
  0x82   :  { %10116 = vst [vmem:[#allocation7_spill] sm:$0xff] %v7024_v6  ;;  %10117 = vst [vmem:[#allocation8_spill] sm:$0xff] %v7026_v7  ;;  %563 = vperm.xlu1 %6352, %v493_v4   ;;  %558 = vperm.xlu0 %6351, %v492_v5   ;;  %v503_v24 = vld [vmem:[%s10104_s2 + $0x58] sm:$0xff]  ;;  %v502_v25 = vld [vmem:[%s10104_s2 + $0x50] sm:$0xff] }
  0x83   :  { %v505_v28 = vld [vmem:[%s10104_s2 + $0x68] sm:$0xff]  ;;  %v504_v29 = vld [vmem:[%s10104_s2 + $0x60] sm:$0xff]  ;;  %v507_v32 = vld [vmem:[%s10104_s2 + $0x78] sm:$0xff] }
  0x84   :  { %v506_v33 = vld [vmem:[%s10104_s2 + $0x70] sm:$0xff]  ;;  %v509_v36 = vld [vmem:[%s10104_s2 + $0x88] sm:$0xff]  ;;  %v508_v37 = vld [vmem:[%s10104_s2 + $0x80] sm:$0xff] }
  0x85   :  { %v7034_v10 = vpop.permute.xlu1 %131  ;;  %v7036_v11 = vpop.permute.xlu0 %126  ;;  %v511_v40 = vld [vmem:[%s10104_s2 + $0x98] sm:$0xff]  ;;  %v510_v41 = vld [vmem:[%s10104_s2 + $0x90] sm:$0xff]  ;;  %v513_v44 = vld [vmem:[%s10104_s2 + $0xa8] sm:$0xff] }
  0x86   :  { %573 = vperm.xlu1 %6352, %v495_v8   ;;  %568 = vperm.xlu0 %6351, %v494_v9   ;;  %v512_v45 = vld [vmem:[%s10104_s2 + $0xa0] sm:$0xff]  ;;  %v515_v48 = vld [vmem:[%s10104_s2 + $0xb8] sm:$0xff]  ;;  %v514_v49 = vld [vmem:[%s10104_s2 + $0xb0] sm:$0xff] }
  0x87   :  { %v517_v52 = vld [vmem:[%s10104_s2 + $0xc8] sm:$0xff]  ;;  %v516_v53 = vld [vmem:[%s10104_s2 + $0xc0] sm:$0xff]  ;;  %v519_v56 = vld [vmem:[%s10104_s2 + $0xd8] sm:$0xff] }
  0x88   :  { %v518_v57 = vld [vmem:[%s10104_s2 + $0xd0] sm:$0xff]  ;;  %v521_v60 = vld [vmem:[%s10104_s2 + $0xe8] sm:$0xff]  ;;  %v520_v61 = vld [vmem:[%s10104_s2 + $0xe0] sm:$0xff] }
  0x89   :  { %v7044_v14 = vpop.permute.xlu1 %141  ;;  %v7046_v15 = vpop.permute.xlu0 %136  ;;  %v523_v0 = vld [vmem:[%s10104_s2 + $0xf8] sm:$0xff]  ;;  %v522_v4 = vld [vmem:[%s10104_s2 + $0xf0] sm:$0xff]  ;;  %v525_v9 = vld [vmem:[%s10104_s2 + $0x108] sm:$0xff] }
  0x8a   :  { %583 = vperm.xlu1 %6352, %v497_v12   ;;  %578 = vperm.xlu0 %6351, %v496_v13   ;;  %v524_v12 = vld [vmem:[%s10104_s2 + $0x100] sm:$0xff] }
  0x8d   :  { %v7054_v18 = vpop.permute.xlu1 %151  ;;  %v7056_v19 = vpop.permute.xlu0 %146 }
  0x8e   :  { %593 = vperm.xlu1 %6352, %v499_v16   ;;  %588 = vperm.xlu0 %6351, %v498_v17   ;;  %v527_v17 = vld [vmem:[%s10104_s2 + $0x118] sm:$0xff] }
  0x91   :  { %v7064_v22 = vpop.permute.xlu1 %161  ;;  %v7066_v23 = vpop.permute.xlu0 %156 }
  0x92   :  { %603 = vperm.xlu1 %6352, %v501_v20   ;;  %598 = vperm.xlu0 %6351, %v500_v21   ;;  %v526_v20 = vld [vmem:[%s10104_s2 + $0x110] sm:$0xff] }
  0x95   :  { %v7074_v26 = vpop.permute.xlu1 %171  ;;  %v7076_v27 = vpop.permute.xlu0 %166 }
  0x96   :  { %613 = vperm.xlu1 %6352, %v503_v24   ;;  %608 = vperm.xlu0 %6351, %v502_v25   ;;  %v529_v25 = vld [vmem:[%s10104_s2 + $0x128] sm:$0xff] }
  0x99   :  { %v7084_v30 = vpop.permute.xlu1 %181  ;;  %v7086_v31 = vpop.permute.xlu0 %176 }
  0x9a   :  { %623 = vperm.xlu1 %6352, %v505_v28   ;;  %618 = vperm.xlu0 %6351, %v504_v29   ;;  %v528_v28 = vld [vmem:[%s10104_s2 + $0x120] sm:$0xff] }
  0x9d   :  { %v7094_v34 = vpop.permute.xlu1 %191  ;;  %v7096_v35 = vpop.permute.xlu0 %186 }
  0x9e   :  { %10118 = vst [vmem:[#allocation9_spill] sm:$0xff] %v7094_v34  ;;  %10119 = vst [vmem:[#allocation10_spill] sm:$0xff] %v7096_v35  ;;  %633 = vperm.xlu1 %6352, %v507_v32   ;;  %628 = vperm.xlu0 %6351, %v506_v33   ;;  %v531_v33 = vld [vmem:[%s10104_s2 + $0x138] sm:$0xff]  ;;  %v1016_v35 = vld [vmem:[%s10105_s3 + $0x40] sm:$0xff] }
  0xa1   :  { %v7104_v38 = vpop.permute.xlu1 %201  ;;  %v7106_v39 = vpop.permute.xlu0 %196 }
  0xa2   :  { %10120 = vst [vmem:[#allocation11_spill] sm:$0xff] %v7104_v38  ;;  %10121 = vst [vmem:[#allocation12_spill] sm:$0xff] %v7106_v39  ;;  %643 = vperm.xlu1 %6352, %v509_v36   ;;  %638 = vperm.xlu0 %6351, %v508_v37   ;;  %v530_v36 = vld [vmem:[%s10104_s2 + $0x130] sm:$0xff] }
  0xa3   :  { %v1014_v38 = vld [vmem:[%s10105_s3 + $0x30] sm:$0xff] }
  0xa4   :  { %v1046_v39 = vld [vmem:[%s10105_s3 + $0x130] sm:$0xff] }
  0xa5   :  { %v7114_v42 = vpop.permute.xlu1 %211  ;;  %v7116_v43 = vpop.permute.xlu0 %206 }
  0xa6   :  { %10122 = vst [vmem:[#allocation13_spill] sm:$0xff] %v7114_v42  ;;  %10123 = vst [vmem:[#allocation14_spill] sm:$0xff] %v7116_v43  ;;  %653 = vperm.xlu1 %6352, %v511_v40   ;;  %648 = vperm.xlu0 %6351, %v510_v41   ;;  %v533_v41 = vld [vmem:[%s10104_s2 + $0x148] sm:$0xff]  ;;  %v1012_v42 = vld [vmem:[%s10105_s3 + $0x20] sm:$0xff] }
  0xa7   :  { %v1044_v43 = vld [vmem:[%s10105_s3 + $0x120] sm:$0xff] }
  0xa9   :  { %v7124_v46 = vpop.permute.xlu1 %221  ;;  %v7126_v47 = vpop.permute.xlu0 %216 }
  0xaa   :  { %10124 = vst [vmem:[#allocation15_spill] sm:$0xff] %v7124_v46  ;;  %10125 = vst [vmem:[#allocation16_spill] sm:$0xff] %v7126_v47  ;;  %663 = vperm.xlu1 %6352, %v513_v44   ;;  %658 = vperm.xlu0 %6351, %v512_v45   ;;  %v532_v44 = vld [vmem:[%s10104_s2 + $0x140] sm:$0xff]  ;;  %v1010_v46 = vld [vmem:[%s10105_s3 + $0x10] sm:$0xff] }
  0xab   :  { %v1042_v47 = vld [vmem:[%s10105_s3 + $0x110] sm:$0xff] }
  0xad   :  { %v7134_v50 = vpop.permute.xlu1 %231  ;;  %v7136_v51 = vpop.permute.xlu0 %226 }
  0xae   :  { %10126 = vst [vmem:[#allocation17_spill] sm:$0xff] %v7134_v50  ;;  %10127 = vst [vmem:[#allocation18_spill] sm:$0xff] %v7136_v51  ;;  %673 = vperm.xlu1 %6352, %v515_v48   ;;  %668 = vperm.xlu0 %6351, %v514_v49   ;;  %v535_v49 = vld [vmem:[%s10104_s2 + $0x158] sm:$0xff]  ;;  %v1008_v50 = vld [vmem:[%s10105_s3] sm:$0xff] }
  0xaf   :  { %v554_v51 = vld [vmem:[%s10104_s2 + $0x1f0] sm:$0xff] }
  0xb1   :  { %v7144_v54 = vpop.permute.xlu1 %241  ;;  %v7146_v55 = vpop.permute.xlu0 %236 }
  0xb2   :  { %10128 = vst [vmem:[#allocation19_spill] sm:$0xff] %v7144_v54  ;;  %10129 = vst [vmem:[#allocation20_spill] sm:$0xff] %v7146_v55  ;;  %683 = vperm.xlu1 %6352, %v517_v52   ;;  %678 = vperm.xlu0 %6351, %v516_v53   ;;  %v534_v52 = vld [vmem:[%s10104_s2 + $0x150] sm:$0xff]  ;;  %v1040_v54 = vld [vmem:[%s10105_s3 + $0x100] sm:$0xff] }
  0xb5   :  { %v7154_v58 = vpop.permute.xlu1 %251  ;;  %v7156_v59 = vpop.permute.xlu0 %246 }
  0xb6   :  { %10130 = vst [vmem:[#allocation21_spill] sm:$0xff] %v7154_v58  ;;  %10131 = vst [vmem:[#allocation22_spill] sm:$0xff] %v7156_v59  ;;  %693 = vperm.xlu1 %6352, %v519_v56   ;;  %688 = vperm.xlu0 %6351, %v518_v57   ;;  %v537_v57 = vld [vmem:[%s10104_s2 + $0x168] sm:$0xff]  ;;  %v548_v58 = vld [vmem:[%s10104_s2 + $0x1c0] sm:$0xff] }
  0xb9   :  { %v7164_v62 = vpop.permute.xlu1 %261  ;;  %v7166_v63 = vpop.permute.xlu0 %256 }
  0xba   :  { %10132 = vst [vmem:[#allocation23_spill] sm:$0xff] %v7164_v62  ;;  %10133 = vst [vmem:[#allocation24_spill] sm:$0xff] %v7166_v63  ;;  %703 = vperm.xlu1 %6352, %v521_v60   ;;  %698 = vperm.xlu0 %6351, %v520_v61   ;;  %v536_v60 = vld [vmem:[%s10104_s2 + $0x160] sm:$0xff]  ;;  %v546_v62 = vld [vmem:[%s10104_s2 + $0x1b0] sm:$0xff] }
  0xbd   :  { %v7174_v5 = vpop.permute.xlu1 %271  ;;  %v7176_v8 = vpop.permute.xlu0 %266 }
  0xbe   :  { %10134 = vst [vmem:[#allocation25_spill] sm:$0xff] %v7174_v5  ;;  %10135 = vst [vmem:[#allocation26_spill] sm:$0xff] %v7176_v8  ;;  %713 = vperm.xlu1 %6352, %v523_v0   ;;  %708 = vperm.xlu0 %6351, %v522_v4   ;;  %v539_v4 = vld [vmem:[%s10104_s2 + $0x178] sm:$0xff]  ;;  %v1064_v5 = vld [vmem:[%s10105_s3 + $0x1c0] sm:$0xff] }
  0xbf   :  { %v7559_v8 = vld [vmem:[%s10102_s0 + $0x1] ss:$0 sm:$0xff] }
  0xc1   :  { %v7184_v13 = vpop.permute.xlu1 %281  ;;  %v7186_v16 = vpop.permute.xlu0 %276 }
  0xc2   :  { %10136 = vst [vmem:[#allocation27_spill] sm:$0xff] %v7184_v13  ;;  %10137 = vst [vmem:[#allocation28_spill] sm:$0xff] %v7186_v16  ;;  %723 = vperm.xlu1 %6352, %v525_v9   ;;  %718 = vperm.xlu0 %6351, %v524_v12   ;;  %v538_v9 = vld [vmem:[%s10104_s2 + $0x170] sm:$0xff] }
  0xc3   :  { %v1062_v13 = vld [vmem:[%s10105_s3 + $0x1b0] sm:$0xff] }
  0xc5   :  { %v7194_v21 = vpop.permute.xlu1 %291  ;;  %v7196_v24 = vpop.permute.xlu0 %286 }
  0xc6   :  { %733 = vperm.xlu1 %6352, %v527_v17   ;;  %728 = vperm.xlu0 %6351, %v526_v20   ;;  %v1022_v20 = vld [vmem:[%s10105_s3 + $0x70] sm:$0xff] }
  0xc9   :  { %v7204_v29 = vpop.permute.xlu1 %301  ;;  %v7206_v32 = vpop.permute.xlu0 %296 }
  0xca   :  { %743 = vperm.xlu1 %6352, %v529_v25   ;;  %738 = vperm.xlu0 %6351, %v528_v28   ;;  %v540_v25 = vld [vmem:[%s10104_s2 + $0x180] sm:$0xff] }
  0xcd   :  { %v7214_v37 = vpop.permute.xlu1 %311  ;;  %v7216_v40 = vpop.permute.xlu0 %306 }
  0xce   :  { %753 = vperm.xlu1 %6352, %v531_v33   ;;  %748 = vperm.xlu0 %6351, %v530_v36   ;;  %v1054_v36 = vld [vmem:[%s10105_s3 + $0x170] sm:$0xff] }
  0xd1   :  { %v7224_v45 = vpop.permute.xlu1 %321  ;;  %v7226_v48 = vpop.permute.xlu0 %316 }
  0xd2   :  { %763 = vperm.xlu1 %6352, %v533_v41   ;;  %758 = vperm.xlu0 %6351, %v532_v44   ;;  %v1023_v41 = vld [vmem:[%s10105_s3 + $0x78] sm:$0xff] }
  0xd5   :  { %v7234_v53 = vpop.permute.xlu1 %331  ;;  %v7236_v56 = vpop.permute.xlu0 %326 }
  0xd6   :  { %773 = vperm.xlu1 %6352, %v535_v49   ;;  %768 = vperm.xlu0 %6351, %v534_v52   ;;  %v1020_v52 = vld [vmem:[%s10105_s3 + $0x60] sm:$0xff] }
  0xd9   :  { %v7244_v61 = vpop.permute.xlu1 %341  ;;  %v7246_v0 = vpop.permute.xlu0 %336 }
  0xda   :  { %783 = vperm.xlu1 %6352, %v537_v57   ;;  %778 = vperm.xlu0 %6351, %v536_v60   ;;  %v1055_v57 = vld [vmem:[%s10105_s3 + $0x178] sm:$0xff] }
  0xdd   :  { %v7254_v12 = vpop.permute.xlu1 %351  ;;  %v7256_v17 = vpop.permute.xlu0 %346 }
  0xde   :  { %10138 = vst [vmem:[#allocation29_spill] sm:$0xff] %v7254_v12  ;;  %10139 = vst [vmem:[#allocation30_spill] sm:$0xff] %v7256_v17  ;;  %793 = vperm.xlu1 %6352, %v539_v4   ;;  %788 = vperm.xlu0 %6351, %v538_v9   ;;  %v1052_v9 = vld [vmem:[%s10105_s3 + $0x160] sm:$0xff]  ;;  %v1050_v17 = vld [vmem:[%s10105_s3 + $0x150] sm:$0xff] }
  0xe1   :  { %v7264_v28 = vpop.permute.xlu1 %361  ;;  %v7266_v33 = vpop.permute.xlu0 %356 }
  0xe2   :  { %10140 = vst [vmem:[#allocation31_spill] sm:$0xff] %v7264_v28  ;;  %10141 = vst [vmem:[#allocation32_spill] sm:$0xff] %v7266_v33  ;;  %1144 = vperm.xlu1 %6352, %v1022_v20   ;;  %798 = vperm.xlu0 %6351, %v540_v25   ;;  %v1021_v20 = vld [vmem:[%s10105_s3 + $0x68] sm:$0xff]  ;;  %v1048_v33 = vld [vmem:[%s10105_s3 + $0x140] sm:$0xff] }
  0xe5   :  { %v7274_v44 = vpop.permute.xlu1 %371  ;;  %v7276_v49 = vpop.permute.xlu0 %366 }
  0xe6   :  { %10142 = vst [vmem:[#allocation33_spill] sm:$0xff] %v7274_v44  ;;  %10143 = vst [vmem:[#allocation34_spill] sm:$0xff] %v7276_v49  ;;  %1304 = vperm.xlu1 %6352, %v1054_v36   ;;  %1149 = vperm.xlu0 %6351, %v1023_v41   ;;  %v1018_v41 = vld [vmem:[%s10105_s3 + $0x50] sm:$0xff] }
  0xe9   :  { %v7284_v60 = vpop.permute.xlu1 %381  ;;  %v7286_v4 = vpop.permute.xlu0 %376 }
  0xea   :  { %10144 = vst [vmem:[#allocation35_spill] sm:$0xff] %v7284_v60  ;;  %10145 = vst [vmem:[#allocation36_spill] sm:$0xff] %v7286_v4  ;;  %1134 = vperm.xlu1 %6352, %v1020_v52   ;;  %1309 = vperm.xlu0 %6351, %v1055_v57   ;;  %v1053_v52 = vld [vmem:[%s10105_s3 + $0x168] sm:$0xff] }
  0xed   :  { %v7294_v25 = vpop.permute.xlu1 %391  ;;  %v7296_v36 = vpop.permute.xlu0 %386 }
  0xee   :  { %10146 = vst [vmem:[#allocation37_spill] sm:$0xff] %v7294_v25  ;;  %10147 = vst [vmem:[#allocation38_spill] sm:$0xff] %v7296_v36  ;;  %1294 = vperm.xlu1 %6352, %v1052_v9   ;;  %1139 = vperm.xlu0 %6351, %v1021_v20   ;;  %v1019_v9 = vld [vmem:[%s10105_s3 + $0x58] sm:$0xff] }
  0xf1   :  { %v7304_v57 = vpop.permute.xlu1 %401  ;;  %v7306_v2 = vpop.permute.xlu0 %396 }
  0xf2   :  { %10148 = vst [vmem:[#allocation39_spill] sm:$0xff] %v7304_v57  ;;  %10149 = vst [vmem:[#allocation40_spill] sm:$0xff] %v7306_v2  ;;  %1124 = vperm.xlu1 %6352, %v1018_v41   ;;  %1299 = vperm.xlu0 %6351, %v1053_v52   ;;  %v1051_v41 = vld [vmem:[%s10105_s3 + $0x158] sm:$0xff] }
  0xf5   :  { %v7314_v20 = vpop.permute.xlu1 %411  ;;  %v7316_v12 = vpop.permute.xlu0 %406 }
  0xf6   :  { %10150 = vst [vmem:[#allocation41_spill] sm:$0xff] %v7314_v20  ;;  %10151 = vst [vmem:[#allocation42_spill] sm:$0xff] %v7316_v12  ;;  %1284 = vperm.xlu1 %6352, %v1050_v17   ;;  %1129 = vperm.xlu0 %6351, %v1019_v9   ;;  %v1017_v17 = vld [vmem:[%s10105_s3 + $0x48] sm:$0xff] }
  0xf9   :  { %v7324_v52 = vpop.permute.xlu1 %421  ;;  %v7326_v34 = vpop.permute.xlu0 %416 }
  0xfa   :  { %10152 = vst [vmem:[#allocation43_spill] sm:$0xff] %v7324_v52  ;;  %10153 = vst [vmem:[#allocation44_spill] sm:$0xff] %v7326_v34  ;;  %1114 = vperm.xlu1 %6352, %v1016_v35   ;;  %1289 = vperm.xlu0 %6351, %v1051_v41   ;;  %v1049_v35 = vld [vmem:[%s10105_s3 + $0x148] sm:$0xff]  ;;  %v1066_v52 = vld [vmem:[%s10105_s3 + $0x1d0] sm:$0xff] }
  0xfd   :  { %v7334_v9 = vpop.permute.xlu1 %563  ;;  %v7336_v28 = vpop.permute.xlu0 %558 }
  0xfe   :  { %10154 = vst [vmem:[#allocation45_spill] sm:$0xff] %v7334_v9  ;;  %10155 = vst [vmem:[#allocation46_spill] sm:$0xff] %v7336_v28  ;;  %1274 = vperm.xlu1 %6352, %v1048_v33   ;;  %1119 = vperm.xlu0 %6351, %v1017_v17   ;;  %v1015_v33 = vld [vmem:[%s10105_s3 + $0x38] sm:$0xff] }
 0x101   :  { %v7344_v41 = vpop.permute.xlu1 %573  ;;  %v7346_v44 = vpop.permute.xlu0 %568 }
 0x102   :  { %10156 = vst [vmem:[#allocation47_spill] sm:$0xff] %v7344_v41  ;;  %1104 = vperm.xlu1 %6352, %v1014_v38   ;;  %1279 = vperm.xlu0 %6351, %v1049_v35   ;;  %v1047_v38 = vld [vmem:[%s10105_s3 + $0x138] sm:$0xff] }
 0x105   :  { %v7354_v17 = vpop.permute.xlu1 %583  ;;  %v7356_v49 = vpop.permute.xlu0 %578 }
 0x106   :  { %1264 = vperm.xlu1 %6352, %v1046_v39   ;;  %1109 = vperm.xlu0 %6351, %v1015_v33   ;;  %v1013_v39 = vld [vmem:[%s10105_s3 + $0x28] sm:$0xff] }
 0x109   :  { %v7364_v35 = vpop.permute.xlu1 %593  ;;  %v7366_v60 = vpop.permute.xlu0 %588 }
 0x10a   :  { %1094 = vperm.xlu1 %6352, %v1012_v42   ;;  %1269 = vperm.xlu0 %6351, %v1047_v38   ;;  %v1045_v42 = vld [vmem:[%s10105_s3 + $0x128] sm:$0xff] }
 0x10d   :  { %v7374_v33 = vpop.permute.xlu1 %603  ;;  %v7376_v4 = vpop.permute.xlu0 %598 }
 0x10e   :  { %1254 = vperm.xlu1 %6352, %v1044_v43   ;;  %1099 = vperm.xlu0 %6351, %v1013_v39   ;;  %v1011_v43 = vld [vmem:[%s10105_s3 + $0x18] sm:$0xff] }
 0x111   :  { %v7384_v38 = vpop.permute.xlu1 %613  ;;  %v7386_v25 = vpop.permute.xlu0 %608 }
 0x112   :  { %1084 = vperm.xlu1 %6352, %v1010_v46   ;;  %1259 = vperm.xlu0 %6351, %v1045_v42   ;;  %v1043_v46 = vld [vmem:[%s10105_s3 + $0x118] sm:$0xff] }
 0x115   :  { %v7394_v39 = vpop.permute.xlu1 %623  ;;  %v7396_v36 = vpop.permute.xlu0 %618 }
 0x116   :  { %1244 = vperm.xlu1 %6352, %v1042_v47   ;;  %1089 = vperm.xlu0 %6351, %v1011_v43   ;;  %v1009_v47 = vld [vmem:[%s10105_s3 + $0x8] sm:$0xff]  ;;  %v893_v41 = vmul.f32 %v7559_v8, %v7394_v39 }
 0x119   :  { %v7404_v42 = vpop.permute.xlu1 %633  ;;  %v7406_v57 = vpop.permute.xlu0 %628 }
 0x11a   :  { %1074 = vperm.xlu1 %6352, %v1008_v50   ;;  %1249 = vperm.xlu0 %6351, %v1043_v46   ;;  %v555_v50 = vld [vmem:[%s10104_s2 + $0x1f8] sm:$0xff]  ;;  %v895_v3 = vmul.f32 %v7559_v8, %v7404_v42 }
 0x11d   :  { %v7414_v43 = vpop.permute.xlu1 %643  ;;  %v7416_v2 = vpop.permute.xlu0 %638 }
 0x11e   :  { %10157 = vst [vmem:[#allocation48_spill] sm:$0xff] %v7414_v43  ;;  %10158 = vst [vmem:[#allocation49_spill] sm:$0xff] %v7416_v2  ;;  %868 = vperm.xlu1 %6352, %v554_v51   ;;  %1079 = vperm.xlu0 %6351, %v1009_v47   ;;  %v1038_v2 = vld [vmem:[%s10105_s3 + $0xf0] sm:$0xff]  ;;  %v1041_v51 = vld [vmem:[%s10105_s3 + $0x108] sm:$0xff] }
 0x121   :  { %v7424_v46 = vpop.permute.xlu1 %653  ;;  %v7426_v20 = vpop.permute.xlu0 %648 }
 0x122   :  { %10159 = vst [vmem:[#allocation50_spill] sm:$0xff] %v7424_v46  ;;  %10160 = vst [vmem:[#allocation51_spill] sm:$0xff] %v7426_v20  ;;  %1234 = vperm.xlu1 %6352, %v1040_v54   ;;  %873 = vperm.xlu0 %6351, %v555_v50   ;;  %v552_v46 = vld [vmem:[%s10104_s2 + $0x1e0] sm:$0xff]  ;;  %v1039_v54 = vld [vmem:[%s10105_s3 + $0xf8] sm:$0xff] }
 0x125   :  { %v7434_v47 = vpop.permute.xlu1 %663  ;;  %v7436_v43 = vpop.permute.xlu0 %658 }
 0x126   :  { %10161 = vst [vmem:[#allocation52_spill] sm:$0xff] %v7434_v47  ;;  %10162 = vst [vmem:[#allocation53_spill] sm:$0xff] %v7436_v43  ;;  %1224 = vperm.xlu1 %6352, %v1038_v2   ;;  %1239 = vperm.xlu0 %6351, %v1041_v51   ;;  %v1070_v47 = vld [vmem:[%s10105_s3 + $0x1f0] sm:$0xff]  ;;  %v553_v2 = vld [vmem:[%s10104_s2 + $0x1e8] sm:$0xff] }
 0x129   :  { %v7444_v50 = vpop.permute.xlu1 %673  ;;  %v7446_v20 = vpop.permute.xlu0 %668 }
 0x12a   :  { %10163 = vst [vmem:[#allocation54_spill] sm:$0xff] %v7444_v50  ;;  %10164 = vst [vmem:[#allocation55_spill] sm:$0xff] %v7446_v20  ;;  %858 = vperm.xlu1 %6352, %v552_v46   ;;  %1229 = vperm.xlu0 %6351, %v1039_v54   ;;  %v1036_v50 = vld [vmem:[%s10105_s3 + $0xe0] sm:$0xff]  ;;  %v1071_v46 = vld [vmem:[%s10105_s3 + $0x1f8] sm:$0xff] }
 0x12d   :  { %v7454_v51 = vpop.permute.xlu1 %683  ;;  %v7456_v43 = vpop.permute.xlu0 %678 }
 0x12e   :  { %10165 = vst [vmem:[#allocation56_spill] sm:$0xff] %v7454_v51  ;;  %10166 = vst [vmem:[#allocation57_spill] sm:$0xff] %v7456_v43  ;;  %1384 = vperm.xlu1 %6352, %v1070_v47   ;;  %863 = vperm.xlu0 %6351, %v553_v2   ;;  %v550_v51 = vld [vmem:[%s10104_s2 + $0x1d0] sm:$0xff]  ;;  %v1037_v47 = vld [vmem:[%s10105_s3 + $0xe8] sm:$0xff] }
 0x131   :  { %v7464_v54 = vpop.permute.xlu1 %693  ;;  %v7466_v20 = vpop.permute.xlu0 %688 }
 0x132   :  { %10167 = vst [vmem:[#allocation58_spill] sm:$0xff] %v7464_v54  ;;  %10168 = vst [vmem:[#allocation59_spill] sm:$0xff] %v7466_v20  ;;  %1214 = vperm.xlu1 %6352, %v1036_v50   ;;  %1389 = vperm.xlu0 %6351, %v1071_v46   ;;  %v1068_v54 = vld [vmem:[%s10105_s3 + $0x1e0] sm:$0xff]  ;;  %v551_v50 = vld [vmem:[%s10104_s2 + $0x1d8] sm:$0xff] }
 0x133   :  { %v1034_v20 = vld [vmem:[%s10105_s3 + $0xd0] sm:$0xff] }
 0x135   :  { %v7474_v2 = vpop.permute.xlu1 %703  ;;  %v7476_v43 = vpop.permute.xlu0 %698 }
 0x136   :  { %10169 = vst [vmem:[#allocation60_spill] sm:$0xff] %v7474_v2  ;;  %10170 = vst [vmem:[#allocation61_spill] sm:$0xff] %v7476_v43  ;;  %848 = vperm.xlu1 %6352, %v550_v51   ;;  %1219 = vperm.xlu0 %6351, %v1037_v47   ;;  %v1069_v51 = vld [vmem:[%s10105_s3 + $0x1e8] sm:$0xff]  ;;  %v1032_v43 = vld [vmem:[%s10105_s3 + $0xc0] sm:$0xff] }
 0x139   :  { %v7484_v46 = vpop.permute.xlu1 %713  ;;  %v7486_v55 = vpop.permute.xlu0 %708 }
 0x13a   :  { %10171 = vst [vmem:[#allocation62_spill] sm:$0xff] %v7484_v46  ;;  %10172 = vst [vmem:[#allocation63_spill] sm:$0xff] %v7486_v55  ;;  %1374 = vperm.xlu1 %6352, %v1068_v54   ;;  %853 = vperm.xlu0 %6351, %v551_v50   ;;  %v1035_v54 = vld [vmem:[%s10105_s3 + $0xd8] sm:$0xff] }
 0x13d   :  { %v7494_v47 = vpop.permute.xlu1 %723  ;;  %v7496_v12 = vpop.permute.xlu0 %718 }
 0x13e   :  { %10173 = vst [vmem:[#allocation64_spill] sm:$0xff] %v7494_v47  ;;  %10174 = vst [vmem:[#allocation65_spill] sm:$0xff] %v7496_v12  ;;  %1204 = vperm.xlu1 %6352, %v1034_v20   ;;  %1379 = vperm.xlu0 %6351, %v1069_v51   ;;  %v549_v20 = vld [vmem:[%s10104_s2 + $0x1c8] sm:$0xff]  ;;  %v1030_v47 = vld [vmem:[%s10105_s3 + $0xb0] sm:$0xff]  ;;  %v894_v12 = vmul.f32 %v7559_v8, %v7406_v57 }
 0x13f   :  { %v545_v57 = vld [vmem:[%s10104_s2 + $0x1a8] sm:$0xff] }
 0x141   :  { %v7504_v50 = vpop.permute.xlu1 %733  ;;  %v7506_v2 = vpop.permute.xlu0 %728 }
 0x142   :  { %10175 = vst [vmem:[#allocation66_spill] sm:$0xff] %v7504_v50  ;;  %10176 = vst [vmem:[#allocation67_spill] sm:$0xff] %v7506_v2  ;;  %838 = vperm.xlu1 %6352, %v548_v58   ;;  %1209 = vperm.xlu0 %6351, %v1035_v54   ;;  %v1067_v58 = vld [vmem:[%s10105_s3 + $0x1d8] sm:$0xff]  ;;  %v892_v2 = vmul.f32 %v7559_v8, %v7396_v36 }
 0x145   :  { %v7514_v51 = vpop.permute.xlu1 %743  ;;  %v7516_v59 = vpop.permute.xlu0 %738 }
 0x146   :  { %1364 = vperm.xlu1 %6352, %v1066_v52   ;;  %843 = vperm.xlu0 %6351, %v549_v20   ;;  %v1033_v52 = vld [vmem:[%s10105_s3 + $0xc8] sm:$0xff] }
 0x149   :  { %v7524_v54 = vpop.permute.xlu1 %753  ;;  %v7526_v34 = vpop.permute.xlu0 %748 }
 0x14a   :  { %1194 = vperm.xlu1 %6352, %v1032_v43   ;;  %1369 = vperm.xlu0 %6351, %v1067_v58   ;;  %v547_v43 = vld [vmem:[%s10104_s2 + $0x1b8] sm:$0xff] }
 0x14d   :  { %v7534_v20 = vpop.permute.xlu1 %763  ;;  %v7536_v46 = vpop.permute.xlu0 %758 }
 0x14e   :  { %828 = vperm.xlu1 %6352, %v546_v62   ;;  %1199 = vperm.xlu0 %6351, %v1033_v52   ;;  %v1065_v62 = vld [vmem:[%s10105_s3 + $0x1c8] sm:$0xff] }
 0x151   :  { %v7544_v58 = vpop.permute.xlu1 %773  ;;  %v7546_v63 = vpop.permute.xlu0 %768 }
 0x152   :  { %1354 = vperm.xlu1 %6352, %v1064_v5   ;;  %833 = vperm.xlu0 %6351, %v547_v43   ;;  %v544_v5 = vld [vmem:[%s10104_s2 + $0x1a0] sm:$0xff]  ;;  %v1031_v43 = vld [vmem:[%s10105_s3 + $0xb8] sm:$0xff] }
 0x155   :  { %v7554_v52 = vpop.permute.xlu1 %783  ;;  %v779_v55 = vpop.permute.xlu0 %778 }
 0x156   :  { %1184 = vperm.xlu1 %6352, %v1030_v47   ;;  %1359 = vperm.xlu0 %6351, %v1065_v62   ;;  %v7572_v47 = vld [vmem:[%s10102_s0] ss:$0 sm:$0xff] }
 0x157   :  { %v442_v9 = vmul.f32 %v7572_v47, %v7086_v31  ;;  %v443_v31 = vmul.f32 %v7572_v47, %v7084_v30  ;;  %v475_v36 = vmul.f32 %v7572_v47, %v7244_v61  ;;  %v472_v39 = vmul.f32 %v7572_v47, %v7236_v56  ;;  %v543_v56 = vld [vmem:[%s10104_s2 + $0x198] sm:$0xff] }
 0x159   :  { %v794_v62 = vpop.permute.xlu1 %793  ;;  %v789_v7 = vpop.permute.xlu0 %788  ;;  %v958_v28 = vadd.f32 %v894_v12, %v442_v9  ;;  %v1063_v12 = vld [vmem:[%s10105_s3 + $0x1b8] sm:$0xff]  ;;  %v959_v42 = vadd.f32 %v895_v3, %v443_v31  ;;  %v542_v3 = vld [vmem:[%s10104_s2 + $0x190] sm:$0xff] }
 0x15a   :  { %818 = vperm.xlu1 %6352, %v544_v5   ;;  %1189 = vperm.xlu0 %6351, %v1031_v43   ;;  %v926_v50 = vmul.f32 %v7559_v8, %v789_v7  ;;  %v474_v5 = vmul.f32 %v7572_v47, %v7246_v0  ;;  %v1028_v7 = vld [vmem:[%s10105_s3 + $0xa0] sm:$0xff]  ;;  %v927_v9 = vmul.f32 %v7559_v8, %v794_v62 }
 0x15c   :  { %v990_v30 = vadd.f32 %v926_v50, %v474_v5  ;;  %v924_v50 = vmul.f32 %v7559_v8, %v779_v55  ;;  %v991_v31 = vadd.f32 %v927_v9, %v475_v36  ;;  %v441_v5 = vmul.f32 %v7572_v47, %v7074_v26  ;;  %v1060_v26 = vld [vmem:[%s10105_s3 + $0x1a0] sm:$0xff] }
 0x15d   :  { %v1145_v16 = vpop.permute.xlu1 %1144  ;;  %v7585_v6 = vpop.permute.xlu0 %798  ;;  %v890_v55 = vmul.f32 %v7559_v8, %v7386_v25  ;;  %v473_v25 = vmul.f32 %v7572_v47, %v7234_v53  ;;  %v1026_v53 = vld [vmem:[%s10105_s3 + $0x90] sm:$0xff] }
 0x15e   :  { %10177 = vst [vmem:[#allocation68_spill] sm:$0xff] %v7585_v6  ;;  %v1406_v43 = vadd.f32 %v1145_v16, %v958_v28  ;;  %1344 = vperm.xlu1 %6352, %v1062_v13   ;;  %823 = vperm.xlu0 %6351, %v545_v57   ;;  %v440_v16 = vmul.f32 %v7572_v47, %v7076_v27  ;;  %v1029_v27 = vld [vmem:[%s10105_s3 + $0xa8] sm:$0xff] }
 0x15f   :  { %v957_v9 = vadd.f32 %v893_v41, %v441_v5  ;;  %v988_v36 = vadd.f32 %v924_v50, %v472_v39  ;;  %v891_v50 = vmul.f32 %v7559_v8, %v7384_v38  ;;  %v1061_v39 = vld [vmem:[%s10105_s3 + $0x1a8] sm:$0xff]  ;;  %v439_v38 = vmul.f32 %v7572_v47, %v7064_v22 }
 0x160   :  { %v1534_v13 = vmul.f32 0.2, %v1406_v43  ;;  %vm1470_vm0 = vcmp.gt.f32.partialorder %v1406_v43, 0.0  ;;  %v956_v62 = vadd.f32 %v892_v2, %v440_v16 }
 0x161   :  { %v1305_v0 = vpop.permute.xlu1 %1304  ;;  %v1150_v28 = vpop.permute.xlu0 %1149 }
 0x162   :  { %v1438_v57 = vadd.f32 %v1305_v0, %v990_v30  ;;  %v1407_v6 = vadd.f32 %v1150_v28, %v959_v42  ;;  %1174 = vperm.xlu1 %6352, %v1028_v7   ;;  %1349 = vperm.xlu0 %6351, %v1063_v12   ;;  %v1598_v30 = vsel %vm1470_vm0, %v1406_v43, %v1534_v13 }
 0x163   :  { %v925_v43 = vmul.f32 %v7559_v8, %v7554_v52 }
 0x164   :  { %v1535_v61 = vmul.f32 0.2, %v1407_v6  ;;  %vm1471_vm1 = vcmp.gt.f32.partialorder %v1407_v6, 0.0  ;;  %v1566_v2 = vmul.f32 0.2, %v1438_v57  ;;  %vm1502_vm2 = vcmp.gt.f32.partialorder %v1438_v57, 0.0 }
 0x165   :  { %v1135_v7 = vpop.permute.xlu1 %1134  ;;  %v1310_v12 = vpop.permute.xlu0 %1309 }
 0x166   :  { %v1404_v42 = vadd.f32 %v1135_v7, %v956_v62  ;;  %v1439_v16 = vadd.f32 %v1310_v12, %v991_v31  ;;  %808 = vperm.xlu1 %6352, %v542_v3   ;;  %1179 = vperm.xlu0 %6351, %v1029_v27   ;;  %v1599_v0 = vsel %vm1471_vm1, %v1407_v6, %v1535_v61 }
 0x167   :  { %v1783_v28 = vpack.c.bf16 %v1599_v0, %v1598_v30  ;;  %v438_v6 = vmul.f32 %v7572_v47, %v7066_v23  ;;  %v1630_v27 = vsel %vm1502_vm2, %v1438_v57, %v1566_v2  ;;  %v10178_v57 = vmov 0  }
 0x168   :  { %v1567_v13 = vmul.f32 0.2, %v1439_v16  ;;  %vm1503_vm3 = vcmp.gt.f32.partialorder %v1439_v16, 0.0  ;;  %v1532_v41 = vmul.f32 0.2, %v1404_v42  ;;  %vm1468_vm4 = vcmp.gt.f32.partialorder %v1404_v42, 0.0 }
 0x169   :  { %v1295_v62 = vpop.permute.xlu1 %1294  ;;  %v1140_v3 = vpop.permute.xlu0 %1139  ;;  %2833 = vmatpush1.bf16.msra.mxu0 %v1783_v28  ;;  %v954_v5 = vadd.f32 %v890_v55, %v438_v6  ;;  %v922_v2 = vmul.f32 %v7559_v8, %v7546_v63  ;;  %v989_v12 = vadd.f32 %v925_v43, %v473_v25  ;;  %v470_v30 = vmul.f32 %v7572_v47, %v7226_v48  ;;  %v541_v48 = vld [vmem:[%s10104_s2 + $0x188] sm:$0xff] }
 0x16a   :  { %v1436_v61 = vadd.f32 %v1295_v62, %v988_v36  ;;  %v1405_v31 = vadd.f32 %v1140_v3, %v957_v9  ;;  %1334 = vperm.xlu1 %6352, %v1060_v26   ;;  %813 = vperm.xlu0 %6351, %v543_v56   ;;  %v1631_v52 = vsel %vm1503_vm3, %v1439_v16, %v1567_v13  ;;  %v1027_v13 = vld [vmem:[%s10105_s3 + $0x98] sm:$0xff] }
 0x16b   :  { %v1799_v23 = vpack.c.bf16 %v1631_v52, %v1630_v27  ;;  %2834 = vmatprep.subr.bf16.mxu0 %v10178_v57  ;;  %v1596_v9 = vsel %vm1468_vm4, %v1404_v42, %v1532_v41  ;;  %v888_v56 = vmul.f32 %v7559_v8, %v7376_v4  ;;  %v955_v43 = vadd.f32 %v891_v50, %v439_v38 }
 0x16c   :  { %vm1469_vm5 = vcmp.gt.f32.partialorder %v1405_v31, 0.0  ;;  %v1533_v7 = vmul.f32 0.2, %v1405_v31  ;;  %v1564_v16 = vmul.f32 0.2, %v1436_v61  ;;  %vm1500_vm6 = vcmp.gt.f32.partialorder %v1436_v61, 0.0 }
 0x16d   :  { %v1125_v0 = vpop.permute.xlu1 %1124  ;;  %v1300_v55 = vpop.permute.xlu0 %1299  ;;  %3122 = vmatpush1.bf16.msra.mxu1 %v1799_v23  ;;  %v923_v42 = vmul.f32 %v7559_v8, %v7544_v58  ;;  %v986_v6 = vadd.f32 %v922_v2, %v470_v30  ;;  %v436_v4 = vmul.f32 %v7572_v47, %v7056_v19  ;;  %v471_v25 = vmul.f32 %v7572_v47, %v7224_v45  ;;  %v1059_v45 = vld [vmem:[%s10105_s3 + $0x198] sm:$0xff]  ;;  %v1058_v23 = vld [vmem:[%s10105_s3 + $0x190] sm:$0xff] }
 0x16e   :  { %v1402_v28 = vadd.f32 %v1125_v0, %v954_v5  ;;  %v1437_v26 = vadd.f32 %v1300_v55, %v989_v12  ;;  %1164 = vperm.xlu1 %6352, %v1026_v53   ;;  %1339 = vperm.xlu0 %6351, %v1061_v39   ;;  %v1597_v63 = vsel %vm1469_vm5, %v1405_v31, %v1533_v7 }
 0x16f   :  { %v1782_v22 = vpack.c.bf16 %v1597_v63, %v1596_v9  ;;  %3123 = vmatprep.subr.bf16.mxu1 %v10178_v57  ;;  %v1628_v27 = vsel %vm1500_vm6, %v1436_v61, %v1564_v16  ;;  %v889_v50 = vmul.f32 %v7559_v8, %v7374_v33  ;;  %v952_v5 = vadd.f32 %v888_v56, %v436_v4 }
 0x170   :  { %vm1501_vm7 = vcmp.gt.f32.partialorder %v1437_v26, 0.0  ;;  %v1565_v36 = vmul.f32 0.2, %v1437_v26  ;;  %v1530_v41 = vmul.f32 0.2, %v1402_v28  ;;  %vm1466_vm8 = vcmp.gt.f32.partialorder %v1402_v28, 0.0 }
 0x171   :  { %v1285_v62 = vpop.permute.xlu1 %1284  ;;  %v1130_v3 = vpop.permute.xlu0 %1129  ;;  %2835 = vmatpush1.bf16.msra.mxu0 %v1782_v22  ;;  %v920_v61 = vmul.f32 %v7559_v8, %v7536_v46  ;;  %v987_v39 = vadd.f32 %v923_v42, %v471_v25  ;;  %v437_v33 = vmul.f32 %v7572_v47, %v7054_v18  ;;  %v468_v2 = vmul.f32 %v7572_v47, %v7216_v40  ;;  %v1025_v40 = vld [vmem:[%s10105_s3 + $0x88] sm:$0xff] }
 0x172   :  { %v1434_v31 = vadd.f32 %v1285_v62, %v986_v6  ;;  %v1403_v52 = vadd.f32 %v1130_v3, %v955_v43  ;;  %803 = vperm.xlu1 %6352, %v541_v48   ;;  %1169 = vperm.xlu0 %6351, %v1027_v13   ;;  %v1629_v58 = vsel %vm1501_vm7, %v1437_v26, %v1565_v36  ;;  %v1024_v26 = vld [vmem:[%s10105_s3 + $0x80] sm:$0xff] }
 0x173   :  { %v1798_v19 = vpack.c.bf16 %v1629_v58, %v1628_v27  ;;  %2836 = vmatprep.subr.bf16.mxu0 %v10178_v57  ;;  %v1594_v30 = vsel %vm1466_vm8, %v1402_v28, %v1530_v41  ;;  %v886_v55 = vmul.f32 %v7559_v8, %v7366_v60  ;;  %v953_v9 = vadd.f32 %v889_v50, %v437_v33  ;;  %v1056_v41 = vld [vmem:[%s10105_s3 + $0x180] sm:$0xff] }
 0x174   :  { %vm1467_vm9 = vcmp.gt.f32.partialorder %v1403_v52, 0.0  ;;  %v1531_v53 = vmul.f32 0.2, %v1403_v52  ;;  %v1562_v7 = vmul.f32 0.2, %v1434_v31  ;;  %vm1498_vm10 = vcmp.gt.f32.partialorder %v1434_v31, 0.0 }
 0x175   :  { %v1115_v12 = vpop.permute.xlu1 %1114  ;;  %v1290_v38 = vpop.permute.xlu0 %1289  ;;  %3124 = vmatpush1.bf16.msra.mxu1 %v1798_v19  ;;  %v921_v28 = vmul.f32 %v7559_v8, %v7534_v20  ;;  %v984_v56 = vadd.f32 %v920_v61, %v468_v2  ;;  %v434_v60 = vmul.f32 %v7572_v47, %v7046_v15  ;;  %v469_v43 = vmul.f32 %v7572_v47, %v7214_v37  ;;  %v1057_v37 = vld [vmem:[%s10105_s3 + $0x188] sm:$0xff] }
 0x176   :  { %v1400_v16 = vadd.f32 %v1115_v12, %v952_v5  ;;  %v1435_v0 = vadd.f32 %v1290_v38, %v987_v39  ;;  %1329 = vperm.xlu1 %6352, %v1059_v45   ;;  %1324 = vperm.xlu0 %6351, %v1058_v23   ;;  %v1595_v46 = vsel %vm1467_vm9, %v1403_v52, %v1531_v53  ;;  %v1808_v53 = vld [vmem:[%s10107_s5] sm:$0xff] }
 0x177   :  { %v1781_v18 = vpack.c.bf16 %v1595_v46, %v1594_v30  ;;  %3125 = vmatprep.subr.bf16.mxu1 %v10178_v57  ;;  %v1626_v42 = vsel %vm1498_vm10, %v1434_v31, %v1562_v7  ;;  %v887_v4 = vmul.f32 %v7559_v8, %v7364_v35  ;;  %v950_v25 = vadd.f32 %v886_v55, %v434_v60 }
 0x178   :  { %vm1499_vm11 = vcmp.gt.f32.partialorder %v1435_v0, 0.0  ;;  %v1563_v63 = vmul.f32 0.2, %v1435_v0  ;;  %v1528_v22 = vmul.f32 0.2, %v1400_v16  ;;  %vm1464_vm12 = vcmp.gt.f32.partialorder %v1400_v16, 0.0 }
 0x179   :  { %v1275_v48 = vpop.permute.xlu1 %1274  ;;  %v1120_v13 = vpop.permute.xlu0 %1119  ;;  %2837 = vmatpush1.bf16.msra.mxu0 %v1781_v18  ;;  %v918_v62 = vmul.f32 %v7559_v8, %v7526_v34  ;;  %v985_v27 = vadd.f32 %v921_v28, %v469_v43  ;;  %v435_v35 = vmul.f32 %v7572_v47, %v7044_v14  ;;  %v466_v31 = vmul.f32 %v7572_v47, %v7206_v32  ;;  %v1809_v32 = vld [vmem:[%s10107_s5 + $0x8] sm:$0xff]  ;;  %v1811_v18 = vld [vmem:[%s10107_s5 + $0x18] sm:$0xff] }
 0x17a   :  { %v1432_v36 = vadd.f32 %v1275_v48, %v984_v56  ;;  %v1401_v6 = vadd.f32 %v1120_v13, %v953_v9  ;;  %1159 = vperm.xlu1 %6352, %v1025_v40   ;;  %1154 = vperm.xlu0 %6351, %v1024_v26   ;;  %v1627_v20 = vsel %vm1499_vm11, %v1435_v0, %v1563_v63  ;;  %v6355_v0 = vld [vmem:[%s10106_s4 + $0x4] ss:$16 sps:$4 sm:$0xff]   ;;  %v6358_v26 = vld [vmem:[%s10106_s4 + $0xc] ss:$16 sps:$4 sm:$0xff]  }
 0x17b   :  { %v1797_v15 = vpack.c.bf16 %v1627_v20, %v1626_v42  ;;  %2838 = vmatprep.subr.bf16.mxu0 %v10178_v57  ;;  %v1592_v5 = vsel %vm1464_vm12, %v1400_v16, %v1528_v22  ;;  %v884_v23 = vmul.f32 %v7559_v8, %v7356_v49  ;;  %v951_v61 = vadd.f32 %v887_v4, %v435_v35  ;;  %v1810_v40 = vld [vmem:[%s10107_s5 + $0x10] sm:$0xff]  ;;  %v1812_v4 = vld [vmem:[%s10107_s5 + $0x20] sm:$0xff] }
 0x17c   :  { %vm1465_vm13 = vcmp.gt.f32.partialorder %v1401_v6, 0.0  ;;  %v1529_v3 = vmul.f32 0.2, %v1401_v6  ;;  %v1560_v52 = vmul.f32 0.2, %v1432_v36  ;;  %vm1496_vm14 = vcmp.gt.f32.partialorder %v1432_v36, 0.0  ;;  %2864 = vmatprep.mubr.bf16.mxu0 %v6355_v0  ;;  %3153 = vmatprep.mubr.bf16.mxu1 %v6358_v26 }
 0x17d   :  { %v1105_v58 = vpop.permute.xlu1 %1104  ;;  %v1280_v50 = vpop.permute.xlu0 %1279  ;;  %3126 = vmatpush1.bf16.msra.mxu1 %v1797_v15  ;;  %v919_v39 = vmul.f32 %v7559_v8, %v7524_v54  ;;  %v982_v2 = vadd.f32 %v918_v62, %v466_v31  ;;  %v432_v49 = vmul.f32 %v7572_v47, %v7036_v11  ;;  %v467_v7 = vmul.f32 %v7572_v47, %v7204_v29  ;;  %v10185_v26 = vld [vmem:[#allocation6_spill] sm:$0xff] }
 0x17e   :  { %v1398_v19 = vadd.f32 %v1105_v58, %v950_v25  ;;  %v1433_v45 = vadd.f32 %v1280_v50, %v985_v27  ;;  %1319 = vperm.xlu1 %6352, %v1057_v37   ;;  %1314 = vperm.xlu0 %6351, %v1056_v41   ;;  %v1593_v34 = vsel %vm1465_vm13, %v1401_v6, %v1529_v3  ;;  %v10179_v58 = vld [vmem:[#allocation47_spill] sm:$0xff] }
 0x17f   :  { %v1780_v14 = vpack.c.bf16 %v1593_v34, %v1592_v5  ;;  %3127 = vmatprep.subr.bf16.mxu1 %v10178_v57  ;;  %v1624_v16 = vsel %vm1496_vm14, %v1432_v36, %v1560_v52  ;;  %v885_v29 = vmul.f32 %v7559_v8, %v7354_v17  ;;  %v948_v55 = vadd.f32 %v884_v23, %v432_v49 }
 0x180   :  { %vm1497_vm15 = vcmp.gt.f32.partialorder %v1433_v45, 0.0  ;;  %v1561_v33 = vmul.f32 0.2, %v1433_v45  ;;  %v1526_v12 = vmul.f32 0.2, %v1398_v19  ;;  %vm1462_vm0 = vcmp.gt.f32.partialorder %v1398_v19, 0.0 }
 0x181   :  { %v1265_v38 = vpop.permute.xlu1 %1264  ;;  %v1110_v30 = vpop.permute.xlu0 %1109  ;;  %2839 = vmatpush1.bf16.msra.mxu0 %v1780_v14  ;;  %v916_v17 = vmul.f32 %v7559_v8, %v7516_v59  ;;  %v983_v63 = vadd.f32 %v919_v39, %v467_v7  ;;  %v433_v56 = vmul.f32 %v7572_v47, %v7034_v10  ;;  %v464_v60 = vmul.f32 %v7572_v47, %v7196_v24  ;;  %v1813_v24 = vld [vmem:[%s10107_s5 + $0x28] sm:$0xff] }
 0x182   :  { %v1430_v54 = vadd.f32 %v1265_v38, %v982_v2  ;;  %v1399_v46 = vadd.f32 %v1110_v30, %v951_v61  ;;  %1879 = vperm.xlu1 %6352, %v1809_v32   ;;  %1874 = vperm.xlu0 %6351, %v1808_v53   ;;  %v1625_v11 = vsel %vm1497_vm15, %v1433_v45, %v1561_v33  ;;  %v10180_v45 = vld [vmem:[#allocation67_spill] sm:$0xff]  ;;  %v10182_v53 = vld [vmem:[#allocation28_spill] sm:$0xff] }
 0x183   :  { %v1796_v9 = vpack.c.bf16 %v1625_v11, %v1624_v16  ;;  %2840 = vmatprep.subr.bf16.mxu0 %v10178_v57  ;;  %v1590_v13 = vsel %vm1462_vm0, %v1398_v19, %v1526_v12  ;;  %v882_v10 = vmul.f32 %v7559_v8, %v7346_v44  ;;  %v949_v6 = vadd.f32 %v885_v29, %v433_v56  ;;  %v1814_v19 = vld [vmem:[%s10107_s5 + $0x30] sm:$0xff]  ;;  %v10183_v16 = vld [vmem:[#allocation46_spill] sm:$0xff] }
 0x184   :  { %vm1463_vm1 = vcmp.gt.f32.partialorder %v1399_v46, 0.0  ;;  %v1527_v28 = vmul.f32 0.2, %v1399_v46  ;;  %v1558_v43 = vmul.f32 0.2, %v1430_v54  ;;  %vm1494_vm2 = vcmp.gt.f32.partialorder %v1430_v54, 0.0 }
 0x185   :  { %v1095_v22 = vpop.permute.xlu1 %1094  ;;  %v1270_v48 = vpop.permute.xlu0 %1269  ;;  %3128 = vmatpush1.bf16.msra.mxu1 %v1796_v9  ;;  %v917_v25 = vmul.f32 %v7559_v8, %v7514_v51  ;;  %v980_v37 = vadd.f32 %v916_v17, %v464_v60  ;;  %v430_v44 = vmul.f32 %v7572_v47, %v7014_v1  ;;  %v465_v41 = vmul.f32 %v7572_v47, %v7194_v21  ;;  %v1815_v21 = vld [vmem:[%s10107_s5 + $0x38] sm:$0xff]  ;;  %v10181_v14 = vld [vmem:[#allocation7_spill] sm:$0xff]  ;;  %v1816_v29 = vld [vmem:[%s10107_s5 + $0x40] sm:$0xff] }
 0x186   :  { %v1396_v42 = vadd.f32 %v1095_v22, %v948_v55  ;;  %v1431_v36 = vadd.f32 %v1270_v48, %v983_v63  ;;  %1889 = vperm.xlu1 %6352, %v1811_v18   ;;  %1884 = vperm.xlu0 %6351, %v1810_v40   ;;  %v1591_v59 = vsel %vm1463_vm1, %v1399_v46, %v1527_v28  ;;  %v1817_v11 = vld [vmem:[%s10107_s5 + $0x48] sm:$0xff] }
 0x187   :  { %v1779_v20 = vpack.c.bf16 %v1591_v59, %v1590_v13  ;;  %3129 = vmatprep.subr.bf16.mxu1 %v10178_v57  ;;  %v1622_v35 = vsel %vm1494_vm2, %v1430_v54, %v1558_v43  ;;  %v883_v50 = vmul.f32 %v7559_v8, %v10179_v58  ;;  %v946_v5 = vadd.f32 %v882_v10, %v430_v44  ;;  %v10184_v55 = vld [vmem:[#allocation66_spill] sm:$0xff]  ;;  %v10186_v28 = vld [vmem:[#allocation27_spill] sm:$0xff] }
 0x188   :  { %vm1495_vm3 = vcmp.gt.f32.partialorder %v1431_v36, 0.0  ;;  %v1559_v15 = vmul.f32 0.2, %v1431_v36  ;;  %v1524_v62 = vmul.f32 0.2, %v1396_v42  ;;  %vm1460_vm4 = vcmp.gt.f32.partialorder %v1396_v42, 0.0 }
 0x189   :  { %v1255_v3 = vpop.permute.xlu1 %1254  ;;  %v1100_v27 = vpop.permute.xlu0 %1099  ;;  %2841 = vmatpush1.bf16.msra.mxu0 %v1779_v20  ;;  %v914_v34 = vmul.f32 %v7559_v8, %v10180_v45  ;;  %v981_v61 = vadd.f32 %v917_v25, %v465_v41  ;;  %v431_v32 = vmul.f32 %v7572_v47, %v10181_v14  ;;  %v462_v39 = vmul.f32 %v7572_v47, %v10182_v53  ;;  %v1818_v20 = vld [vmem:[%s10107_s5 + $0x50] sm:$0xff]  ;;  %v1820_v58 = vld [vmem:[%s10107_s5 + $0x60] sm:$0xff] }
 0x18a   :  { %v1428_v31 = vadd.f32 %v1255_v3, %v980_v37  ;;  %v1397_v52 = vadd.f32 %v1100_v27, %v949_v6  ;;  %1899 = vperm.xlu1 %6352, %v1813_v24   ;;  %1894 = vperm.xlu0 %6351, %v1812_v4   ;;  %v1623_v51 = vsel %vm1495_vm3, %v1431_v36, %v1559_v15  ;;  %v10187_v36 = vld [vmem:[#allocation45_spill] sm:$0xff]  ;;  %v10188_v15 = vld [vmem:[#allocation8_spill] sm:$0xff] }
 0x18b   :  { %v1795_v1 = vpack.c.bf16 %v1623_v51, %v1622_v35  ;;  %2842 = vmatprep.subr.bf16.mxu0 %v10178_v57  ;;  %v1588_v7 = vsel %vm1460_vm4, %v1396_v42, %v1524_v62  ;;  %v880_v0 = vmul.f32 %v7559_v8, %v10183_v16  ;;  %v947_v54 = vadd.f32 %v883_v50, %v431_v32  ;;  %v1819_v6 = vld [vmem:[%s10107_s5 + $0x58] sm:$0xff]  ;;  %v1821_v51 = vld [vmem:[%s10107_s5 + $0x68] sm:$0xff] }
 0x18c   :  { %vm1461_vm5 = vcmp.gt.f32.partialorder %v1397_v52, 0.0  ;;  %v1525_v23 = vmul.f32 0.2, %v1397_v52  ;;  %v1556_v33 = vmul.f32 0.2, %v1428_v31  ;;  %vm1492_vm6 = vcmp.gt.f32.partialorder %v1428_v31, 0.0 }
 0x18d   :  { %v1085_v2 = vpop.permute.xlu1 %1084  ;;  %v1260_v49 = vpop.permute.xlu0 %1259  ;;  %3130 = vmatpush1.bf16.msra.mxu1 %v1795_v1  ;;  %v915_v9 = vmul.f32 %v7559_v8, %v10184_v55  ;;  %v978_v40 = vadd.f32 %v914_v34, %v462_v39  ;;  %v428_v17 = vmul.f32 %v7572_v47, %v10185_v26  ;;  %v463_v63 = vmul.f32 %v7572_v47, %v10186_v28  ;;  %v10189_v50 = vld [vmem:[#allocation65_spill] sm:$0xff]  ;;  %v10191_v39 = vld [vmem:[#allocation63_spill] sm:$0xff] }
 0x18e   :  { %v1394_v12 = vadd.f32 %v1085_v2, %v946_v5  ;;  %v1429_v38 = vadd.f32 %v1260_v49, %v981_v61  ;;  %1909 = vperm.xlu1 %6352, %v1815_v21   ;;  %1904 = vperm.xlu0 %6351, %v1814_v19   ;;  %v1589_v30 = vsel %vm1461_vm5, %v1397_v52, %v1525_v23  ;;  %v10190_v19 = vld [vmem:[#allocation26_spill] sm:$0xff]  ;;  %v1823_v49 = vld [vmem:[%s10107_s5 + $0x78] sm:$0xff] }
 0x18f   :  { %v1778_v46 = vpack.c.bf16 %v1589_v30, %v1588_v7  ;;  %3131 = vmatprep.subr.bf16.mxu1 %v10178_v57  ;;  %v1620_v22 = vsel %vm1492_vm6, %v1428_v31, %v1556_v33  ;;  %v881_v59 = vmul.f32 %v7559_v8, %v10187_v36  ;;  %v944_v4 = vadd.f32 %v880_v0, %v428_v17  ;;  %v1822_v7 = vld [vmem:[%s10107_s5 + $0x70] sm:$0xff]  ;;  %v1825_v17 = vld [vmem:[%s10107_s5 + $0x88] sm:$0xff]  ;;  %v1824_v28 = vld [vmem:[%s10107_s5 + $0x80] sm:$0xff] }
 0x190   :  { %vm1493_vm7 = vcmp.gt.f32.partialorder %v1429_v38, 0.0  ;;  %v1557_v18 = vmul.f32 0.2, %v1429_v38  ;;  %v1522_v56 = vmul.f32 0.2, %v1394_v12  ;;  %vm1458_vm8 = vcmp.gt.f32.partialorder %v1394_v12, 0.0 }
 0x191   :  { %v1245_v60 = vpop.permute.xlu1 %1244  ;;  %v1090_v43 = vpop.permute.xlu0 %1089  ;;  %2843 = vmatpush1.bf16.msra.mxu0 %v1778_v46  ;;  %v979_v25 = vadd.f32 %v915_v9, %v463_v63  ;;  %v429_v37 = vmul.f32 %v7572_v47, %v10188_v15  ;;  %v912_v5 = vmul.f32 %v7559_v8, %v10189_v50  ;;  %v460_v45 = vmul.f32 %v7572_v47, %v10190_v19  ;;  %v10193_v0 = vld [vmem:[#allocation24_spill] sm:$0xff]  ;;  %v10194_v46 = vld [vmem:[#allocation25_spill] sm:$0xff]  ;;  %v10195_v63 = vld [vmem:[#allocation62_spill] sm:$0xff] }
 0x192   :  { %v1426_v48 = vadd.f32 %v1245_v60, %v978_v40  ;;  %v1395_v13 = vadd.f32 %v1090_v43, %v947_v54  ;;  %1919 = vperm.xlu1 %6352, %v1817_v11   ;;  %1914 = vperm.xlu0 %6351, %v1816_v29   ;;  %v1621_v42 = vsel %vm1493_vm7, %v1429_v38, %v1557_v18  ;;  %v10197_v15 = vld [vmem:[#allocation44_spill] sm:$0xff]  ;;  %v1828_v50 = vld [vmem:[%s10107_s5 + $0xa0] sm:$0xff] }
 0x193   :  { %v1794_v10 = vpack.c.bf16 %v1621_v42, %v1620_v22  ;;  %2844 = vmatprep.subr.bf16.mxu0 %v10178_v57  ;;  %v1586_v62 = vsel %vm1458_vm8, %v1394_v12, %v1522_v56  ;;  %v945_v21 = vadd.f32 %v881_v59, %v429_v37  ;;  %v910_v33 = vmul.f32 %v7559_v8, %v10191_v39  ;;  %v10192_v12 = vld [vmem:[#allocation64_spill] sm:$0xff]  ;;  %v10199_v19 = vld [vmem:[#allocation22_spill] sm:$0xff] }
 0x194   :  { %vm1459_vm9 = vcmp.gt.f32.partialorder %v1395_v13, 0.0  ;;  %v1523_v24 = vmul.f32 0.2, %v1395_v13  ;;  %v1554_v3 = vmul.f32 0.2, %v1426_v48  ;;  %vm1490_vm10 = vcmp.gt.f32.partialorder %v1426_v48, 0.0 }
 0x195   :  { %v1075_v44 = vpop.permute.xlu1 %1074  ;;  %v1250_v41 = vpop.permute.xlu0 %1249  ;;  %3132 = vmatpush1.bf16.msra.mxu1 %v1794_v10  ;;  %v913_v38 = vmul.f32 %v7559_v8, %v10192_v12  ;;  %v976_v16 = vadd.f32 %v912_v5, %v460_v45  ;;  %v458_v54 = vmul.f32 %v7572_v47, %v10193_v0  ;;  %v461_v11 = vmul.f32 %v7572_v47, %v10194_v46 }
 0x196   :  { %v1392_v27 = vadd.f32 %v1075_v44, %v944_v4  ;;  %v1427_v35 = vadd.f32 %v1250_v41, %v979_v25  ;;  %1929 = vperm.xlu1 %6352, %v1819_v6   ;;  %1924 = vperm.xlu0 %6351, %v1818_v20   ;;  %v1587_v31 = vsel %vm1459_vm9, %v1395_v13, %v1523_v24  ;;  %v10196_v13 = vld [vmem:[#allocation23_spill] sm:$0xff]  ;;  %v1827_v6 = vld [vmem:[%s10107_s5 + $0x98] sm:$0xff] }
 0x197   :  { %v1777_v52 = vpack.c.bf16 %v1587_v31, %v1586_v62  ;;  %3133 = vmatprep.subr.bf16.mxu1 %v10178_v57  ;;  %v1618_v32 = vsel %vm1490_vm10, %v1426_v48, %v1554_v3  ;;  %v911_v56 = vmul.f32 %v7559_v8, %v10195_v63  ;;  %v974_v60 = vadd.f32 %v910_v33, %v458_v54  ;;  %v1826_v20 = vld [vmem:[%s10107_s5 + $0x90] sm:$0xff]  ;;  %v10198_v31 = vld [vmem:[#allocation61_spill] sm:$0xff] }
 0x198   :  { %vm1491_vm11 = vcmp.gt.f32.partialorder %v1427_v35, 0.0  ;;  %v1555_v1 = vmul.f32 0.2, %v1427_v35  ;;  %v1520_v61 = vmul.f32 0.2, %v1392_v27  ;;  %vm1456_vm12 = vcmp.gt.f32.partialorder %v1392_v27, 0.0 }
 0x199   :  { %v869_v34 = vpop.permute.xlu1 %868  ;;  %v1080_v23 = vpop.permute.xlu0 %1079  ;;  %2845 = vmatpush1.bf16.msra.mxu0 %v1777_v52  ;;  %v977_v43 = vadd.f32 %v913_v38, %v461_v11  ;;  %v459_v42 = vmul.f32 %v7572_v47, %v10196_v13  ;;  %v490_v37 = vmul.f32 %v7572_v47, %v10197_v15  ;;  %v908_v52 = vmul.f32 %v7559_v8, %v10198_v31  ;;  %v10202_v54 = vld [vmem:[#allocation21_spill] sm:$0xff] }
 0x19a   :  { %v1393_v14 = vadd.f32 %v1080_v23, %v945_v21  ;;  %1939 = vperm.xlu1 %6352, %v1821_v51   ;;  %1934 = vperm.xlu0 %6351, %v1820_v58   ;;  %v1619_v53 = vsel %vm1491_vm11, %v1427_v35, %v1555_v1  ;;  %v1584_v18 = vsel %vm1456_vm12, %v1392_v27, %v1520_v61  ;;  %v1829_v58 = vld [vmem:[%s10107_s5 + $0xa8] sm:$0xff] }
 0x19b   :  { %v1793_v2 = vpack.c.bf16 %v1619_v53, %v1618_v32  ;;  %2846 = vmatprep.subr.bf16.mxu0 %v10178_v57  ;;  %v942_v24 = vmul.f32 %v7559_v8, %v869_v34  ;;  %v975_v25 = vadd.f32 %v911_v56, %v459_v42  ;;  %v456_v45 = vmul.f32 %v7572_v47, %v10199_v19  ;;  %v10200_v34 = vld [vmem:[#allocation43_spill] sm:$0xff] }
 0x19c   :  { %vm1457_vm13 = vcmp.gt.f32.partialorder %v1393_v14, 0.0  ;;  %v1521_v30 = vmul.f32 0.2, %v1393_v14  ;;  %v491_v23 = vmul.f32 %v7572_v47, %v10200_v34  ;;  %v457_v46 = vmul.f32 %v7572_v47, %v10202_v54  ;;  %v10204_v42 = vld [vmem:[#allocation59_spill] sm:$0xff] }
 0x19d   :  { %v1235_v29 = vpop.permute.xlu1 %1234  ;;  %v874_v55 = vpop.permute.xlu0 %873  ;;  %3134 = vmatpush1.bf16.msra.mxu1 %v1793_v2  ;;  %v1006_v21 = vadd.f32 %v942_v24, %v490_v37  ;;  %v1831_v2 = vld [vmem:[%s10107_s5 + $0xb8] sm:$0xff]  ;;  %v972_v38 = vadd.f32 %v908_v52, %v456_v45  ;;  %v1837_v52 = vld [vmem:[%s10107_s5 + $0xe8] sm:$0xff] }
 0x19e   :  { %v1424_v9 = vadd.f32 %v1235_v29, %v976_v16  ;;  %1949 = vperm.xlu1 %6352, %v1823_v49   ;;  %1944 = vperm.xlu0 %6351, %v1822_v7   ;;  %v1585_v40 = vsel %vm1457_vm13, %v1393_v14, %v1521_v30  ;;  %v943_v5 = vmul.f32 %v7559_v8, %v874_v55  ;;  %v1830_v49 = vld [vmem:[%s10107_s5 + $0xb0] sm:$0xff]  ;;  %v10206_v37 = vld [vmem:[#allocation41_spill] sm:$0xff] }
 0x19f   :  { %v1776_v26 = vpack.c.bf16 %v1585_v40, %v1584_v18  ;;  %3135 = vmatprep.subr.bf16.mxu1 %v10178_v57  ;;  %v10201_v7 = vld [vmem:[#allocation60_spill] sm:$0xff]  ;;  %v1832_v18 = vld [vmem:[%s10107_s5 + $0xc0] sm:$0xff]  ;;  %v10208_v45 = vld [vmem:[#allocation19_spill] sm:$0xff] }
 0x1a0   :  { %v1552_v36 = vmul.f32 0.2, %v1424_v9  ;;  %vm1488_vm14 = vcmp.gt.f32.partialorder %v1424_v9, 0.0  ;;  %v909_v12 = vmul.f32 %v7559_v8, %v10201_v7  ;;  %v1007_v30 = vadd.f32 %v943_v5, %v491_v23 }
 0x1a1   :  { %v1225_v22 = vpop.permute.xlu1 %1224  ;;  %v1240_v48 = vpop.permute.xlu0 %1239  ;;  %2847 = vmatpush1.bf16.msra.mxu0 %v1776_v26  ;;  %v455_v34 = vmul.f32 %v7572_v47, %v10208_v45 }
 0x1a2   :  { %v1422_v59 = vadd.f32 %v1225_v22, %v974_v60  ;;  %v1425_v10 = vadd.f32 %v1240_v48, %v977_v43  ;;  %1959 = vperm.xlu1 %6352, %v1825_v17   ;;  %1954 = vperm.xlu0 %6351, %v1824_v28   ;;  %v1616_v27 = vsel %vm1488_vm14, %v1424_v9, %v1552_v36  ;;  %v1833_v9 = vld [vmem:[%s10107_s5 + $0xc8] sm:$0xff] }
 0x1a3   :  { %2848 = vmatprep.subr.bf16.mxu0 %v10178_v57  ;;  %v973_v17 = vadd.f32 %v909_v12, %v457_v46  ;;  %v10203_v28 = vld [vmem:[#allocation42_spill] sm:$0xff]  ;;  %v906_v36 = vmul.f32 %v7559_v8, %v10204_v42  ;;  %v10210_v46 = vld [vmem:[#allocation57_spill] sm:$0xff] }
 0x1a4   :  { %vm1489_vm15 = vcmp.gt.f32.partialorder %v1425_v10, 0.0  ;;  %v1553_v4 = vmul.f32 0.2, %v1425_v10  ;;  %v1550_v62 = vmul.f32 0.2, %v1422_v59  ;;  %vm1486_vm0 = vcmp.gt.f32.partialorder %v1422_v59, 0.0 }
 0x1a5   :  { %v859_v44 = vpop.permute.xlu1 %858  ;;  %v1230_v41 = vpop.permute.xlu0 %1229  ;;  %v488_v63 = vmul.f32 %v7572_v47, %v10203_v28 }
 0x1a6   :  { %v1423_v3 = vadd.f32 %v1230_v41, %v975_v25  ;;  %1969 = vperm.xlu1 %6352, %v1827_v6   ;;  %1964 = vperm.xlu0 %6351, %v1826_v20   ;;  %v1617_v35 = vsel %vm1489_vm15, %v1425_v10, %v1553_v4  ;;  %v1614_v53 = vsel %vm1486_vm0, %v1422_v59, %v1550_v62  ;;  %v1835_v10 = vld [vmem:[%s10107_s5 + $0xd8] sm:$0xff]  ;;  %v1834_v6 = vld [vmem:[%s10107_s5 + $0xd0] sm:$0xff] }
 0x1a7   :  { %v1792_v51 = vpack.c.bf16 %v1617_v35, %v1616_v27  ;;  %v940_v40 = vmul.f32 %v7559_v8, %v859_v44  ;;  %v10205_v25 = vld [vmem:[#allocation20_spill] sm:$0xff]  ;;  %v489_v44 = vmul.f32 %v7572_v47, %v10206_v37 }
 0x1a8   :  { %vm1487_vm1 = vcmp.gt.f32.partialorder %v1423_v3, 0.0  ;;  %v1551_v1 = vmul.f32 0.2, %v1423_v3  ;;  %v454_v15 = vmul.f32 %v7572_v47, %v10205_v25 }
 0x1a9   :  { %v1385_v61 = vpop.permute.xlu1 %1384  ;;  %v864_v14 = vpop.permute.xlu0 %863  ;;  %3136 = vmatpush1.bf16.msra.mxu1 %v1792_v51  ;;  %v1004_v4 = vadd.f32 %v940_v40, %v488_v63  ;;  %v1836_v51 = vld [vmem:[%s10107_s5 + $0xe0] sm:$0xff]  ;;  %v10212_v63 = vld [vmem:[#allocation39_spill] sm:$0xff] }
 0x1aa   :  { %v1454_v32 = vadd.f32 %v1385_v61, %v1006_v21  ;;  %1979 = vperm.xlu1 %6352, %v1829_v58   ;;  %1974 = vperm.xlu0 %6351, %v1828_v50   ;;  %v1615_v39 = vsel %vm1487_vm1, %v1423_v3, %v1551_v1  ;;  %v941_v20 = vmul.f32 %v7559_v8, %v864_v14  ;;  %v10207_v58 = vld [vmem:[#allocation58_spill] sm:$0xff] }
 0x1ab   :  { %v1791_v33 = vpack.c.bf16 %v1615_v39, %v1614_v53  ;;  %3137 = vmatprep.subr.bf16.mxu1 %v10178_v57  ;;  %v907_v50 = vmul.f32 %v7559_v8, %v10207_v58  ;;  %v970_v5 = vadd.f32 %v906_v36, %v454_v15  ;;  %v1838_v53 = vld [vmem:[%s10107_s5 + $0xf0] sm:$0xff]  ;;  %v1843_v36 = vld [vmem:[%s10107_s5 + $0x118] sm:$0xff] }
 0x1ac   :  { %v1582_v11 = vmul.f32 0.2, %v1454_v32  ;;  %vm1518_vm2 = vcmp.gt.f32.partialorder %v1454_v32, 0.0  ;;  %v1005_v1 = vadd.f32 %v941_v20, %v489_v44  ;;  %v10214_v15 = vld [vmem:[#allocation17_spill] sm:$0xff] }
 0x1ad   :  { %v1215_v16 = vpop.permute.xlu1 %1214  ;;  %v1390_v0 = vpop.permute.xlu0 %1389  ;;  %2849 = vmatpush2.bf16.msra.mxu0 %v1791_v33 }
 0x1ae   :  { %v1420_v29 = vadd.f32 %v1215_v16, %v972_v38  ;;  %v1455_v55 = vadd.f32 %v1390_v0, %v1007_v30  ;;  %1989 = vperm.xlu1 %6352, %v1831_v2   ;;  %1984 = vperm.xlu0 %6351, %v1830_v49   ;;  %v1646_v48 = vsel %vm1518_vm2, %v1454_v32, %v1582_v11  ;;  %v1839_v32 = vld [vmem:[%s10107_s5 + $0xf8] sm:$0xff] }
 0x1af   :  { %2850 = vmatprep.subr.bf16.mxu0 %v10178_v57  ;;  %v971_v2 = vadd.f32 %v907_v50, %v455_v34  ;;  %v10209_v49 = vld [vmem:[#allocation40_spill] sm:$0xff]  ;;  %v904_v11 = vmul.f32 %v7559_v8, %v10210_v46  ;;  %v10216_v34 = vld [vmem:[#allocation55_spill] sm:$0xff] }
 0x1b0   :  { %vm1519_vm3 = vcmp.gt.f32.partialorder %v1455_v55, 0.0  ;;  %v1583_v26 = vmul.f32 0.2, %v1455_v55  ;;  %v1548_v43 = vmul.f32 0.2, %v1420_v29  ;;  %vm1484_vm4 = vcmp.gt.f32.partialorder %v1420_v29, 0.0 }
 0x1b1   :  { %v849_v56 = vpop.permute.xlu1 %848  ;;  %v1220_v60 = vpop.permute.xlu0 %1219  ;;  %v486_v7 = vmul.f32 %v7572_v47, %v10209_v49  ;;  %v1840_v47 = vld [vmem:[%s10107_s5 + $0x100] sm:$0xff] }
 0x1b2   :  { %v1421_v22 = vadd.f32 %v1220_v60, %v973_v17  ;;  %1999 = vperm.xlu1 %6352, %v1833_v9   ;;  %1994 = vperm.xlu0 %6351, %v1832_v18   ;;  %v1647_v13 = vsel %vm1519_vm3, %v1455_v55, %v1583_v26  ;;  %v1612_v27 = vsel %vm1484_vm4, %v1420_v29, %v1548_v43  ;;  %v1841_v55 = vld [vmem:[%s10107_s5 + $0x108] sm:$0xff]  ;;  %v7942_v9 = vld [vmem:[%s10102_s0 + $0x1] ss:$0 sm:$0xff]  ;;  %v7948_v26 = vld [vmem:[%s10102_s0] ss:$0 sm:$0xff] }
 0x1b3   :  { %v1807_v59 = vpack.c.bf16 %v1647_v13, %v1646_v48  ;;  %v938_v39 = vmul.f32 %v7559_v8, %v849_v56  ;;  %v10211_v17 = vld [vmem:[#allocation18_spill] sm:$0xff]  ;;  %v487_v56 = vmul.f32 %v7948_v26, %v10212_v63  ;;  %v453_v37 = vmul.f32 %v7948_v26, %v10214_v15 }
 0x1b4   :  { %vm1485_vm5 = vcmp.gt.f32.partialorder %v1421_v22, 0.0  ;;  %v1549_v24 = vmul.f32 0.2, %v1421_v22  ;;  %v452_v28 = vmul.f32 %v7948_v26, %v10211_v17 }
 0x1b5   :  { %v1375_v41 = vpop.permute.xlu1 %1374  ;;  %v854_v62 = vpop.permute.xlu0 %853  ;;  %3138 = vmatpush2.bf16.msra.mxu1 %v1807_v59  ;;  %v1002_v8 = vadd.f32 %v938_v39, %v486_v7  ;;  %v1842_v59 = vld [vmem:[%s10107_s5 + $0x110] sm:$0xff]  ;;  %v10218_v7 = vld [vmem:[#allocation37_spill] sm:$0xff] }
 0x1b6   :  { %v1452_v3 = vadd.f32 %v1375_v41, %v1004_v4  ;;  %2009 = vperm.xlu1 %6352, %v1835_v10   ;;  %2004 = vperm.xlu0 %6351, %v1834_v6   ;;  %v1613_v35 = vsel %vm1485_vm5, %v1421_v22, %v1549_v24  ;;  %v939_v18 = vmul.f32 %v7942_v9, %v854_v62  ;;  %v10213_v10 = vld [vmem:[#allocation56_spill] sm:$0xff] }
 0x1b7   :  { %v1790_v31 = vpack.c.bf16 %v1613_v35, %v1612_v27  ;;  %3139 = vmatprep.subr.bf16.mxu1 %v10178_v57  ;;  %v905_v6 = vmul.f32 %v7942_v9, %v10213_v10  ;;  %v968_v20 = vadd.f32 %v904_v11, %v452_v28  ;;  %v1844_v27 = vld [vmem:[%s10107_s5 + $0x120] sm:$0xff]  ;;  %v1854_v11 = vld [vmem:[%s10107_s5 + $0x170] sm:$0xff] }
 0x1b8   :  { %v1580_v23 = vmul.f32 0.2, %v1452_v3  ;;  %vm1516_vm6 = vcmp.gt.f32.partialorder %v1452_v3, 0.0  ;;  %v1003_v24 = vadd.f32 %v939_v18, %v487_v56  ;;  %v10220_v28 = vld [vmem:[#allocation15_spill] sm:$0xff] }
 0x1b9   :  { %v1205_v21 = vpop.permute.xlu1 %1204  ;;  %v1380_v19 = vpop.permute.xlu0 %1379  ;;  %2851 = vmatpush2.bf16.msra.mxu0 %v1790_v31  ;;  %v451_v63 = vmul.f32 %v7948_v26, %v10220_v28 }
 0x1ba   :  { %v1418_v61 = vadd.f32 %v1205_v21, %v970_v5  ;;  %v1453_v14 = vadd.f32 %v1380_v19, %v1005_v1  ;;  %2019 = vperm.xlu1 %6352, %v1837_v52   ;;  %2014 = vperm.xlu0 %6351, %v1836_v51   ;;  %v1644_v0 = vsel %vm1516_vm6, %v1452_v3, %v1580_v23  ;;  %v1845_v3 = vld [vmem:[%s10107_s5 + $0x128] sm:$0xff] }
 0x1bb   :  { %2852 = vmatprep.subr.bf16.mxu0 %v10178_v57  ;;  %v969_v52 = vadd.f32 %v905_v6, %v453_v37  ;;  %v10215_v51 = vld [vmem:[#allocation38_spill] sm:$0xff]  ;;  %v902_v23 = vmul.f32 %v7942_v9, %v10216_v34  ;;  %v10222_v37 = vld [vmem:[#allocation53_spill] sm:$0xff] }
 0x1bc   :  { %vm1517_vm7 = vcmp.gt.f32.partialorder %v1453_v14, 0.0  ;;  %v1581_v33 = vmul.f32 0.2, %v1453_v14  ;;  %v1546_v30 = vmul.f32 0.2, %v1418_v61  ;;  %vm1482_vm8 = vcmp.gt.f32.partialorder %v1418_v61, 0.0 }
 0x1bd   :  { %v839_v12 = vpop.permute.xlu1 %838  ;;  %v1210_v38 = vpop.permute.xlu0 %1209  ;;  %v484_v58 = vmul.f32 %v7948_v26, %v10215_v51 }
 0x1be   :  { %v1419_v16 = vadd.f32 %v1210_v38, %v971_v2  ;;  %2029 = vperm.xlu1 %6352, %v1839_v32   ;;  %2024 = vperm.xlu0 %6351, %v1838_v53   ;;  %v1645_v54 = vsel %vm1517_vm7, %v1453_v14, %v1581_v33  ;;  %v1610_v48 = vsel %vm1482_vm8, %v1418_v61, %v1546_v30  ;;  %v1847_v14 = vld [vmem:[%s10107_s5 + $0x138] sm:$0xff]  ;;  %v1846_v32 = vld [vmem:[%s10107_s5 + $0x130] sm:$0xff] }
 0x1bf   :  { %v1806_v29 = vpack.c.bf16 %v1645_v54, %v1644_v0  ;;  %v936_v35 = vmul.f32 %v7942_v9, %v839_v12  ;;  %v10217_v2 = vld [vmem:[#allocation16_spill] sm:$0xff]  ;;  %v485_v12 = vmul.f32 %v7948_v26, %v10218_v7 }
 0x1c0   :  { %vm1483_vm9 = vcmp.gt.f32.partialorder %v1419_v16, 0.0  ;;  %v1547_v40 = vmul.f32 0.2, %v1419_v16  ;;  %v450_v49 = vmul.f32 %v7948_v26, %v10217_v2 }
 0x1c1   :  { %v1365_v60 = vpop.permute.xlu1 %1364  ;;  %v844_v43 = vpop.permute.xlu0 %843  ;;  %3140 = vmatpush2.bf16.msra.mxu1 %v1806_v29  ;;  %v1000_v33 = vadd.f32 %v936_v35, %v484_v58  ;;  %v1848_v29 = vld [vmem:[%s10107_s5 + $0x140] sm:$0xff]  ;;  %v10224_v58 = vld [vmem:[#allocation35_spill] sm:$0xff] }
 0x1c2   :  { %v1450_v22 = vadd.f32 %v1365_v60, %v1002_v8  ;;  %2039 = vperm.xlu1 %6352, %v1841_v55   ;;  %2034 = vperm.xlu0 %6351, %v1840_v47   ;;  %v1611_v13 = vsel %vm1483_vm9, %v1419_v16, %v1547_v40  ;;  %v937_v53 = vmul.f32 %v7942_v9, %v844_v43  ;;  %v10219_v55 = vld [vmem:[#allocation54_spill] sm:$0xff] }
 0x1c3   :  { %v1789_v42 = vpack.c.bf16 %v1611_v13, %v1610_v48  ;;  %3141 = vmatprep.subr.bf16.mxu1 %v10178_v57  ;;  %v903_v47 = vmul.f32 %v7942_v9, %v10219_v55  ;;  %v966_v18 = vadd.f32 %v902_v23, %v450_v49  ;;  %v1855_v48 = vld [vmem:[%s10107_s5 + $0x178] sm:$0xff]  ;;  %v1849_v23 = vld [vmem:[%s10107_s5 + $0x148] sm:$0xff] }
 0x1c4   :  { %v1578_v44 = vmul.f32 0.2, %v1450_v22  ;;  %vm1514_vm10 = vcmp.gt.f32.partialorder %v1450_v22, 0.0  ;;  %v1001_v40 = vadd.f32 %v937_v53, %v485_v12  ;;  %v10226_v49 = vld [vmem:[#allocation13_spill] sm:$0xff] }
 0x1c5   :  { %v1195_v4 = vpop.permute.xlu1 %1194  ;;  %v1370_v25 = vpop.permute.xlu0 %1369  ;;  %2853 = vmatpush2.bf16.msra.mxu0 %v1789_v42  ;;  %v449_v7 = vmul.f32 %v7948_v26, %v10226_v49 }
 0x1c6   :  { %v1416_v41 = vadd.f32 %v1195_v4, %v968_v20  ;;  %v1451_v62 = vadd.f32 %v1370_v25, %v1003_v24  ;;  %2049 = vperm.xlu1 %6352, %v1843_v36   ;;  %2044 = vperm.xlu0 %6351, %v1842_v59   ;;  %v1642_v19 = vsel %vm1514_vm10, %v1450_v22, %v1578_v44  ;;  %v1852_v22 = vld [vmem:[%s10107_s5 + $0x160] sm:$0xff]  ;;  %v10221_v59 = vld [vmem:[#allocation36_spill] sm:$0xff] }
 0x1c7   :  { %2854 = vmatprep.subr.bf16.mxu0 %v10178_v57  ;;  %v967_v36 = vadd.f32 %v903_v47, %v451_v63  ;;  %v482_v10 = vmul.f32 %v7948_v26, %v10221_v59  ;;  %v900_v44 = vmul.f32 %v7942_v9, %v10222_v37  ;;  %v10228_v63 = vld [vmem:[#allocation51_spill] sm:$0xff]  ;;  %v10231_v37 = vld [vmem:[#allocation50_spill] sm:$0xff] }
 0x1c8   :  { %vm1515_vm11 = vcmp.gt.f32.partialorder %v1451_v62, 0.0  ;;  %v1579_v31 = vmul.f32 0.2, %v1451_v62  ;;  %v1544_v1 = vmul.f32 0.2, %v1416_v41  ;;  %vm1480_vm12 = vcmp.gt.f32.partialorder %v1416_v41, 0.0 }
 0x1c9   :  { %v829_v50 = vpop.permute.xlu1 %828  ;;  %v1200_v5 = vpop.permute.xlu0 %1199 }
 0x1ca   :  { %v1417_v21 = vadd.f32 %v1200_v5, %v969_v52  ;;  %2059 = vperm.xlu1 %6352, %v1845_v3   ;;  %2054 = vperm.xlu0 %6351, %v1844_v27   ;;  %v1643_v45 = vsel %vm1515_vm11, %v1451_v62, %v1579_v31  ;;  %v1608_v0 = vsel %vm1480_vm12, %v1416_v41, %v1544_v1  ;;  %v1850_v62 = vld [vmem:[%s10107_s5 + $0x150] sm:$0xff]  ;;  %v1853_v3 = vld [vmem:[%s10107_s5 + $0x168] sm:$0xff] }
 0x1cb   :  { %v1805_v61 = vpack.c.bf16 %v1643_v45, %v1642_v19  ;;  %v934_v13 = vmul.f32 %v7942_v9, %v829_v50  ;;  %v10223_v52 = vld [vmem:[#allocation14_spill] sm:$0xff]  ;;  %v483_v50 = vmul.f32 %v7948_v26, %v10224_v58 }
 0x1cc   :  { %vm1481_vm13 = vcmp.gt.f32.partialorder %v1417_v21, 0.0  ;;  %v1545_v39 = vmul.f32 0.2, %v1417_v21  ;;  %v448_v51 = vmul.f32 %v7948_v26, %v10223_v52 }
 0x1cd   :  { %v1355_v38 = vpop.permute.xlu1 %1354  ;;  %v834_v30 = vpop.permute.xlu0 %833  ;;  %3142 = vmatpush2.bf16.msra.mxu1 %v1805_v61  ;;  %v998_v31 = vadd.f32 %v934_v13, %v482_v10  ;;  %v1851_v61 = vld [vmem:[%s10107_s5 + $0x158] sm:$0xff] }
 0x1ce   :  { %v1448_v16 = vadd.f32 %v1355_v38, %v1000_v33  ;;  %2069 = vperm.xlu1 %6352, %v1847_v14   ;;  %2064 = vperm.xlu0 %6351, %v1846_v32   ;;  %v1609_v54 = vsel %vm1481_vm13, %v1417_v21, %v1545_v39  ;;  %v935_v27 = vmul.f32 %v7942_v9, %v834_v30  ;;  %v10225_v14 = vld [vmem:[#allocation52_spill] sm:$0xff]  ;;  %v10230_v10 = vld [vmem:[#allocation33_spill] sm:$0xff] }
 0x1cf   :  { %v1788_v46 = vpack.c.bf16 %v1609_v54, %v1608_v0  ;;  %3143 = vmatprep.subr.bf16.mxu1 %v10178_v57  ;;  %v901_v32 = vmul.f32 %v7942_v9, %v10225_v14  ;;  %v964_v53 = vadd.f32 %v900_v44, %v448_v51  ;;  %v1856_v0 = vld [vmem:[%s10107_s5 + $0x180] sm:$0xff]  ;;  %v899_v44 = vmul.f32 %v7942_v9, %v10231_v37  ;;  %v10233_v14 = vld [vmem:[#allocation31_spill] sm:$0xff] }
 0x1d0   :  { %v1576_v56 = vmul.f32 0.2, %v1448_v16  ;;  %vm1512_vm14 = vcmp.gt.f32.partialorder %v1448_v16, 0.0  ;;  %v999_v39 = vadd.f32 %v935_v27, %v483_v50 }
 0x1d1   :  { %v1185_v8 = vpop.permute.xlu1 %1184  ;;  %v1360_v17 = vpop.permute.xlu0 %1359  ;;  %2855 = vmatpush2.bf16.msra.mxu0 %v1788_v46 }
 0x1d2   :  { %v1414_v60 = vadd.f32 %v1185_v8, %v966_v18  ;;  %v1449_v43 = vadd.f32 %v1360_v17, %v1001_v40  ;;  %2104 = vperm.xlu1 %6352, %v1854_v11   ;;  %2074 = vperm.xlu0 %6351, %v1848_v29   ;;  %v1640_v25 = vsel %vm1512_vm14, %v1448_v16, %v1576_v56  ;;  %v1870_v16 = vld [vmem:[%s10107_s5 + $0x1f0] sm:$0xff]  ;;  %v10227_v29 = vld [vmem:[#allocation34_spill] sm:$0xff] }
 0x1d3   :  { %2856 = vmatprep.subr.bf16.mxu0 %v10178_v57  ;;  %v965_v11 = vadd.f32 %v901_v32, %v449_v7  ;;  %v480_v55 = vmul.f32 %v7948_v26, %v10227_v29  ;;  %v898_v56 = vmul.f32 %v7942_v9, %v10228_v63  ;;  %v479_v32 = vmul.f32 %v7948_v26, %v10233_v14  ;;  %v1857_v14 = vld [vmem:[%s10107_s5 + $0x188] sm:$0xff] }
 0x1d4   :  { %vm1513_vm15 = vcmp.gt.f32.partialorder %v1449_v43, 0.0  ;;  %v1577_v42 = vmul.f32 0.2, %v1449_v43  ;;  %v1542_v24 = vmul.f32 0.2, %v1414_v60  ;;  %vm1478_vm0 = vcmp.gt.f32.partialorder %v1414_v60, 0.0 }
 0x1d5   :  { %v819_v6 = vpop.permute.xlu1 %818  ;;  %v1190_v20 = vpop.permute.xlu0 %1189 }
 0x1d6   :  { %v1415_v4 = vadd.f32 %v1190_v20, %v967_v36  ;;  %2094 = vperm.xlu1 %6352, %v1852_v22   ;;  %2109 = vperm.xlu0 %6351, %v1855_v48   ;;  %v1641_v15 = vsel %vm1513_vm15, %v1449_v43, %v1577_v42  ;;  %v1606_v19 = vsel %vm1478_vm0, %v1414_v60, %v1542_v24  ;;  %v1868_v43 = vld [vmem:[%s10107_s5 + $0x1e0] sm:$0xff]  ;;  %v1871_v22 = vld [vmem:[%s10107_s5 + $0x1f8] sm:$0xff] }
 0x1d7   :  { %v1804_v41 = vpack.c.bf16 %v1641_v15, %v1640_v25  ;;  %v932_v54 = vmul.f32 %v7942_v9, %v819_v6  ;;  %v10229_v36 = vld [vmem:[#allocation12_spill] sm:$0xff]  ;;  %v481_v6 = vmul.f32 %v7948_v26, %v10230_v10 }
 0x1d8   :  { %vm1479_vm1 = vcmp.gt.f32.partialorder %v1415_v4, 0.0  ;;  %v1543_v35 = vmul.f32 0.2, %v1415_v4  ;;  %v446_v59 = vmul.f32 %v7948_v26, %v10229_v36 }
 0x1d9   :  { %v1345_v5 = vpop.permute.xlu1 %1344  ;;  %v824_v1 = vpop.permute.xlu0 %823  ;;  %3144 = vmatpush2.bf16.msra.mxu1 %v1804_v41  ;;  %v996_v42 = vadd.f32 %v932_v54, %v480_v55  ;;  %v1862_v55 = vld [vmem:[%s10107_s5 + $0x1b0] sm:$0xff] }
 0x1da   :  { %v1446_v21 = vadd.f32 %v1345_v5, %v998_v31  ;;  %2084 = vperm.xlu1 %6352, %v1850_v62   ;;  %2099 = vperm.xlu0 %6351, %v1853_v3   ;;  %v1607_v45 = vsel %vm1479_vm1, %v1415_v4, %v1543_v35  ;;  %v933_v48 = vmul.f32 %v7942_v9, %v824_v1  ;;  %v1866_v62 = vld [vmem:[%s10107_s5 + $0x1d0] sm:$0xff]  ;;  %v1869_v3 = vld [vmem:[%s10107_s5 + $0x1e8] sm:$0xff] }
 0x1db   :  { %v1787_v34 = vpack.c.bf16 %v1607_v45, %v1606_v19  ;;  %3145 = vmatprep.subr.bf16.mxu1 %v10178_v57  ;;  %v962_v27 = vadd.f32 %v898_v56, %v446_v59  ;;  %v10232_v31 = vld [vmem:[#allocation11_spill] sm:$0xff]  ;;  %v1864_v19 = vld [vmem:[%s10107_s5 + $0x1c0] sm:$0xff]  ;;  %v1867_v45 = vld [vmem:[%s10107_s5 + $0x1d8] sm:$0xff] }
 0x1dc   :  { %v1574_v12 = vmul.f32 0.2, %v1446_v21  ;;  %vm1510_vm2 = vcmp.gt.f32.partialorder %v1446_v21, 0.0  ;;  %v997_v35 = vadd.f32 %v933_v48, %v481_v6  ;;  %v447_v52 = vmul.f32 %v7948_v26, %v10232_v31 }
 0x1dd   :  { %v1175_v33 = vpop.permute.xlu1 %1174  ;;  %v1350_v2 = vpop.permute.xlu0 %1349  ;;  %2857 = vmatpush2.bf16.msra.mxu0 %v1787_v34 }
 0x1de   :  { %v1412_v38 = vadd.f32 %v1175_v33, %v964_v53  ;;  %v1447_v30 = vadd.f32 %v1350_v2, %v999_v39  ;;  %2079 = vperm.xlu1 %6352, %v1849_v23   ;;  %2089 = vperm.xlu0 %6351, %v1851_v61   ;;  %v1638_v17 = vsel %vm1510_vm2, %v1446_v21, %v1574_v12  ;;  %v10234_v53 = vld [vmem:[#allocation32_spill] sm:$0xff] }
 0x1df   :  { %2858 = vmatprep.subr.bf16.mxu0 %v10178_v57  ;;  %v963_v21 = vadd.f32 %v899_v44, %v447_v52  ;;  %v478_v39 = vmul.f32 %v7948_v26, %v10234_v53  ;;  %v10235_v33 = vld [vmem:[#allocation48_spill] sm:$0xff] }
 0x1e0   :  { %vm1511_vm3 = vcmp.gt.f32.partialorder %v1447_v30, 0.0  ;;  %v1575_v46 = vmul.f32 0.2, %v1447_v30  ;;  %v1540_v40 = vmul.f32 0.2, %v1412_v38  ;;  %vm1476_vm4 = vcmp.gt.f32.partialorder %v1412_v38, 0.0 }
 0x1e1   :  { %v809_v47 = vpop.permute.xlu1 %808  ;;  %v1180_v18 = vpop.permute.xlu0 %1179  ;;  %v897_v2 = vmul.f32 %v7942_v9, %v10235_v33 }
 0x1e2   :  { %v1413_v8 = vadd.f32 %v1180_v18, %v965_v11  ;;  %2184 = vperm.xlu1 %6352, %v1870_v16   ;;  %2114 = vperm.xlu0 %6351, %v1856_v0   ;;  %v1639_v28 = vsel %vm1511_vm3, %v1447_v30, %v1575_v46  ;;  %v1604_v25 = vsel %vm1476_vm4, %v1412_v38, %v1540_v40  ;;  %v10236_v0 = vld [vmem:[#allocation9_spill] sm:$0xff] }
 0x1e3   :  { %v1803_v60 = vpack.c.bf16 %v1639_v28, %v1638_v17  ;;  %v930_v34 = vmul.f32 %v7942_v9, %v809_v47  ;;  %v445_v54 = vmul.f32 %v7948_v26, %v10236_v0  ;;  %v10237_v46 = vld [vmem:[#allocation49_spill] sm:$0xff]  ;;  %v1865_v47 = vld [vmem:[%s10107_s5 + $0x1c8] sm:$0xff]  ;;  %v6359_v0 = vld [vmem:[%s10106_s4 + $0x24] ss:$16 sps:$4 sm:$0xff]  }
 0x1e4   :  { %vm1477_vm5 = vcmp.gt.f32.partialorder %v1413_v8, 0.0  ;;  %v1541_v13 = vmul.f32 0.2, %v1413_v8  ;;  %v896_v11 = vmul.f32 %v7942_v9, %v10237_v46  ;;  %v10238_v17 = vld [vmem:[#allocation10_spill] sm:$0xff] }
 0x1e5   :  { %v1335_v20 = vpop.permute.xlu1 %1334  ;;  %v814_v24 = vpop.permute.xlu0 %813  ;;  %3146 = vmatpush2.bf16.msra.mxu1 %v1803_v60  ;;  %v444_v28 = vmul.f32 %v7948_v26, %v10238_v17  ;;  %v961_v60 = vadd.f32 %v897_v2, %v445_v54  ;;  %v3762_v54 = vld [vmem:[%s10109_s7] sm:$0xff]  ;;  %v6356_v46 = vld [vmem:[%s10106_s4 + $0x8] ss:$16 sps:$4 sm:$0xff]  }
 0x1e6   :  { %v1444_v4 = vadd.f32 %v1335_v20, %v996_v42  ;;  %2174 = vperm.xlu1 %6352, %v1868_v43   ;;  %2189 = vperm.xlu0 %6351, %v1871_v22   ;;  %v1605_v15 = vsel %vm1477_vm5, %v1413_v8, %v1541_v13  ;;  %v931_v23 = vmul.f32 %v7942_v9, %v814_v24  ;;  %v10239_v42 = vld [vmem:[#allocation68_spill] sm:$0xff]  ;;  %v1860_v20 = vld [vmem:[%s10107_s5 + $0x1a0] sm:$0xff] }
 0x1e7   :  { %v1786_v41 = vpack.c.bf16 %v1605_v15, %v1604_v25  ;;  %3147 = vmatprep.subr.bf16.mxu1 %v10178_v57  ;;  %v994_v8 = vadd.f32 %v930_v34, %v478_v39  ;;  %v928_v36 = vmul.f32 %v7942_v9, %v10239_v42  ;;  %v960_v10 = vadd.f32 %v896_v11, %v444_v28  ;;  %v1863_v24 = vld [vmem:[%s10107_s5 + $0x1b8] sm:$0xff]  ;;  %v6361_v17 = vld [vmem:[%s10106_s4 + $0x20] ss:$16 sps:$4 sm:$0xff]   ;;  %v3767_v28 = vld [vmem:[%s10109_s7 + $0x28] sm:$0xff] }
 0x1e8   :  { %v1572_v50 = vmul.f32 0.2, %v1444_v4  ;;  %vm1508_vm6 = vcmp.gt.f32.partialorder %v1444_v4, 0.0  ;;  %v995_v40 = vadd.f32 %v931_v23, %v479_v32  ;;  %v10240_v15 = vld [vmem:[#allocation29_spill] sm:$0xff]  ;;  %v3768_v42 = vld [vmem:[%s10109_s7 + $0x30] sm:$0xff] }
 0x1e9   :  { %v1165_v51 = vpop.permute.xlu1 %1164  ;;  %v1340_v58 = vpop.permute.xlu0 %1339  ;;  %2859 = vmatpush2.bf16.msra.mxu0 %v1786_v41  ;;  %v477_v37 = vmul.f32 %v7948_v26, %v10240_v15  ;;  %v1859_v32 = vld [vmem:[%s10107_s5 + $0x198] sm:$0xff] }
 0x1ea   :  { %v1410_v5 = vadd.f32 %v1165_v51, %v962_v27  ;;  %v1445_v1 = vadd.f32 %v1340_v58, %v997_v35  ;;  %2164 = vperm.xlu1 %6352, %v1866_v62   ;;  %2179 = vperm.xlu0 %6351, %v1869_v3   ;;  %v1636_v30 = vsel %vm1508_vm6, %v1444_v4, %v1572_v50  ;;  %v1858_v58 = vld [vmem:[%s10107_s5 + $0x190] sm:$0xff] }
 0x1eb   :  { %2860 = vmatprep.subr.bf16.mxu0 %v10178_v57 }
 0x1ec   :  { %vm1509_vm7 = vcmp.gt.f32.partialorder %v1445_v1, 0.0  ;;  %v1573_v61 = vmul.f32 0.2, %v1445_v1  ;;  %v1538_v49 = vmul.f32 0.2, %v1410_v5  ;;  %vm1474_vm8 = vcmp.gt.f32.partialorder %v1410_v5, 0.0 }
 0x1ed   :  { %v804_v7 = vpop.permute.xlu1 %803  ;;  %v1170_v12 = vpop.permute.xlu0 %1169 }
 0x1ee   :  { %v1411_v38 = vadd.f32 %v1170_v12, %v963_v21  ;;  %2154 = vperm.xlu1 %6352, %v1864_v19   ;;  %2169 = vperm.xlu0 %6351, %v1867_v45   ;;  %v1637_v16 = vsel %vm1509_vm7, %v1445_v1, %v1573_v61  ;;  %v1602_v43 = vsel %vm1474_vm8, %v1410_v5, %v1538_v49 }
 0x1ef   :  { %v1802_v29 = vpack.c.bf16 %v1637_v16, %v1636_v30  ;;  %v929_v59 = vmul.f32 %v7942_v9, %v804_v7  ;;  %v10241_v9 = vld [vmem:[#allocation30_spill] sm:$0xff] }
 0x1f0   :  { %vm1475_vm9 = vcmp.gt.f32.partialorder %v1411_v38, 0.0  ;;  %v1539_v18 = vmul.f32 0.2, %v1411_v38  ;;  %v476_v44 = vmul.f32 %v7948_v26, %v10241_v9  ;;  %v1861_v26 = vld [vmem:[%s10107_s5 + $0x1a8] sm:$0xff]  ;;  %v6353_v7 = vld [vmem:[%s10106_s4] ss:$16 sps:$4 sm:$0xff]  }
 0x1f1   :  { %v1330_v63 = vpop.permute.xlu1 %1329  ;;  %v1325_v56 = vpop.permute.xlu0 %1324  ;;  %3148 = vmatpush2.bf16.msra.mxu1 %v1802_v29  ;;  %v993_v31 = vadd.f32 %v929_v59, %v477_v37  ;;  %v3763_v16 = vld [vmem:[%s10109_s7 + $0x8] sm:$0xff]  ;;  %v3773_v9 = vld [vmem:[%s10109_s7 + $0x58] sm:$0xff]  ;;  %s6083_s5 = sshll.u32 %s6762_s24, 4  ;;  %s6084_s5 = int_to_ptr.vmem [resolvable:$true] %s6083_s5 }
 0x1f2   :  { %v1443_v22 = vadd.f32 %v1330_v63, %v995_v40  ;;  %v1442_v48 = vadd.f32 %v1325_v56, %v994_v8  ;;  %2144 = vperm.xlu1 %6352, %v1862_v55   ;;  %2159 = vperm.xlu0 %6351, %v1865_v47   ;;  %v1603_v13 = vsel %vm1475_vm9, %v1411_v38, %v1539_v18  ;;  %v6362_v55 = vld [vmem:[%s10106_s4 + $0x2c] ss:$16 sps:$4 sm:$0xff]   ;;  %v3764_v18 = vld [vmem:[%s10109_s7 + $0x10] sm:$0xff]  ;;  %v3766_v56 = vld [vmem:[%s10109_s7 + $0x20] sm:$0xff]  ;;  %s6739_s1 = scalar_lea.vmem %s6084_s5, 16  ;;  %s6743_s25 = scalar_lea.vmem %s6084_s5, 32 }
 0x1f3   :  { %v1785_v6 = vpack.c.bf16 %v1603_v13, %v1602_v43  ;;  %3149 = vmatprep.subr.bf16.mxu1 %v10178_v57  ;;  %v992_v52 = vadd.f32 %v928_v36, %v476_v44  ;;  %v3765_v47 = vld [vmem:[%s10109_s7 + $0x18] sm:$0xff]  ;;  %v6365_v63 = vld [vmem:[%s10106_s4 + $0x44] ss:$16 sps:$4 sm:$0xff]   ;;  %p6740_p0 = scmp.ne.s32.totalorder %s6084_s5, %s6739_s1  ;;  %p6744_p1 = scmp.lt.s32.totalorder %s6084_s5, %s6084_s5 }
 0x1f4   :  { %vm1507_vm10 = vcmp.gt.f32.partialorder %v1443_v22, 0.0  ;;  %v1571_v4 = vmul.f32 0.2, %v1443_v22  ;;  %vm1506_vm11 = vcmp.gt.f32.partialorder %v1442_v48, 0.0  ;;  %v1570_v25 = vmul.f32 0.2, %v1442_v48  ;;  %p6745_p2 = scmp.lt.s32.totalorder %s6743_s25, %s6739_s1 }
 0x1f5   :  { %v1160_v41 = vpop.permute.xlu1 %1159  ;;  %v1155_v62 = vpop.permute.xlu0 %1154  ;;  %2861 = vmatpush2.bf16.msra.mxu0 %v1785_v6  ;;  %v3769_v13 = vld [vmem:[%s10109_s7 + $0x38] sm:$0xff]  ;;  %v3771_v6 = vld [vmem:[%s10109_s7 + $0x48] sm:$0xff]  ;;  %v3772_v44 = vld [vmem:[%s10109_s7 + $0x50] sm:$0xff] }
 0x1f6   :  { %v1409_v3 = vadd.f32 %v1160_v41, %v961_v60  ;;  %v1408_v27 = vadd.f32 %v1155_v62, %v960_v10  ;;  %2134 = vperm.xlu1 %6352, %v1860_v20   ;;  %2149 = vperm.xlu0 %6351, %v1863_v24   ;;  %v1634_v35 = vsel %vm1506_vm11, %v1442_v48, %v1570_v25  ;;  %v6364_v60 = vld [vmem:[%s10106_s4 + $0x28] ss:$16 sps:$4 sm:$0xff]   ;;  %v6368_v48 = vld [vmem:[%s10106_s4 + $0x4c] ss:$16 sps:$4 sm:$0xff]   ;;  %v6367_v10 = vld [vmem:[%s10106_s4 + $0x40] ss:$16 sps:$4 sm:$0xff]   ;;  %p6746_p3 = por %p6745_p2, %p6744_p1 }
 0x1f7   :  { %v1635_v51 = vsel %vm1507_vm10, %v1443_v22, %v1571_v4  ;;  %2862 = vmatprep.subr.bf16.mxu0 %v10178_v57  ;;  %v6371_v20 = vld [vmem:[%s10106_s4 + $0x64] ss:$16 sps:$4 sm:$0xff]   ;;  %v6370_v4 = vld [vmem:[%s10106_s4 + $0x48] ss:$16 sps:$4 sm:$0xff]   ;;  %v6374_v37 = vld [vmem:[%s10106_s4 + $0x6c] ss:$16 sps:$4 sm:$0xff]  }
 0x1f8   :  { %vm1473_vm12 = vcmp.gt.f32.partialorder %v1409_v3, 0.0  ;;  %v1537_v50 = vmul.f32 0.2, %v1409_v3  ;;  %vm1472_vm13 = vcmp.gt.f32.partialorder %v1408_v27, 0.0  ;;  %v1536_v5 = vmul.f32 0.2, %v1408_v27  ;;  %p6747_p4 = pnand %p6746_p3, %p6740_p0 }
 0x1f9   :  { %v1320_v1 = vpop.permute.xlu1 %1319  ;;  %v1315_v21 = vpop.permute.xlu0 %1314  ;;  %v1801_v19 = vpack.c.bf16 %v1635_v51, %v1634_v35  ;;  %v3770_v24 = vld [vmem:[%s10109_s7 + $0x40] sm:$0xff] }
 0x1fa   :  { %v1441_v45 = vadd.f32 %v1320_v1, %v993_v31  ;;  %v1440_v34 = vadd.f32 %v1315_v21, %v992_v52  ;;  %2124 = vperm.xlu1 %6352, %v1858_v58   ;;  %2139 = vperm.xlu0 %6351, %v1861_v26   ;;  %v1600_v23 = vsel %vm1472_vm13, %v1408_v27, %v1536_v5  ;;  %v3775_v27 = vld [vmem:[%s10109_s7 + $0x68] sm:$0xff]  ;;  %v6377_v35 = vld [vmem:[%s10106_s4 + $0x84] ss:$16 sps:$4 sm:$0xff]  }
 0x1fb   :  { %3150 = vmatpush2.bf16.msra.mxu1 %v1801_v19  ;;  %v1601_v61 = vsel %vm1473_vm12, %v1409_v3, %v1537_v50  ;;  %v6373_v3 = vld [vmem:[%s10106_s4 + $0x60] ss:$16 sps:$4 sm:$0xff]   ;;  %v6376_v52 = vld [vmem:[%s10106_s4 + $0x68] ss:$16 sps:$4 sm:$0xff]   ;;  %v6380_v26 = vld [vmem:[%s10106_s4 + $0x8c] ss:$16 sps:$4 sm:$0xff]  }
 0x1fc   :  { %vm1505_vm14 = vcmp.gt.f32.partialorder %v1441_v45, 0.0  ;;  %v1569_v53 = vmul.f32 0.2, %v1441_v45  ;;  %vm1504_vm15 = vcmp.gt.f32.partialorder %v1440_v34, 0.0  ;;  %v1568_v39 = vmul.f32 0.2, %v1440_v34  ;;  %3151 = vmatprep.subr.bf16.mxu1 %v10178_v57 }
 0x1fd   :  { %v8129_v33 = vpop.permute.xlu1 %1879  ;;  %v8131_v2 = vpop.permute.xlu0 %1874  ;;  %v1784_v49 = vpack.c.bf16 %v1601_v61, %v1600_v23  ;;  %v3774_v31 = vld [vmem:[%s10109_s7 + $0x60] sm:$0xff]  ;;  %v3777_v50 = vld [vmem:[%s10109_s7 + $0x78] sm:$0xff]  ;;  %v3776_v5 = vld [vmem:[%s10109_s7 + $0x70] sm:$0xff] }
 0x1fe   :  { %2119 = vperm.xlu1 %6352, %v1857_v14   ;;  %2129 = vperm.xlu0 %6351, %v1859_v32   ;;  %v1632_v12 = vsel %vm1504_vm15, %v1440_v34, %v1568_v39  ;;  %v1633_v38 = vsel %vm1505_vm14, %v1441_v45, %v1569_v53  ;;  %v6379_v19 = vld [vmem:[%s10106_s4 + $0x80] ss:$16 sps:$4 sm:$0xff]   ;;  %v3779_v45 = vld [vmem:[%s10109_s7 + $0x88] sm:$0xff]  ;;  %v6383_v34 = vld [vmem:[%s10106_s4 + $0xa4] ss:$16 sps:$4 sm:$0xff]  }
 0x1ff   :  { %2863 = vmatpush2.bf16.msra.mxu0 %v1784_v49  ;;  %v1800_v30 = vpack.c.bf16 %v1633_v38, %v1632_v12  ;;  %v3778_v23 = vld [vmem:[%s10109_s7 + $0x80] sm:$0xff]  ;;  %v6382_v61 = vld [vmem:[%s10106_s4 + $0x88] ss:$16 sps:$4 sm:$0xff]   ;;  %v6386_v53 = vld [vmem:[%s10106_s4 + $0xac] ss:$16 sps:$4 sm:$0xff]  }
 0x200   :  { %4786 = vmatprep.subr.bf16.mxu0 %v10178_v57  ;;  %v3781_v39 = vld [vmem:[%s10109_s7 + $0x98] sm:$0xff]  ;;  %v3780_v49 = vld [vmem:[%s10109_s7 + $0x90] sm:$0xff] }
 0x201   :  { %v8149_v11 = vpop.permute.xlu1 %1889  ;;  %v8151_v29 = vpop.permute.xlu0 %1884  ;;  %3152 = vmatpush2.bf16.msra.mxu1 %v1800_v30  ;;  %v6385_v12 = vld [vmem:[%s10106_s4 + $0xa0] ss:$16 sps:$4 sm:$0xff]   ;;  %v3783_v30 = vld [vmem:[%s10109_s7 + $0xa8] sm:$0xff] }
 0x202   :  { %2865 = vmatmul.mubr.bf16.vlgmr.msra.gmra.mxu0 %v6353_v7  ;;  %3833 = vperm.xlu1 %6352, %v3763_v16   ;;  %v6389_v16 = vld [vmem:[%s10106_s4 + $0xc4] ss:$16 sps:$4 sm:$0xff]  }
 0x203   :  { %3828 = vperm.xlu0 %6351, %v3762_v54   ;;  %2872 = vmatprep.mubr.bf16.mxu0 %v6359_v0  ;;  %v3782_v0 = vld [vmem:[%s10109_s7 + $0xa0] sm:$0xff]  ;;  %v6388_v54 = vld [vmem:[%s10106_s4 + $0xa8] ss:$16 sps:$4 sm:$0xff]  }
 0x204   :  { %3154 = vmatmul.mubr.bf16.vlgmr.msra.gmra.mxu1 %v6356_v46  ;;  %5075 = vmatprep.subr.bf16.mxu1 %v10178_v57  ;;  %v6392_v46 = vld [vmem:[%s10106_s4 + $0xcc] ss:$16 sps:$4 sm:$0xff]  }
 0x205   :  { %v8163_v40 = vpop.permute.xlu1 %1899  ;;  %v8165_v8 = vpop.permute.xlu0 %1894  ;;  %3161 = vmatprep.mubr.bf16.mxu1 %v6362_v55  ;;  %v3785_v55 = vld [vmem:[%s10109_s7 + $0xb8] sm:$0xff] }
 0x206   :  { %3843 = vperm.xlu1 %6352, %v3765_v47  }
 0x207   :  { %3838 = vperm.xlu0 %6351, %v3764_v18   ;;  %v3784_v18 = vld [vmem:[%s10109_s7 + $0xb0] sm:$0xff] }
 0x209   :  { %v8182_v43 = vpop.permute.xlu1 %1909  ;;  %v8184_v22 = vpop.permute.xlu0 %1904 }
 0x20a   :  { %2873 = vmatmul.mubr.bf16.gmra.mxu0 %v6361_v17  ;;  %3853 = vperm.xlu1 %6352, %v3767_v28   ;;  %v6391_v28 = vld [vmem:[%s10106_s4 + $0xc0] ss:$16 sps:$4 sm:$0xff]  }
 0x20b   :  { %3848 = vperm.xlu0 %6351, %v3766_v56   ;;  %2880 = vmatprep.mubr.bf16.mxu0 %v6365_v63  ;;  %v3787_v63 = vld [vmem:[%s10109_s7 + $0xc8] sm:$0xff]  ;;  %v6395_v56 = vld [vmem:[%s10106_s4 + $0xe4] ss:$16 sps:$4 sm:$0xff]  }
 0x20c   :  { %3162 = vmatmul.mubr.bf16.gmra.mxu1 %v6364_v60  ;;  %v3786_v60 = vld [vmem:[%s10109_s7 + $0xc0] sm:$0xff] }
 0x20d   :  { %v8195_v36 = vpop.permute.xlu1 %1919  ;;  %v8197_v59 = vpop.permute.xlu0 %1914  ;;  %3169 = vmatprep.mubr.bf16.mxu1 %v6368_v48  ;;  %v6394_v48 = vld [vmem:[%s10106_s4 + $0xc8] ss:$16 sps:$4 sm:$0xff]  }
 0x20e   :  { %3863 = vperm.xlu1 %6352, %v3769_v13   ;;  %v6398_v13 = vld [vmem:[%s10106_s4 + $0xec] ss:$16 sps:$4 sm:$0xff]  }
 0x20f   :  { %3858 = vperm.xlu0 %6351, %v3768_v42  }
 0x211   :  { %v8214_v25 = vpop.permute.xlu1 %1929  ;;  %v8216_v15 = vpop.permute.xlu0 %1924 }
 0x212   :  { %2881 = vmatmul.mubr.bf16.gmra.mxu0 %v6367_v10  ;;  %3873 = vperm.xlu1 %6352, %v3771_v6   ;;  %v3789_v6 = vld [vmem:[%s10109_s7 + $0xd8] sm:$0xff] }
 0x213   :  { %3868 = vperm.xlu0 %6351, %v3770_v24   ;;  %2888 = vmatprep.mubr.bf16.mxu0 %v6371_v20  ;;  %v3788_v20 = vld [vmem:[%s10109_s7 + $0xd0] sm:$0xff] }
 0x214   :  { %3170 = vmatmul.mubr.bf16.gmra.mxu1 %v6370_v4  ;;  %v6397_v24 = vld [vmem:[%s10106_s4 + $0xe0] ss:$16 sps:$4 sm:$0xff]   ;;  %v3791_v4 = vld [vmem:[%s10109_s7 + $0xe8] sm:$0xff] }
 0x215   :  { %v8227_v41 = vpop.permute.xlu1 %1939  ;;  %v8229_v62 = vpop.permute.xlu0 %1934  ;;  %3177 = vmatprep.mubr.bf16.mxu1 %v6374_v37  ;;  %v6401_v37 = vld [vmem:[%s10106_s4 + $0x104] ss:$16 sps:$4 sm:$0xff]  }
 0x216   :  { %3883 = vperm.xlu1 %6352, %v3773_v9  }
 0x217   :  { %3878 = vperm.xlu0 %6351, %v3772_v44   ;;  %v3790_v44 = vld [vmem:[%s10109_s7 + $0xe0] sm:$0xff] }
 0x219   :  { %v8246_v51 = vpop.permute.xlu1 %1949  ;;  %v8248_v58 = vpop.permute.xlu0 %1944 }
 0x21a   :  { %2889 = vmatmul.mubr.bf16.gmra.mxu0 %v6373_v3  ;;  %3893 = vperm.xlu1 %6352, %v3775_v27   ;;  %v6400_v3 = vld [vmem:[%s10106_s4 + $0xe8] ss:$16 sps:$4 sm:$0xff]  }
 0x21b   :  { %3888 = vperm.xlu0 %6351, %v3774_v31   ;;  %2896 = vmatprep.mubr.bf16.mxu0 %v6377_v35  ;;  %v6404_v35 = vld [vmem:[%s10106_s4 + $0x10c] ss:$16 sps:$4 sm:$0xff]  }
 0x21c   :  { %3178 = vmatmul.mubr.bf16.gmra.mxu1 %v6376_v52  ;;  %v3793_v31 = vld [vmem:[%s10109_s7 + $0xf8] sm:$0xff]  ;;  %v3792_v52 = vld [vmem:[%s10109_s7 + $0xf0] sm:$0xff] }
 0x21d   :  { %v8259_v1 = vpop.permute.xlu1 %1959  ;;  %v8261_v21 = vpop.permute.xlu0 %1954  ;;  %3185 = vmatprep.mubr.bf16.mxu1 %v6380_v26 }
 0x21e   :  { %3903 = vperm.xlu1 %6352, %v3777_v50   ;;  %v6403_v50 = vld [vmem:[%s10106_s4 + $0x100] ss:$16 sps:$4 sm:$0xff]  }
 0x21f   :  { %3898 = vperm.xlu0 %6351, %v3776_v5  }
 0x221   :  { %v8278_v14 = vpop.permute.xlu1 %1969  ;;  %v8280_v32 = vpop.permute.xlu0 %1964 }
 0x222   :  { %2897 = vmatmul.mubr.bf16.gmra.mxu0 %v6379_v19  ;;  %3913 = vperm.xlu1 %6352, %v3779_v45   ;;  %v3795_v19 = vld [vmem:[%s10109_s7 + $0x108] sm:$0xff]  ;;  %v6407_v45 = vld [vmem:[%s10106_s4 + $0x124] ss:$16 sps:$4 sm:$0xff]  }
 0x223   :  { %3908 = vperm.xlu0 %6351, %v3778_v23   ;;  %2904 = vmatprep.mubr.bf16.mxu0 %v6383_v34  ;;  %v3794_v34 = vld [vmem:[%s10109_s7 + $0x100] sm:$0xff]  ;;  %v6406_v23 = vld [vmem:[%s10106_s4 + $0x108] ss:$16 sps:$4 sm:$0xff]  }
 0x224   :  { %3186 = vmatmul.mubr.bf16.gmra.mxu1 %v6382_v61  ;;  %v6410_v61 = vld [vmem:[%s10106_s4 + $0x12c] ss:$16 sps:$4 sm:$0xff]  }
 0x225   :  { %3193 = vmatprep.mubr.bf16.mxu1 %v6386_v53  ;;  %v8291_v7 = vpop.permute.xlu1 %1979  ;;  %v8296_v38 = vpop.permute.xlu0 %1974  ;;  %v3797_v53 = vld [vmem:[%s10109_s7 + $0x118] sm:$0xff] }
 0x226   :  { %10242 = vst [vmem:[#allocation47_spill] sm:$0xff] %v8291_v7  ;;  %3923 = vperm.xlu1 %6352, %v3781_v39  }
 0x227   :  { %3918 = vperm.xlu0 %6351, %v3780_v49   ;;  %v3796_v49 = vld [vmem:[%s10109_s7 + $0x110] sm:$0xff] }
 0x229   :  { %v8316_v47 = vpop.permute.xlu1 %1989  ;;  %v8321_v17 = vpop.permute.xlu0 %1984 }
 0x22a   :  { %2905 = vmatmul.mubr.bf16.gmra.mxu0 %v6385_v12  ;;  %3933 = vperm.xlu1 %6352, %v3783_v30   ;;  %10243 = vst [vmem:[#allocation67_spill] sm:$0xff] %v8321_v17  ;;  %v6409_v30 = vld [vmem:[%s10106_s4 + $0x120] ss:$16 sps:$4 sm:$0xff]  }
 0x22b   :  { %3928 = vperm.xlu0 %6351, %v3782_v0   ;;  %2912 = vmatprep.mubr.bf16.mxu0 %v6389_v16  ;;  %v3799_v16 = vld [vmem:[%s10109_s7 + $0x128] sm:$0xff]  ;;  %v6413_v0 = vld [vmem:[%s10106_s4 + $0x144] ss:$16 sps:$4 sm:$0xff]  }
 0x22c   :  { %3194 = vmatmul.mubr.bf16.gmra.mxu1 %v6388_v54  ;;  %v3798_v54 = vld [vmem:[%s10109_s7 + $0x120] sm:$0xff] }
 0x22d   :  { %3201 = vmatprep.mubr.bf16.mxu1 %v6392_v46  ;;  %v8341_v42 = vpop.permute.xlu1 %1999  ;;  %v8343_v10 = vpop.permute.xlu0 %1994  ;;  %v6412_v46 = vld [vmem:[%s10106_s4 + $0x128] ss:$16 sps:$4 sm:$0xff]  }
 0x22e   :  { %3943 = vperm.xlu1 %6352, %v3785_v55   ;;  %10244 = vst [vmem:[#allocation7_spill] sm:$0xff] %v8341_v42  ;;  %10245 = vst [vmem:[#allocation28_spill] sm:$0xff] %v8343_v10  ;;  %v6416_v55 = vld [vmem:[%s10106_s4 + $0x14c] ss:$16 sps:$4 sm:$0xff]  }
 0x22f   :  { %3938 = vperm.xlu0 %6351, %v3784_v18  }
 0x231   :  { %v8360_v9 = vpop.permute.xlu1 %2009  ;;  %v8368_v27 = vpop.permute.xlu0 %2004 }
 0x232   :  { %2913 = vmatmul.mubr.bf16.gmra.mxu0 %v6391_v28  ;;  %3953 = vperm.xlu1 %6352, %v3787_v63   ;;  %v3801_v63 = vld [vmem:[%s10109_s7 + $0x138] sm:$0xff] }
 0x233   :  { %3948 = vperm.xlu0 %6351, %v3786_v60   ;;  %2920 = vmatprep.mubr.bf16.mxu0 %v6395_v56  ;;  %v3800_v56 = vld [vmem:[%s10109_s7 + $0x130] sm:$0xff] }
 0x234   :  { %3202 = vmatmul.mubr.bf16.gmra.mxu1 %v6394_v48  ;;  %v6415_v60 = vld [vmem:[%s10106_s4 + $0x140] ss:$16 sps:$4 sm:$0xff]   ;;  %v3803_v48 = vld [vmem:[%s10109_s7 + $0x148] sm:$0xff] }
 0x235   :  { %3209 = vmatprep.mubr.bf16.mxu1 %v6398_v13  ;;  %v8379_v26 = vpop.permute.xlu1 %2019  ;;  %v8384_v5 = vpop.permute.xlu0 %2014  ;;  %v6419_v13 = vld [vmem:[%s10106_s4 + $0x164] ss:$16 sps:$4 sm:$0xff]  }
 0x236   :  { %3963 = vperm.xlu1 %6352, %v3789_v6  }
 0x237   :  { %3958 = vperm.xlu0 %6351, %v3788_v20   ;;  %v3802_v20 = vld [vmem:[%s10109_s7 + $0x140] sm:$0xff] }
 0x239   :  { %v8404_v39 = vpop.permute.xlu1 %2029  ;;  %v8409_v12 = vpop.permute.xlu0 %2024 }
 0x23a   :  { %2921 = vmatmul.mubr.bf16.gmra.mxu0 %v6397_v24  ;;  %3973 = vperm.xlu1 %6352, %v3791_v4   ;;  %v6418_v24 = vld [vmem:[%s10106_s4 + $0x148] ss:$16 sps:$4 sm:$0xff]  }
 0x23b   :  { %3968 = vperm.xlu0 %6351, %v3790_v44   ;;  %2928 = vmatprep.mubr.bf16.mxu0 %v6401_v37  ;;  %v6422_v37 = vld [vmem:[%s10106_s4 + $0x16c] ss:$16 sps:$4 sm:$0xff]  }
 0x23c   :  { %3210 = vmatmul.mubr.bf16.gmra.mxu1 %v6400_v3  ;;  %v3805_v44 = vld [vmem:[%s10109_s7 + $0x158] sm:$0xff]  ;;  %v3804_v3 = vld [vmem:[%s10109_s7 + $0x150] sm:$0xff] }
 0x23d   :  { %3217 = vmatprep.mubr.bf16.mxu1 %v6404_v35  ;;  %v8429_v18 = vpop.permute.xlu1 %2039  ;;  %v8431_v28 = vpop.permute.xlu0 %2034 }
 0x23e   :  { %3983 = vperm.xlu1 %6352, %v3793_v31   ;;  %10246 = vst [vmem:[#allocation46_spill] sm:$0xff] %v8429_v18  ;;  %v6421_v31 = vld [vmem:[%s10106_s4 + $0x160] ss:$16 sps:$4 sm:$0xff]  }
 0x23f   :  { %3978 = vperm.xlu0 %6351, %v3792_v52  }
 0x241   :  { %v8448_v6 = vpop.permute.xlu1 %2049  ;;  %v8456_v4 = vpop.permute.xlu0 %2044 }
 0x242   :  { %2929 = vmatmul.mubr.bf16.gmra.mxu0 %v6403_v50  ;;  %3993 = vperm.xlu1 %6352, %v3795_v19   ;;  %10247 = vst [vmem:[#allocation66_spill] sm:$0xff] %v8448_v6  ;;  %10248 = vst [vmem:[#allocation6_spill] sm:$0xff] %v8456_v4  ;;  %v3807_v50 = vld [vmem:[%s10109_s7 + $0x168] sm:$0xff]  ;;  %v6425_v19 = vld [vmem:[%s10106_s4 + $0x184] ss:$16 sps:$4 sm:$0xff]  }
 0x243   :  { %3988 = vperm.xlu0 %6351, %v3794_v34   ;;  %2936 = vmatprep.mubr.bf16.mxu0 %v6407_v45  ;;  %v3806_v45 = vld [vmem:[%s10109_s7 + $0x160] sm:$0xff]  ;;  %v6424_v34 = vld [vmem:[%s10106_s4 + $0x168] ss:$16 sps:$4 sm:$0xff]   ;;  %v5618_v4 = vld [vmem:[%s10110_s8 + $0x1f0] sm:$0xff] }
 0x244   :  { %3218 = vmatmul.mubr.bf16.gmra.mxu1 %v6406_v23  ;;  %v6428_v23 = vld [vmem:[%s10106_s4 + $0x18c] ss:$16 sps:$4 sm:$0xff]  }
 0x245   :  { %3225 = vmatprep.mubr.bf16.mxu1 %v6410_v61  ;;  %v8467_v35 = vpop.permute.xlu1 %2059  ;;  %v8472_v52 = vpop.permute.xlu0 %2054  ;;  %v3809_v61 = vld [vmem:[%s10109_s7 + $0x178] sm:$0xff] }
 0x246   :  { %4003 = vperm.xlu1 %6352, %v3797_v53   ;;  %10249 = vst [vmem:[#allocation27_spill] sm:$0xff] %v8467_v35  ;;  %10250 = vst [vmem:[#allocation45_spill] sm:$0xff] %v8472_v52  ;;  %v5614_v52 = vld [vmem:[%s10110_s8 + $0x1d0] sm:$0xff] }
 0x247   :  { %3998 = vperm.xlu0 %6351, %v3796_v49   ;;  %v3808_v49 = vld [vmem:[%s10109_s7 + $0x170] sm:$0xff] }
 0x249   :  { %v8492_v53 = vpop.permute.xlu1 %2069 }
 0x24a   :  { %2937 = vmatmul.mubr.bf16.gmra.mxu0 %v6409_v30  ;;  %4013 = vperm.xlu1 %6352, %v3799_v16   ;;  %10251 = vst [vmem:[#allocation8_spill] sm:$0xff] %v8492_v53  ;;  %v8497_v30 = vpop.permute.xlu0 %2064  ;;  %v6427_v16 = vld [vmem:[%s10106_s4 + $0x180] ss:$16 sps:$4 sm:$0xff]  }
 0x24b   :  { %4008 = vperm.xlu0 %6351, %v3798_v54   ;;  %2944 = vmatprep.mubr.bf16.mxu0 %v6413_v0  ;;  %10252 = vst [vmem:[#allocation65_spill] sm:$0xff] %v8497_v30  ;;  %v3811_v0 = vld [vmem:[%s10109_s7 + $0x188] sm:$0xff]  ;;  %v6431_v54 = vld [vmem:[%s10106_s4 + $0x1a4] ss:$16 sps:$4 sm:$0xff]  }
 0x24c   :  { %3226 = vmatmul.mubr.bf16.gmra.mxu1 %v6412_v46  ;;  %v3810_v46 = vld [vmem:[%s10109_s7 + $0x180] sm:$0xff] }
 0x24d   :  { %3233 = vmatprep.mubr.bf16.mxu1 %v6416_v55  ;;  %v6430_v55 = vld [vmem:[%s10106_s4 + $0x188] ss:$16 sps:$4 sm:$0xff]  }
 0x24e   :  { %4023 = vperm.xlu1 %6352, %v3801_v63   ;;  %v6434_v63 = vld [vmem:[%s10106_s4 + $0x1ac] ss:$16 sps:$4 sm:$0xff]  }
 0x24f   :  { %4018 = vperm.xlu0 %6351, %v3800_v56   ;;  %v8517_v56 = vpop.permute.xlu1 %2104 }
 0x250   :  { %10253 = vst [vmem:[#allocation26_spill] sm:$0xff] %v8517_v56 }
 0x252   :  { %2945 = vmatmul.mubr.bf16.gmra.mxu0 %v6415_v60  ;;  %4033 = vperm.xlu1 %6352, %v3803_v48   ;;  %v8519_v60 = vpop.permute.xlu0 %2074  ;;  %v3813_v48 = vld [vmem:[%s10109_s7 + $0x198] sm:$0xff] }
 0x253   :  { %4028 = vperm.xlu0 %6351, %v3802_v20   ;;  %2952 = vmatprep.mubr.bf16.mxu0 %v6419_v13  ;;  %10254 = vst [vmem:[#allocation63_spill] sm:$0xff] %v8519_v60  ;;  %v3812_v13 = vld [vmem:[%s10109_s7 + $0x190] sm:$0xff] }
 0x254   :  { %3234 = vmatmul.mubr.bf16.gmra.mxu1 %v6418_v24  ;;  %v6433_v20 = vld [vmem:[%s10106_s4 + $0x1a0] ss:$16 sps:$4 sm:$0xff]   ;;  %v3815_v24 = vld [vmem:[%s10109_s7 + $0x1a8] sm:$0xff] }
 0x255   :  { %3241 = vmatprep.mubr.bf16.mxu1 %v6422_v37  ;;  %v6437_v37 = vld [vmem:[%s10106_s4 + $0x1c4] ss:$16 sps:$4 sm:$0xff]  }
 0x256   :  { %4043 = vperm.xlu1 %6352, %v3805_v44   ;;  %v8536_v44 = vpop.permute.xlu1 %2094 }
 0x257   :  { %4038 = vperm.xlu0 %6351, %v3804_v3   ;;  %10255 = vst [vmem:[#allocation64_spill] sm:$0xff] %v8536_v44  ;;  %v3814_v3 = vld [vmem:[%s10109_s7 + $0x1a0] sm:$0xff] }
 0x25a   :  { %2953 = vmatmul.mubr.bf16.gmra.mxu0 %v6421_v31  ;;  %4053 = vperm.xlu1 %6352, %v3807_v50   ;;  %v6436_v31 = vld [vmem:[%s10106_s4 + $0x1a8] ss:$16 sps:$4 sm:$0xff]   ;;  %v8544_v50 = vpop.permute.xlu0 %2109 }
 0x25b   :  { %4048 = vperm.xlu0 %6351, %v3806_v45   ;;  %2960 = vmatprep.mubr.bf16.mxu0 %v6425_v19  ;;  %10256 = vst [vmem:[#allocation24_spill] sm:$0xff] %v8544_v50  ;;  %v6440_v19 = vld [vmem:[%s10106_s4 + $0x1cc] ss:$16 sps:$4 sm:$0xff]  }
 0x25c   :  { %3242 = vmatmul.mubr.bf16.gmra.mxu1 %v6424_v34  ;;  %v3817_v45 = vld [vmem:[%s10109_s7 + $0x1b8] sm:$0xff]  ;;  %v3816_v34 = vld [vmem:[%s10109_s7 + $0x1b0] sm:$0xff] }
 0x25d   :  { %3249 = vmatprep.mubr.bf16.mxu1 %v6428_v23  ;;  %v8555_v23 = vpop.permute.xlu1 %2084 }
 0x25e   :  { %4063 = vperm.xlu1 %6352, %v3809_v61   ;;  %10257 = vst [vmem:[#allocation25_spill] sm:$0xff] %v8555_v23  ;;  %v6439_v61 = vld [vmem:[%s10106_s4 + $0x1c0] ss:$16 sps:$4 sm:$0xff]  }
 0x25f   :  { %4058 = vperm.xlu0 %6351, %v3808_v49   ;;  %v8560_v49 = vpop.permute.xlu0 %2099 }
 0x260   :  { %10258 = vst [vmem:[#allocation62_spill] sm:$0xff] %v8560_v49  ;;  %v5615_v49 = vld [vmem:[%s10110_s8 + $0x1d8] sm:$0xff] }
 0x262   :  { %2961 = vmatmul.mubr.bf16.gmra.mxu0 %v6427_v16  ;;  %4073 = vperm.xlu1 %6352, %v3811_v0   ;;  %v3819_v16 = vld [vmem:[%s10109_s7 + $0x1c8] sm:$0xff]  ;;  %v6443_v0 = vld [vmem:[%s10106_s4 + $0x1e4] ss:$16 sps:$4 sm:$0xff]  }
 0x263   :  { %4068 = vperm.xlu0 %6351, %v3810_v46   ;;  %2968 = vmatprep.mubr.bf16.mxu0 %v6431_v54  ;;  %v3818_v54 = vld [vmem:[%s10109_s7 + $0x1c0] sm:$0xff]  ;;  %v6442_v46 = vld [vmem:[%s10106_s4 + $0x1c8] ss:$16 sps:$4 sm:$0xff]  }
 0x264   :  { %3250 = vmatmul.mubr.bf16.gmra.mxu1 %v6430_v55  ;;  %v6446_v55 = vld [vmem:[%s10106_s4 + $0x1ec] ss:$16 sps:$4 sm:$0xff]  }
 0x265   :  { %3257 = vmatprep.mubr.bf16.mxu1 %v6434_v63  ;;  %v3821_v63 = vld [vmem:[%s10109_s7 + $0x1d8] sm:$0xff] }
 0x266   :  { %4083 = vperm.xlu1 %6352, %v3813_v48   ;;  %v8580_v48 = vpop.permute.xlu1 %2079 }
 0x267   :  { %4078 = vperm.xlu0 %6351, %v3812_v13   ;;  %10259 = vst [vmem:[#allocation23_spill] sm:$0xff] %v8580_v48  ;;  %v3820_v13 = vld [vmem:[%s10109_s7 + $0x1d0] sm:$0xff] }
 0x26a   :  { %2969 = vmatmul.mubr.bf16.gmra.mxu0 %v6433_v20  ;;  %4093 = vperm.xlu1 %6352, %v3815_v24   ;;  %v8585_v20 = vpop.permute.xlu0 %2089  ;;  %v6445_v24 = vld [vmem:[%s10106_s4 + $0x1e0] ss:$16 sps:$4 sm:$0xff]  }
 0x26b   :  { %4088 = vperm.xlu0 %6351, %v3814_v3   ;;  %2976 = vmatprep.mubr.bf16.mxu0 %v6437_v37  ;;  %10260 = vst [vmem:[#allocation44_spill] sm:$0xff] %v8585_v20  ;;  %v3823_v37 = vld [vmem:[%s10109_s7 + $0x1e8] sm:$0xff]  ;;  %v6449_v3 = vld [vmem:[%s10106_s4 + $0x204] ss:$16 sps:$4 sm:$0xff]  }
 0x26c   :  { %3258 = vmatmul.mubr.bf16.gmra.mxu1 %v6436_v31  ;;  %v3822_v31 = vld [vmem:[%s10109_s7 + $0x1e0] sm:$0xff]  ;;  %v5610_v20 = vld [vmem:[%s10110_s8 + $0x1b0] sm:$0xff] }
 0x26d   :  { %3265 = vmatprep.mubr.bf16.mxu1 %v6440_v19  ;;  %v6448_v19 = vld [vmem:[%s10106_s4 + $0x1e8] ss:$16 sps:$4 sm:$0xff]  }
 0x26e   :  { %4103 = vperm.xlu1 %6352, %v3817_v45   ;;  %v6452_v45 = vld [vmem:[%s10106_s4 + $0x20c] ss:$16 sps:$4 sm:$0xff]  }
 0x26f   :  { %4098 = vperm.xlu0 %6351, %v3816_v34   ;;  %v8605_v34 = vpop.permute.xlu1 %2184 }
 0x270   :  { %10261 = vst [vmem:[#allocation61_spill] sm:$0xff] %v8605_v34  ;;  %v5578_v34 = vld [vmem:[%s10110_s8 + $0xb0] sm:$0xff] }
 0x272   :  { %2977 = vmatmul.mubr.bf16.gmra.mxu0 %v6439_v61  ;;  %4113 = vperm.xlu1 %6352, %v3819_v16   ;;  %v8607_v61 = vpop.permute.xlu0 %2114  ;;  %v3825_v16 = vld [vmem:[%s10109_s7 + $0x1f8] sm:$0xff] }
 0x273   :  { %4108 = vperm.xlu0 %6351, %v3818_v54   ;;  %2984 = vmatprep.mubr.bf16.mxu0 %v6443_v0  ;;  %10262 = vst [vmem:[#allocation22_spill] sm:$0xff] %v8607_v61  ;;  %v3824_v0 = vld [vmem:[%s10109_s7 + $0x1f0] sm:$0xff] }
 0x274   :  { %3266 = vmatmul.mubr.bf16.gmra.mxu1 %v6442_v46  ;;  %v6451_v54 = vld [vmem:[%s10106_s4 + $0x200] ss:$16 sps:$4 sm:$0xff]   ;;  %v5557_v46 = vld [vmem:[%s10110_s8 + $0x8] sm:$0xff] }
 0x275   :  { %3273 = vmatprep.mubr.bf16.mxu1 %v6446_v55  ;;  %v6455_v55 = vld [vmem:[%s10106_s4 + $0x224] ss:$16 sps:$4 sm:$0xff]  }
 0x276   :  { %4123 = vperm.xlu1 %6352, %v3821_v63   ;;  %v8624_v63 = vpop.permute.xlu1 %2174 }
 0x277   :  { %4118 = vperm.xlu0 %6351, %v3820_v13   ;;  %10263 = vst [vmem:[#allocation43_spill] sm:$0xff] %v8624_v63  ;;  %v5556_v13 = vld [vmem:[%s10110_s8] sm:$0xff] }
 0x27a   :  { %2985 = vmatmul.mubr.bf16.gmra.mxu0 %v6445_v24  ;;  %4133 = vperm.xlu1 %6352, %v3823_v37   ;;  %v6454_v24 = vld [vmem:[%s10106_s4 + $0x208] ss:$16 sps:$4 sm:$0xff]   ;;  %v8632_v37 = vpop.permute.xlu0 %2189 }
 0x27b   :  { %4128 = vperm.xlu0 %6351, %v3822_v31   ;;  %2992 = vmatprep.mubr.bf16.mxu0 %v6449_v3  ;;  %10264 = vst [vmem:[#allocation60_spill] sm:$0xff] %v8632_v37  ;;  %v6458_v3 = vld [vmem:[%s10106_s4 + $0x22c] ss:$16 sps:$4 sm:$0xff]  }
 0x27c   :  { %3274 = vmatmul.mubr.bf16.gmra.mxu1 %v6448_v19  ;;  %v5559_v31 = vld [vmem:[%s10110_s8 + $0x18] sm:$0xff]  ;;  %v5558_v19 = vld [vmem:[%s10110_s8 + $0x10] sm:$0xff] }
 0x27d   :  { %3281 = vmatprep.mubr.bf16.mxu1 %v6452_v45  ;;  %v8643_v45 = vpop.permute.xlu1 %2164 }
 0x27e   :  { %4143 = vperm.xlu1 %6352, %v3825_v16   ;;  %10265 = vst [vmem:[#allocation21_spill] sm:$0xff] %v8643_v45  ;;  %v6457_v16 = vld [vmem:[%s10106_s4 + $0x220] ss:$16 sps:$4 sm:$0xff]  }
 0x27f   :  { %4138 = vperm.xlu0 %6351, %v3824_v0   ;;  %v8648_v0 = vpop.permute.xlu0 %2179 }
 0x280   :  { %10266 = vst [vmem:[#allocation42_spill] sm:$0xff] %v8648_v0  ;;  %v5579_v0 = vld [vmem:[%s10110_s8 + $0xb8] sm:$0xff] }
 0x282   :  { %2993 = vmatmul.mubr.bf16.gmra.mxu0 %v6451_v54  ;;  %5627 = vperm.xlu1 %6352, %v5557_v46   ;;  %v5561_v54 = vld [vmem:[%s10110_s8 + $0x28] sm:$0xff]  ;;  %v6461_v46 = vld [vmem:[%s10106_s4 + $0x244] ss:$16 sps:$4 sm:$0xff]  }
 0x283   :  { %5622 = vperm.xlu0 %6351, %v5556_v13   ;;  %3000 = vmatprep.mubr.bf16.mxu0 %v6455_v55  ;;  %v5560_v55 = vld [vmem:[%s10110_s8 + $0x20] sm:$0xff]  ;;  %v6460_v13 = vld [vmem:[%s10106_s4 + $0x228] ss:$16 sps:$4 sm:$0xff]   ;;  %v8673_v45 = vpop.permute.xlu0 %2169 }
 0x284   :  { %3282 = vmatmul.mubr.bf16.gmra.mxu1 %v6454_v24  ;;  %v6464_v24 = vld [vmem:[%s10106_s4 + $0x24c] ss:$16 sps:$4 sm:$0xff]   ;;  %10268 = vst [vmem:[#allocation20_spill] sm:$0xff] %v8673_v45  ;;  %v5566_v45 = vld [vmem:[%s10110_s8 + $0x50] sm:$0xff] }
 0x285   :  { %3289 = vmatprep.mubr.bf16.mxu1 %v6458_v3  ;;  %v5563_v3 = vld [vmem:[%s10110_s8 + $0x38] sm:$0xff] }
 0x286   :  { %5637 = vperm.xlu1 %6352, %v5559_v31   ;;  %v8668_v31 = vpop.permute.xlu1 %2154 }
 0x287   :  { %5632 = vperm.xlu0 %6351, %v5558_v19   ;;  %10267 = vst [vmem:[#allocation59_spill] sm:$0xff] %v8668_v31  ;;  %v5562_v19 = vld [vmem:[%s10110_s8 + $0x30] sm:$0xff]  ;;  %v5567_v31 = vld [vmem:[%s10110_s8 + $0x58] sm:$0xff] }
 0x28a   :  { %3001 = vmatmul.mubr.bf16.gmra.mxu0 %v6457_v16  ;;  %5647 = vperm.xlu1 %6352, %v5561_v54   ;;  %v6463_v16 = vld [vmem:[%s10106_s4 + $0x240] ss:$16 sps:$4 sm:$0xff]   ;;  %v5565_v54 = vld [vmem:[%s10110_s8 + $0x48] sm:$0xff] }
 0x28b   :  { %5642 = vperm.xlu0 %6351, %v5560_v55   ;;  %3008 = vmatprep.mubr.bf16.mxu0 %v6461_v46  ;;  %v6467_v46 = vld [vmem:[%s10106_s4 + $0x264] ss:$16 sps:$4 sm:$0xff]  }
 0x28c   :  { %3290 = vmatmul.mubr.bf16.gmra.mxu1 %v6460_v13  ;;  %v5564_v55 = vld [vmem:[%s10110_s8 + $0x40] sm:$0xff]  ;;  %v6466_v13 = vld [vmem:[%s10106_s4 + $0x248] ss:$16 sps:$4 sm:$0xff]  }
 0x28d   :  { %3297 = vmatprep.mubr.bf16.mxu1 %v6464_v24  ;;  %v6470_v24 = vld [vmem:[%s10106_s4 + $0x26c] ss:$16 sps:$4 sm:$0xff]  }
 0x28e   :  { %5657 = vperm.xlu1 %6352, %v5563_v3   ;;  %v8693_v3 = vpop.permute.xlu1 %2144 }
 0x28f   :  { %5652 = vperm.xlu0 %6351, %v5562_v19   ;;  %10269 = vst [vmem:[#allocation41_spill] sm:$0xff] %v8693_v3  ;;  %v8695_v19 = vpop.permute.xlu0 %2159  ;;  %v5571_v3 = vld [vmem:[%s10110_s8 + $0x78] sm:$0xff] }
 0x290   :  { %10270 = vst [vmem:[#allocation58_spill] sm:$0xff] %v8695_v19  ;;  %v5570_v19 = vld [vmem:[%s10110_s8 + $0x70] sm:$0xff] }
 0x292   :  { %3009 = vmatmul.mubr.bf16.gmra.mxu0 %v6463_v16  ;;  %5667 = vperm.xlu1 %6352, %v5565_v54   ;;  %v6469_v16 = vld [vmem:[%s10106_s4 + $0x260] ss:$16 sps:$4 sm:$0xff]   ;;  %v5569_v54 = vld [vmem:[%s10110_s8 + $0x68] sm:$0xff] }
 0x293   :  { %5662 = vperm.xlu0 %6351, %v5564_v55   ;;  %3016 = vmatprep.mubr.bf16.mxu0 %v6467_v46  ;;  %v6473_v46 = vld [vmem:[%s10106_s4 + $0x284] ss:$16 sps:$4 sm:$0xff]   ;;  %v8712_v55 = vpop.permute.xlu1 %2134 }
 0x294   :  { %3298 = vmatmul.mubr.bf16.gmra.mxu1 %v6466_v13  ;;  %10271 = vst [vmem:[#allocation19_spill] sm:$0xff] %v8712_v55  ;;  %v5568_v13 = vld [vmem:[%s10110_s8 + $0x60] sm:$0xff]  ;;  %v5591_v55 = vld [vmem:[%s10110_s8 + $0x118] sm:$0xff] }
 0x295   :  { %3305 = vmatprep.mubr.bf16.mxu1 %v6470_v24  ;;  %v8720_v24 = vpop.permute.xlu0 %2149 }
 0x296   :  { %5677 = vperm.xlu1 %6352, %v5567_v31   ;;  %v6472_v31 = vld [vmem:[%s10106_s4 + $0x268] ss:$16 sps:$4 sm:$0xff]   ;;  %10272 = vst [vmem:[#allocation40_spill] sm:$0xff] %v8720_v24  ;;  %v5574_v24 = vld [vmem:[%s10110_s8 + $0x90] sm:$0xff] }
 0x297   :  { %5672 = vperm.xlu0 %6351, %v5566_v45   ;;  %v6476_v45 = vld [vmem:[%s10106_s4 + $0x28c] ss:$16 sps:$4 sm:$0xff]   ;;  %v8731_v37 = vpop.permute.xlu1 %2124 }
 0x298   :  { %10273 = vst [vmem:[#allocation57_spill] sm:$0xff] %v8731_v37 }
 0x29a   :  { %3017 = vmatmul.mubr.bf16.gmra.mxu0 %v6469_v16  ;;  %5687 = vperm.xlu1 %6352, %v5569_v54   ;;  %v6475_v16 = vld [vmem:[%s10106_s4 + $0x280] ss:$16 sps:$4 sm:$0xff]   ;;  %v8736_v54 = vpop.permute.xlu0 %2139 }
 0x29b   :  { %5682 = vperm.xlu0 %6351, %v5568_v13   ;;  %3024 = vmatprep.mubr.bf16.mxu0 %v6473_v46  ;;  %10274 = vst [vmem:[#allocation18_spill] sm:$0xff] %v8736_v54  ;;  %v5573_v46 = vld [vmem:[%s10110_s8 + $0x88] sm:$0xff]  ;;  %v6479_v13 = vld [vmem:[%s10106_s4 + $0x2a4] ss:$16 sps:$4 sm:$0xff]   ;;  %v8756_v54 = vpop.permute.xlu1 %2119 }
 0x29c   :  { %3306 = vmatmul.mubr.bf16.gmra.mxu1 %v6472_v31  ;;  %v5572_v31 = vld [vmem:[%s10110_s8 + $0x80] sm:$0xff]  ;;  %10275 = vst [vmem:[#allocation39_spill] sm:$0xff] %v8756_v54 }
 0x29d   :  { %3313 = vmatprep.mubr.bf16.mxu1 %v6476_v45  ;;  %v5575_v45 = vld [vmem:[%s10110_s8 + $0x98] sm:$0xff] }
 0x29e   :  { %5697 = vperm.xlu1 %6352, %v5571_v3   ;;  %v6478_v3 = vld [vmem:[%s10106_s4 + $0x288] ss:$16 sps:$4 sm:$0xff]   ;;  %v8761_v63 = vpop.permute.xlu0 %2129 }
 0x29f   :  { %5692 = vperm.xlu0 %6351, %v5570_v19   ;;  %v6482_v19 = vld [vmem:[%s10106_s4 + $0x2ac] ss:$16 sps:$4 sm:$0xff]   ;;  %10276 = vst [vmem:[#allocation56_spill] sm:$0xff] %v8761_v63 }
 0x2a2   :  { %3025 = vmatmul.mubr.bf16.gmra.mxu0 %v6475_v16  ;;  %5707 = vperm.xlu1 %6352, %v5573_v46   ;;  %v6481_v16 = vld [vmem:[%s10106_s4 + $0x2a0] ss:$16 sps:$4 sm:$0xff]   ;;  %v5577_v46 = vld [vmem:[%s10110_s8 + $0xa8] sm:$0xff] }
 0x2a3   :  { %5702 = vperm.xlu0 %6351, %v5572_v31   ;;  %3032 = vmatprep.mubr.bf16.mxu0 %v6479_v13  ;;  %v6485_v13 = vld [vmem:[%s10106_s4 + $0x2c4] ss:$16 sps:$4 sm:$0xff]  }
 0x2a4   :  { %3314 = vmatmul.mubr.bf16.gmra.mxu1 %v6478_v3  ;;  %v5576_v31 = vld [vmem:[%s10110_s8 + $0xa0] sm:$0xff]  ;;  %v6484_v3 = vld [vmem:[%s10106_s4 + $0x2a8] ss:$16 sps:$4 sm:$0xff]  }
 0x2a5   :  { %3321 = vmatprep.mubr.bf16.mxu1 %v6482_v19  ;;  %v8781_v19 = vpop.permute.xlu1 %3833 }
 0x2a6   :  { %5717 = vperm.xlu1 %6352, %v5575_v45   ;;  %10277 = vst [vmem:[#allocation17_spill] sm:$0xff] %v8781_v19  ;;  %v8783_v45 = vpop.permute.xlu0 %3828  ;;  %v5582_v19 = vld [vmem:[%s10110_s8 + $0xd0] sm:$0xff] }
 0x2a7   :  { %5712 = vperm.xlu0 %6351, %v5574_v24   ;;  %v6488_v24 = vld [vmem:[%s10106_s4 + $0x2cc] ss:$16 sps:$4 sm:$0xff]   ;;  %10278 = vst [vmem:[#allocation38_spill] sm:$0xff] %v8783_v45 }
 0x2aa   :  { %3033 = vmatmul.mubr.bf16.gmra.mxu0 %v6481_v16  ;;  %5727 = vperm.xlu1 %6352, %v5577_v46   ;;  %v6487_v16 = vld [vmem:[%s10106_s4 + $0x2c0] ss:$16 sps:$4 sm:$0xff]   ;;  %v5581_v46 = vld [vmem:[%s10110_s8 + $0xc8] sm:$0xff] }
 0x2ab   :  { %5722 = vperm.xlu0 %6351, %v5576_v31   ;;  %3040 = vmatprep.mubr.bf16.mxu0 %v6485_v13  ;;  %v6491_v13 = vld [vmem:[%s10106_s4 + $0x2e4] ss:$16 sps:$4 sm:$0xff]   ;;  %v8800_v31 = vpop.permute.xlu1 %3843 }
 0x2ac   :  { %3322 = vmatmul.mubr.bf16.gmra.mxu1 %v6484_v3  ;;  %10279 = vst [vmem:[#allocation55_spill] sm:$0xff] %v8800_v31  ;;  %v5580_v3 = vld [vmem:[%s10110_s8 + $0xc0] sm:$0xff]  ;;  %v5583_v31 = vld [vmem:[%s10110_s8 + $0xd8] sm:$0xff] }
 0x2ad   :  { %3329 = vmatprep.mubr.bf16.mxu1 %v6488_v24  ;;  %v8808_v24 = vpop.permute.xlu0 %3838 }
 0x2ae   :  { %5737 = vperm.xlu1 %6352, %v5579_v0   ;;  %v6490_v0 = vld [vmem:[%s10106_s4 + $0x2c8] ss:$16 sps:$4 sm:$0xff]   ;;  %10280 = vst [vmem:[#allocation16_spill] sm:$0xff] %v8808_v24 }
 0x2af   :  { %5732 = vperm.xlu0 %6351, %v5578_v34   ;;  %v6494_v34 = vld [vmem:[%s10106_s4 + $0x2ec] ss:$16 sps:$4 sm:$0xff]   ;;  %v8819_v45 = vpop.permute.xlu1 %3853 }
 0x2b0   :  { %10281 = vst [vmem:[#allocation37_spill] sm:$0xff] %v8819_v45 }
 0x2b2   :  { %3041 = vmatmul.mubr.bf16.gmra.mxu0 %v6487_v16  ;;  %5747 = vperm.xlu1 %6352, %v5581_v46   ;;  %v6493_v16 = vld [vmem:[%s10106_s4 + $0x2e0] ss:$16 sps:$4 sm:$0xff]   ;;  %v8824_v46 = vpop.permute.xlu0 %3848 }
 0x2b3   :  { %5742 = vperm.xlu0 %6351, %v5580_v3   ;;  %3048 = vmatprep.mubr.bf16.mxu0 %v6491_v13  ;;  %10282 = vst [vmem:[#allocation54_spill] sm:$0xff] %v8824_v46  ;;  %v5585_v13 = vld [vmem:[%s10110_s8 + $0xe8] sm:$0xff]  ;;  %v6497_v3 = vld [vmem:[%s10106_s4 + $0x304] ss:$16 sps:$4 sm:$0xff]   ;;  %v8844_v45 = vpop.permute.xlu1 %3863 }
 0x2b4   :  { %3330 = vmatmul.mubr.bf16.gmra.mxu1 %v6490_v0  ;;  %v5584_v0 = vld [vmem:[%s10110_s8 + $0xe0] sm:$0xff]  ;;  %10283 = vst [vmem:[#allocation15_spill] sm:$0xff] %v8844_v45  ;;  %v5586_v46 = vld [vmem:[%s10110_s8 + $0xf0] sm:$0xff] }
 0x2b5   :  { %3337 = vmatprep.mubr.bf16.mxu1 %v6494_v34  ;;  %v5587_v34 = vld [vmem:[%s10110_s8 + $0xf8] sm:$0xff] }
 0x2b6   :  { %5757 = vperm.xlu1 %6352, %v5583_v31   ;;  %v6496_v31 = vld [vmem:[%s10106_s4 + $0x2e8] ss:$16 sps:$4 sm:$0xff]   ;;  %v8849_v24 = vpop.permute.xlu0 %3858 }
 0x2b7   :  { %5752 = vperm.xlu0 %6351, %v5582_v19   ;;  %v6500_v19 = vld [vmem:[%s10106_s4 + $0x30c] ss:$16 sps:$4 sm:$0xff]   ;;  %10284 = vst [vmem:[#allocation36_spill] sm:$0xff] %v8849_v24 }
 0x2ba   :  { %3049 = vmatmul.mubr.bf16.gmra.mxu0 %v6493_v16  ;;  %5767 = vperm.xlu1 %6352, %v5585_v13   ;;  %v6499_v16 = vld [vmem:[%s10106_s4 + $0x300] ss:$16 sps:$4 sm:$0xff]   ;;  %v5589_v13 = vld [vmem:[%s10110_s8 + $0x108] sm:$0xff]  ;;  %v8871_v45 = vpop.permute.xlu0 %3868 }
 0x2bb   :  { %5762 = vperm.xlu0 %6351, %v5584_v0   ;;  %3056 = vmatprep.mubr.bf16.mxu0 %v6497_v3  ;;  %v6503_v3 = vld [vmem:[%s10106_s4 + $0x324] ss:$16 sps:$4 sm:$0xff]   ;;  %10286 = vst [vmem:[#allocation14_spill] sm:$0xff] %v8871_v45 }
 0x2bc   :  { %3338 = vmatmul.mubr.bf16.gmra.mxu1 %v6496_v31  ;;  %v5588_v0 = vld [vmem:[%s10110_s8 + $0x100] sm:$0xff]  ;;  %v6502_v31 = vld [vmem:[%s10106_s4 + $0x308] ss:$16 sps:$4 sm:$0xff]  }
 0x2bd   :  { %3345 = vmatprep.mubr.bf16.mxu1 %v6500_v19  ;;  %v8869_v19 = vpop.permute.xlu1 %3873 }
 0x2be   :  { %5777 = vperm.xlu1 %6352, %v5587_v34   ;;  %10285 = vst [vmem:[#allocation53_spill] sm:$0xff] %v8869_v19  ;;  %v5590_v19 = vld [vmem:[%s10110_s8 + $0x110] sm:$0xff] }
 0x2bf   :  { %5772 = vperm.xlu0 %6351, %v5586_v46   ;;  %v6506_v46 = vld [vmem:[%s10106_s4 + $0x32c] ss:$16 sps:$4 sm:$0xff]  }
 0x2c2   :  { %v2866_v34 = vpop.f32.mrf.mxu0  ;;  %3057 = vmatmul.mubr.bf16.gmra.mxu0 %v6499_v16  ;;  %5787 = vperm.xlu1 %6352, %v5589_v13  }
 0x2c3   :  { %v2867_v24 = vadd.f32 %v2866_v34, %v8131_v2  ;;  %5782 = vperm.xlu0 %6351, %v5588_v0   ;;  %3064 = vmatprep.mubr.bf16.mxu0 %v6503_v3  ;;  %v6505_v2 = vld [vmem:[%s10106_s4 + $0x320] ss:$16 sps:$4 sm:$0xff]   ;;  %v6509_v3 = vld [vmem:[%s10106_s4 + $0x344] ss:$16 sps:$4 sm:$0xff]   ;;  %v8889_v0 = vpop.permute.xlu1 %3883  ;;  %v6512_v34 = vld [vmem:[%s10106_s4 + $0x34c] ss:$16 sps:$4 sm:$0xff]  }
 0x2c4   :  { %v2868_v63 = vpop.f32.mrf.mxu0  ;;  %v3155_v35 = vpop.f32.mrf.mxu1  ;;  %3346 = vmatmul.mubr.bf16.gmra.mxu1 %v6502_v31  ;;  %10287 = vst [vmem:[#allocation35_spill] sm:$0xff] %v8889_v0  ;;  %v6508_v31 = vld [vmem:[%s10106_s4 + $0x328] ss:$16 sps:$4 sm:$0xff]  }
 0x2c5   :  { %v3156_v37 = vadd.f32 %v3155_v35, %v2867_v24  ;;  %3353 = vmatprep.mubr.bf16.mxu1 %v6506_v46  ;;  %v5593_v63 = vld [vmem:[%s10110_s8 + $0x128] sm:$0xff]  ;;  %v8898_v46 = vpop.permute.xlu0 %3878 }
 0x2c6   :  { %v2869_v16 = vpop.f32.mrf.mxu0  ;;  %5797 = vperm.xlu1 %6352, %v5591_v55   ;;  %v3157_v13 = vpop.f32.mrf.mxu1  ;;  %v5592_v55 = vld [vmem:[%s10110_s8 + $0x120] sm:$0xff]  ;;  %10288 = vst [vmem:[#allocation52_spill] sm:$0xff] %v8898_v46 }
 0x2c7   :  { %5792 = vperm.xlu0 %6351, %v5590_v19   ;;  %v2870_v35 = vadd.f32 %v2869_v16, %v8129_v33  ;;  %v3474_v13 = vmul.f32 0.2, %v3156_v37  ;;  %vm3410_vm0 = vcmp.gt.f32.partialorder %v3156_v37, 0.0 }
 0x2c8   :  { %v2871_v24 = vpop.f32.mrf.mxu0  ;;  %v3158_v19 = vpop.f32.mrf.mxu1 }
 0x2c9   :  { %v3159_v33 = vadd.f32 %v3158_v19, %v2870_v35  ;;  %v5595_v24 = vld [vmem:[%s10110_s8 + $0x138] sm:$0xff] }
 0x2ca   :  { %v2874_v0 = vpop.f32.mrf.mxu0  ;;  %3065 = vmatmul.mubr.bf16.gmra.mxu0 %v6505_v2  ;;  %5807 = vperm.xlu1 %6352, %v5593_v63   ;;  %v3160_v16 = vpop.f32.mrf.mxu1  ;;  %v5594_v2 = vld [vmem:[%s10110_s8 + $0x130] sm:$0xff] }
 0x2cb   :  { %5802 = vperm.xlu0 %6351, %v5592_v55   ;;  %3072 = vmatprep.mubr.bf16.mxu0 %v6509_v3  ;;  %v2875_v46 = vadd.f32 %v2874_v0, %v8151_v29  ;;  %vm3411_vm1 = vcmp.gt.f32.partialorder %v3159_v33, 0.0  ;;  %v3475_v45 = vmul.f32 0.2, %v3159_v33  ;;  %v8910_v63 = vpop.permute.xlu1 %3893  ;;  %v8912_v55 = vsel %vm3410_vm0, %v3156_v37, %v3474_v13  ;;  %v6511_v29 = vld [vmem:[%s10106_s4 + $0x340] ss:$16 sps:$4 sm:$0xff]   ;;  %v5597_v37 = vld [vmem:[%s10110_s8 + $0x148] sm:$0xff] }
 0x2cc   :  { %v2876_v30 = vpop.f32.mrf.mxu0  ;;  %3354 = vmatmul.mubr.bf16.gmra.mxu1 %v6508_v31  ;;  %v3163_v35 = vpop.f32.mrf.mxu1  ;;  %10289 = vst [vmem:[#allocation13_spill] sm:$0xff] %v8910_v63  ;;  %v5596_v13 = vld [vmem:[%s10110_s8 + $0x140] sm:$0xff] }
 0x2cd   :  { %3361 = vmatprep.mubr.bf16.mxu1 %v6512_v34  ;;  %v8914_v19 = vsel %vm3411_vm1, %v3159_v33, %v3475_v45  ;;  %v3164_v3 = vadd.f32 %v3163_v35, %v2875_v46  ;;  %v8919_v30 = vpop.permute.xlu0 %3888  ;;  %v6515_v45 = vld [vmem:[%s10106_s4 + $0x364] ss:$16 sps:$4 sm:$0xff]   ;;  %v6514_v33 = vld [vmem:[%s10106_s4 + $0x348] ss:$16 sps:$4 sm:$0xff]  }
 0x2ce   :  { %v2877_v16 = vpop.f32.mrf.mxu0  ;;  %5817 = vperm.xlu1 %6352, %v5595_v24   ;;  %10290 = vst [vmem:[#allocation34_spill] sm:$0xff] %v8919_v30  ;;  %v3165_v31 = vpop.f32.mrf.mxu1 }
 0x2cf   :  { %5812 = vperm.xlu0 %6351, %v5594_v2   ;;  %v2878_v46 = vadd.f32 %v2877_v16, %v8149_v11  ;;  %v6518_v2 = vld [vmem:[%s10106_s4 + $0x36c] ss:$16 sps:$4 sm:$0xff]   ;;  %v3476_v35 = vmul.f32 0.2, %v3164_v3  ;;  %vm3412_vm2 = vcmp.gt.f32.partialorder %v3164_v3, 0.0 }
 0x2d0   :  { %v2879_v34 = vpop.f32.mrf.mxu0  ;;  %v3166_v24 = vpop.f32.mrf.mxu1  ;;  %v5599_v16 = vld [vmem:[%s10110_s8 + $0x158] sm:$0xff] }
 0x2d1   :  { %v3167_v0 = vadd.f32 %v3166_v24, %v2878_v46  ;;  %v8942_v34 = vpop.permute.xlu1 %3903 }
 0x2d2   :  { %v2882_v31 = vpop.f32.mrf.mxu0  ;;  %3073 = vmatmul.mubr.bf16.gmra.mxu0 %v6511_v29  ;;  %5827 = vperm.xlu1 %6352, %v5597_v37   ;;  %v3168_v11 = vpop.f32.mrf.mxu1  ;;  %10291 = vst [vmem:[#allocation51_spill] sm:$0xff] %v8942_v34  ;;  %v5598_v29 = vld [vmem:[%s10110_s8 + $0x150] sm:$0xff] }
 0x2d3   :  { %5822 = vperm.xlu0 %6351, %v5596_v13   ;;  %3080 = vmatprep.mubr.bf16.mxu0 %v6515_v45  ;;  %v2883_v63 = vadd.f32 %v2882_v31, %v8165_v8  ;;  %vm3413_vm3 = vcmp.gt.f32.partialorder %v3167_v0, 0.0  ;;  %v3477_v30 = vmul.f32 0.2, %v3167_v0  ;;  %v8948_v37 = vpop.permute.xlu0 %3898  ;;  %v8950_v13 = vsel %vm3412_vm2, %v3164_v3, %v3476_v35  ;;  %v6517_v8 = vld [vmem:[%s10106_s4 + $0x360] ss:$16 sps:$4 sm:$0xff]   ;;  %v5601_v3 = vld [vmem:[%s10110_s8 + $0x168] sm:$0xff] }
 0x2d4   :  { %v2884_v54 = vpop.f32.mrf.mxu0  ;;  %3362 = vmatmul.mubr.bf16.gmra.mxu1 %v6514_v33  ;;  %10292 = vst [vmem:[#allocation12_spill] sm:$0xff] %v8948_v37  ;;  %v3171_v46 = vpop.f32.mrf.mxu1  ;;  %v6526_v31 = vld [vmem:[%s10106_s4 + $0x38c] ss:$16 sps:$4 sm:$0xff]   ;;  %v5602_v34 = vld [vmem:[%s10110_s8 + $0x170] sm:$0xff] }
 0x2d5   :  { %3369 = vmatprep.mubr.bf16.mxu1 %v6518_v2  ;;  %v8952_v24 = vsel %vm3413_vm3, %v3167_v0, %v3477_v30  ;;  %v8956_v11 = vadd.f32 %v3171_v46, %v2883_v63  ;;  %v6523_v30 = vld [vmem:[%s10106_s4 + $0x384] ss:$16 sps:$4 sm:$0xff]   ;;  %v6520_v2 = vld [vmem:[%s10106_s4 + $0x368] ss:$16 sps:$4 sm:$0xff]  }
 0x2d6   :  { %v8954_v45 = vpop.f32.mrf.mxu0  ;;  %5837 = vperm.xlu1 %6352, %v5599_v16   ;;  %v3173_v33 = vpop.f32.mrf.mxu1  ;;  %v5600_v0 = vld [vmem:[%s10110_s8 + $0x160] sm:$0xff] }
 0x2d7   :  { %5832 = vperm.xlu0 %6351, %v5598_v29   ;;  %v8980_v16 = vpop.permute.xlu1 %3913  ;;  %v8984_v46 = vpop.permute.xlu0 %3908  ;;  %vm3414_vm3 = vcmp.gt.f32.partialorder %v8956_v11, 0.0 }
 0x2d8   :  { %v2887_v63 = vpop.f32.mrf.mxu0  ;;  %v8975_v35 = vpop.f32.mrf.mxu1  ;;  %10293 = vst [vmem:[#allocation33_spill] sm:$0xff] %v8980_v16  ;;  %10294 = vst [vmem:[#allocation50_spill] sm:$0xff] %v8984_v46  ;;  %v6532_v46 = vld [vmem:[%s10106_s4 + $0x3ac] ss:$16 sps:$4 sm:$0xff]  }
 0x2d9   :  { %v5603_v63 = vld [vmem:[%s10110_s8 + $0x178] sm:$0xff] }
 0x2da   :  { %v8982_v29 = vpop.f32.mrf.mxu0  ;;  %3081 = vmatmul.mubr.bf16.gmra.mxu0 %v6517_v8  ;;  %5847 = vperm.xlu1 %6352, %v5601_v3   ;;  %v3176_v33 = vpop.f32.mrf.mxu1  ;;  %v6521_v3 = vld [vmem:[%s10106_s4 + $0x380] ss:$16 sps:$4 sm:$0xff]  }
 0x2db   :  { %5842 = vperm.xlu0 %6351, %v5600_v0   ;;  %3088 = vmatprep.mubr.bf16.mxu0 %v6523_v30  ;;  %v6529_v30 = vld [vmem:[%s10106_s4 + $0x3a4] ss:$16 sps:$4 sm:$0xff]  }
 0x2dc   :  { %v2892_v54 = vpop.f32.mrf.mxu0  ;;  %3370 = vmatmul.mubr.bf16.gmra.mxu1 %v6520_v2  ;;  %v8992_v16 = vpop.f32.mrf.mxu1  ;;  %v5604_v33 = vld [vmem:[%s10110_s8 + $0x180] sm:$0xff] }
 0x2dd   :  { %3377 = vmatprep.mubr.bf16.mxu1 %v6526_v31  ;;  %v5605_v54 = vld [vmem:[%s10110_s8 + $0x188] sm:$0xff]  ;;  %v9005_v2 = vpop.permute.xlu1 %3923 }
 0x2de   :  { %v8994_v8 = vpop.f32.mrf.mxu0  ;;  %5857 = vperm.xlu1 %6352, %v5603_v63   ;;  %v3181_v0 = vpop.f32.mrf.mxu1  ;;  %10295 = vst [vmem:[#allocation11_spill] sm:$0xff] %v9005_v2  ;;  %v5607_v2 = vld [vmem:[%s10110_s8 + $0x198] sm:$0xff] }
 0x2df   :  { %5852 = vperm.xlu0 %6351, %v5602_v34   ;;  %v6524_v34 = vld [vmem:[%s10106_s4 + $0x388] ss:$16 sps:$4 sm:$0xff]   ;;  %v9013_v63 = vpop.permute.xlu0 %3918 }
 0x2e0   :  { %v2895_v31 = vpop.f32.mrf.mxu0  ;;  %10296 = vst [vmem:[#allocation31_spill] sm:$0xff] %v9013_v63  ;;  %v9015_v0 = vpop.f32.mrf.mxu1  ;;  %v5606_v63 = vld [vmem:[%s10110_s8 + $0x190] sm:$0xff] }
 0x2e1   :  { %v9030_v53 = vpop.permute.xlu1 %3933 }
 0x2e2   :  { %v9020_v37 = vpop.f32.mrf.mxu0  ;;  %3089 = vmatmul.mubr.bf16.gmra.mxu0 %v6521_v3  ;;  %5867 = vperm.xlu1 %6352, %v5605_v54   ;;  %v3184_v31 = vpop.f32.mrf.mxu1  ;;  %10297 = vst [vmem:[#allocation32_spill] sm:$0xff] %v9030_v53  ;;  %v6527_v54 = vld [vmem:[%s10106_s4 + $0x3a0] ss:$16 sps:$4 sm:$0xff]  }
 0x2e3   :  { %5862 = vperm.xlu0 %6351, %v5604_v33   ;;  %3096 = vmatprep.mubr.bf16.mxu0 %v6529_v30  ;;  %v9037_v33 = vpop.permute.xlu0 %3928  ;;  %v5609_v30 = vld [vmem:[%s10110_s8 + $0x1a8] sm:$0xff] }
 0x2e4   :  { %v2900_v60 = vpop.f32.mrf.mxu0  ;;  %3378 = vmatmul.mubr.bf16.gmra.mxu1 %v6524_v34  ;;  %v9028_v48 = vpop.f32.mrf.mxu1  ;;  %10298 = vst [vmem:[#allocation48_spill] sm:$0xff] %v9037_v33  ;;  %v6530_v31 = vld [vmem:[%s10106_s4 + $0x3a8] ss:$16 sps:$4 sm:$0xff]  }
 0x2e5   :  { %3385 = vmatprep.mubr.bf16.mxu1 %v6532_v46  ;;  %v6535_v46 = vld [vmem:[%s10106_s4 + $0x3c4] ss:$16 sps:$4 sm:$0xff]   ;;  %v5611_v33 = vld [vmem:[%s10110_s8 + $0x1b8] sm:$0xff]  ;;  %v9061_v61 = vpop.permute.xlu1 %3943 }
 0x2e6   :  { %v9032_v3 = vpop.f32.mrf.mxu0  ;;  %5877 = vperm.xlu1 %6352, %v5607_v2   ;;  %v3189_v60 = vpop.f32.mrf.mxu1  ;;  %v5608_v2 = vld [vmem:[%s10110_s8 + $0x1a0] sm:$0xff]  ;;  %10299 = vst [vmem:[#allocation9_spill] sm:$0xff] %v9061_v61 }
 0x2e7   :  { %5872 = vperm.xlu0 %6351, %v5606_v63   ;;  %v6538_v63 = vld [vmem:[%s10106_s4 + $0x3cc] ss:$16 sps:$4 sm:$0xff]   ;;  %v9066_v50 = vpop.permute.xlu0 %3938 }
 0x2e8   :  { %v2903_v34 = vpop.f32.mrf.mxu0  ;;  %v9051_v53 = vpop.f32.mrf.mxu1  ;;  %10300 = vst [vmem:[#allocation49_spill] sm:$0xff] %v9066_v50 }
 0x2ea   :  { %v9056_v60 = vpop.f32.mrf.mxu0  ;;  %3097 = vmatmul.mubr.bf16.gmra.mxu0 %v6527_v54  ;;  %5887 = vperm.xlu1 %6352, %v5609_v30   ;;  %v3192_v34 = vpop.f32.mrf.mxu1  ;;  %v6533_v30 = vld [vmem:[%s10106_s4 + $0x3c0] ss:$16 sps:$4 sm:$0xff]  }
 0x2eb   :  { %5882 = vperm.xlu0 %6351, %v5608_v2   ;;  %3104 = vmatprep.mubr.bf16.mxu0 %v6535_v46  ;;  %v6541_v2 = vld [vmem:[%s10106_s4 + $0x3e4] ss:$16 sps:$4 sm:$0xff]   ;;  %v9092_v50 = vpop.permute.xlu0 %3948 }
 0x2ec   :  { %v2908_v23 = vpop.f32.mrf.mxu0  ;;  %3386 = vmatmul.mubr.bf16.gmra.mxu1 %v6530_v31  ;;  %v9068_v44 = vpop.f32.mrf.mxu1  ;;  %10302 = vst [vmem:[#allocation68_spill] sm:$0xff] %v9092_v50 }
 0x2ed   :  { %3393 = vmatprep.mubr.bf16.mxu1 %v6538_v63  ;;  %v5613_v23 = vld [vmem:[%s10110_s8 + $0x1c8] sm:$0xff]  ;;  %v5612_v63 = vld [vmem:[%s10110_s8 + $0x1c0] sm:$0xff] }
 0x2ee   :  { %v9070_v54 = vpop.f32.mrf.mxu0  ;;  %5897 = vperm.xlu1 %6352, %v5611_v33   ;;  %v3197_v46 = vpop.f32.mrf.mxu1  ;;  %v6536_v33 = vld [vmem:[%s10106_s4 + $0x3c8] ss:$16 sps:$4 sm:$0xff]  }
 0x2ef   :  { %5892 = vperm.xlu0 %6351, %v5610_v20   ;;  %v6544_v20 = vld [vmem:[%s10106_s4 + $0x3ec] ss:$16 sps:$4 sm:$0xff]   ;;  %v9090_v46 = vpop.permute.xlu1 %3953  ;;  %v2910_v18 = vadd.f32 %v9070_v54, %v8214_v25  ;;  %v2894_v25 = vadd.f32 %v8994_v8, %v8182_v43 }
 0x2f0   :  { %v2911_v31 = vpop.f32.mrf.mxu0  ;;  %v3198_v34 = vpop.f32.mrf.mxu1  ;;  %10301 = vst [vmem:[#allocation10_spill] sm:$0xff] %v9090_v46 }
 0x2f2   :  { %v2914_v61 = vpop.f32.mrf.mxu0  ;;  %3105 = vmatmul.mubr.bf16.gmra.mxu0 %v6533_v30  ;;  %5907 = vperm.xlu1 %6352, %v5613_v23   ;;  %v3200_v31 = vpop.f32.mrf.mxu1  ;;  %v6539_v30 = vld [vmem:[%s10106_s4 + $0x3e0] ss:$16 sps:$4 sm:$0xff]  }
 0x2f3   :  { %5902 = vperm.xlu0 %6351, %v5612_v63   ;;  %3112 = vmatprep.mubr.bf16.mxu0 %v6541_v2  ;;  %v5617_v2 = vld [vmem:[%s10110_s8 + $0x1e8] sm:$0xff]  ;;  %v9109_v63 = vpop.permute.xlu1 %3963 }
 0x2f4   :  { %v2916_v56 = vpop.f32.mrf.mxu0  ;;  %3394 = vmatmul.mubr.bf16.gmra.mxu1 %v6536_v33  ;;  %v3203_v6 = vpop.f32.mrf.mxu1  ;;  %10303 = vst [vmem:[#allocation29_spill] sm:$0xff] %v9109_v63 }
 0x2f5   :  { %3401 = vmatprep.mubr.bf16.mxu1 %v6544_v20  ;;  %v6547_v56 = vld [vmem:[%s10108_s6 + $0x4] ss:$16 sps:$4 sm:$0xff]   ;;  %v9117_v20 = vpop.permute.xlu0 %3958 }
 0x2f6   :  { %v2917_v46 = vpop.f32.mrf.mxu0  ;;  %5917 = vperm.xlu1 %6352, %v5615_v49   ;;  %v3205_v23 = vpop.f32.mrf.mxu1  ;;  %v5616_v49 = vld [vmem:[%s10110_s8 + $0x1e0] sm:$0xff]  ;;  %10304 = vst [vmem:[#allocation30_spill] sm:$0xff] %v9117_v20 }
 0x2f7   :  { %5912 = vperm.xlu0 %6351, %v5614_v52   ;;  %v6542_v52 = vld [vmem:[%s10106_s4 + $0x3e8] ss:$16 sps:$4 sm:$0xff]   ;;  %v9126_v17 = vpop.permute.xlu1 %3973 }
 0x2f8   :  { %v2919_v33 = vpop.f32.mrf.mxu0  ;;  %v3206_v31 = vpop.f32.mrf.mxu1  ;;  %10305 = vst [vmem:[#allocation69_spill] sm:$0xff] %v9126_v17 }
 0x2f9   :  { %v5619_v33 = vld [vmem:[%s10110_s8 + $0x1f8] sm:$0xff] }
 0x2fa   :  { %v2922_v23 = vpop.f32.mrf.mxu0  ;;  %3113 = vmatmul.mubr.bf16.gmra.mxu0 %v6539_v30  ;;  %5927 = vperm.xlu1 %6352, %v5617_v2   ;;  %v3208_v50 = vpop.f32.mrf.mxu1  ;;  %v2918_v30 = vadd.f32 %v2917_v46, %v8227_v41 }
 0x2fb   :  { %5922 = vperm.xlu0 %6351, %v5616_v49   ;;  %4818 = vmatprep.mubr.bf16.mxu0 %v6547_v56  ;;  %v2923_v63 = vadd.f32 %v2922_v23, %v8248_v58  ;;  %v9129_v49 = vpop.permute.xlu0 %3968  ;;  %v2915_v58 = vadd.f32 %v2914_v61, %v8229_v62 }
 0x2fc   :  { %v2924_v7 = vpop.f32.mrf.mxu0  ;;  %3402 = vmatmul.mubr.bf16.gmra.mxu1 %v6542_v52  ;;  %v3211_v20 = vpop.f32.mrf.mxu1 }
 0x2fd   :  { %v3212_v50 = vadd.f32 %v3211_v20, %v2923_v63  ;;  %v3207_v7 = vadd.f32 %v3206_v31, %v2918_v30  ;;  %v3204_v17 = vadd.f32 %v3203_v6, %v2915_v58  ;;  %v2907_v63 = vadd.f32 %v9056_v60, %v8216_v15 }
 0x2fe   :  { %v2925_v2 = vpop.f32.mrf.mxu0  ;;  %5937 = vperm.xlu1 %6352, %v5619_v33   ;;  %v3213_v56 = vpop.f32.mrf.mxu1  ;;  %v3199_v20 = vadd.f32 %v3198_v34, %v2910_v18  ;;  %v2902_v6 = vadd.f32 %v9032_v3, %v8195_v36  ;;  %v2891_v3 = vadd.f32 %v8982_v29, %v8184_v22 }
 0x2ff   :  { %5932 = vperm.xlu0 %6351, %v5618_v4   ;;  %v2926_v52 = vadd.f32 %v2925_v2, %v8246_v51  ;;  %v3488_v42 = vmul.f32 0.2, %v3212_v50  ;;  %vm3424_vm4 = vcmp.gt.f32.partialorder %v3212_v50, 0.0  ;;  %v3487_v33 = vmul.f32 0.2, %v3207_v7 }
 0x300   :  { %v2927_v23 = vpop.f32.mrf.mxu0  ;;  %v3214_v10 = vpop.f32.mrf.mxu1  ;;  %vm3423_vm6 = vcmp.gt.f32.partialorder %v3207_v7, 0.0  ;;  %v3486_v15 = vmul.f32 0.2, %v3204_v17  ;;  %v3191_v30 = vadd.f32 %v9051_v53, %v2902_v6  ;;  %vm3422_vm7 = vcmp.gt.f32.partialorder %v3204_v17, 0.0 }
 0x301   :  { %v3215_v46 = vadd.f32 %v3214_v10, %v2926_v52  ;;  %v3196_v10 = vadd.f32 %v9068_v44, %v2907_v63  ;;  %v3552_v18 = vsel %vm3424_vm4, %v3212_v50, %v3488_v42  ;;  %v3485_v8 = vmul.f32 0.2, %v3199_v20 }
 0x302   :  { %v2930_v41 = vpop.f32.mrf.mxu0  ;;  %v3216_v4 = vpop.f32.mrf.mxu1  ;;  %v3551_v56 = vsel %vm3423_vm6, %v3207_v7, %v3487_v33  ;;  %v3183_v42 = vadd.f32 %v9015_v0, %v2894_v25  ;;  %vm3421_vm8 = vcmp.gt.f32.partialorder %v3199_v20, 0.0  ;;  %v3550_v53 = vsel %vm3422_vm7, %v3204_v17, %v3486_v15 }
 0x303   :  { %v2931_v62 = vadd.f32 %v2930_v41, %v8261_v21  ;;  %vm3425_vm5 = vcmp.gt.f32.partialorder %v3215_v46, 0.0  ;;  %v3489_v51 = vmul.f32 0.2, %v3215_v46  ;;  %v2899_v21 = vadd.f32 %v9020_v37, %v8197_v59 }
 0x304   :  { %v2932_v61 = vpop.f32.mrf.mxu0  ;;  %v3219_v54 = vpop.f32.mrf.mxu1  ;;  %v3484_v59 = vmul.f32 0.2, %v3196_v10  ;;  %v3483_v7 = vmul.f32 0.2, %v3191_v30  ;;  %vm3420_vm9 = vcmp.gt.f32.partialorder %v3196_v10, 0.0  ;;  %v3549_v22 = vsel %vm3421_vm8, %v3199_v20, %v3485_v8 }
 0x305   :  { %v3553_v60 = vsel %vm3425_vm5, %v3215_v46, %v3489_v51  ;;  %v3220_v31 = vadd.f32 %v3219_v54, %v2931_v62  ;;  %v3188_v50 = vadd.f32 %v9028_v48, %v2899_v21  ;;  %v2886_v46 = vadd.f32 %v8954_v45, %v8163_v40 }
 0x306   :  { %v2933_v34 = vpop.f32.mrf.mxu0  ;;  %v3737_v2 = vpack.c.bf16 %v3553_v60, %v3552_v18  ;;  %v3221_v43 = vpop.f32.mrf.mxu1  ;;  %v3180_v17 = vadd.f32 %v8992_v16, %v2891_v3  ;;  %vm3419_vm12 = vcmp.gt.f32.partialorder %v3191_v30, 0.0  ;;  %v3548_v33 = vsel %vm3420_vm9, %v3196_v10, %v3484_v59 }
 0x307   :  { %v2934_v36 = vadd.f32 %v2933_v34, %v8259_v1  ;;  %v3490_v37 = vmul.f32 0.2, %v3220_v31  ;;  %v3736_v1 = vpack.c.bf16 %v3551_v56, %v3550_v53  ;;  %vm3426_vm10 = vcmp.gt.f32.partialorder %v3220_v31, 0.0 }
 0x308   :  { %v2935_v44 = vpop.f32.mrf.mxu0  ;;  %v3222_v58 = vpop.f32.mrf.mxu1  ;;  %4787 = vmatpush1.bf16.msra.mxu0 %v3737_v2  ;;  %v3482_v63 = vmul.f32 0.2, %v3188_v50  ;;  %vm3418_vm13 = vcmp.gt.f32.partialorder %v3188_v50, 0.0  ;;  %v3735_v25 = vpack.c.bf16 %v3549_v22, %v3548_v33  ;;  %v3481_v16 = vmul.f32 0.2, %v3183_v42 }
 0x309   :  { %v3223_v23 = vadd.f32 %v3222_v58, %v2934_v36  ;;  %4788 = vmatprep.subr.bf16.mxu0 %v10178_v57  ;;  %v9156_v62 = vsel %vm3426_vm10, %v3220_v31, %v3490_v37  ;;  %v3547_v6 = vsel %vm3419_vm12, %v3191_v30, %v3483_v7  ;;  %vm3417_vm14 = vcmp.gt.f32.partialorder %v3183_v42, 0.0 }
 0x30a   :  { %v2938_v52 = vpop.f32.mrf.mxu0  ;;  %v3224_v41 = vpop.f32.mrf.mxu1  ;;  %v3480_v18 = vmul.f32 0.2, %v3180_v17  ;;  %v3546_v60 = vsel %vm3418_vm13, %v3188_v50, %v3482_v63  ;;  %vm3416_vm15 = vcmp.gt.f32.partialorder %v3180_v17, 0.0  ;;  %v3545_v8 = vsel %vm3417_vm14, %v3183_v42, %v3481_v16 }
 0x30b   :  { %v2939_v29 = vadd.f32 %v2938_v52, %v8280_v32  ;;  %vm3427_vm11 = vcmp.gt.f32.partialorder %v3223_v23, 0.0  ;;  %v3491_v48 = vmul.f32 0.2, %v3223_v23  ;;  %v3175_v32 = vadd.f32 %v8975_v35, %v2886_v46 }
 0x30c   :  { %v2940_v0 = vpop.f32.mrf.mxu0  ;;  %v3227_v4 = vpop.f32.mrf.mxu1  ;;  %4789 = vmatpush1.bf16.msra.mxu0 %v3736_v1  ;;  %v3734_v2 = vpack.c.bf16 %v3547_v6, %v3546_v60  ;;  %v3478_v36 = vmul.f32 0.2, %v8956_v11  ;;  %v3544_v3 = vsel %vm3416_vm15, %v3180_v17, %v3480_v18 }
 0x30d   :  { %v9158_v51 = vsel %vm3427_vm11, %v3223_v23, %v3491_v48  ;;  %v3228_v61 = vadd.f32 %v3227_v4, %v2939_v29  ;;  %4790 = vmatprep.subr.bf16.mxu0 %v10178_v57  ;;  %v3479_v35 = vmul.f32 0.2, %v3175_v32  ;;  %vm3415_vm2 = vcmp.gt.f32.partialorder %v3175_v32, 0.0 }
 0x30e   :  { %v2941_v20 = vpop.f32.mrf.mxu0  ;;  %v3738_v40 = vpack.c.bf16 %v9158_v51, %v9156_v62  ;;  %v3229_v45 = vpop.f32.mrf.mxu1  ;;  %v3542_v1 = vsel %vm3414_vm3, %v8956_v11, %v3478_v36  ;;  %v10306_v11 = vpack.c.bf16 %v8952_v24, %v8950_v13 }
 0x30f   :  { %v2942_v10 = vadd.f32 %v2941_v20, %v8278_v14  ;;  %v3492_v34 = vmul.f32 0.2, %v3228_v61  ;;  %vm3428_vm0 = vcmp.gt.f32.partialorder %v3228_v61, 0.0  ;;  %v3543_v52 = vsel %vm3415_vm2, %v3175_v32, %v3479_v35 }
 0x310   :  { %v2943_v54 = vpop.f32.mrf.mxu0  ;;  %v3230_v15 = vpop.f32.mrf.mxu1  ;;  %4791 = vmatpush1.bf16.msra.mxu0 %v3735_v25  ;;  %v3732_v22 = vpack.c.bf16 %v3543_v52, %v3542_v1  ;;  %v10307_v25 = vpack.c.bf16 %v8914_v19, %v8912_v55 }
 0x311   :  { %v3231_v21 = vadd.f32 %v3230_v15, %v2942_v10  ;;  %4792 = vmatprep.subr.bf16.mxu0 %v10178_v57  ;;  %v9168_v50 = vsel %vm3428_vm0, %v3228_v61, %v3492_v34 }
 0x312   :  { %v2946_v31 = vpop.f32.mrf.mxu0  ;;  %v3232_v43 = vpop.f32.mrf.mxu1 }
 0x313   :  { %v2947_v30 = vadd.f32 %v2946_v31, %v8296_v38  ;;  %vm3429_vm1 = vcmp.gt.f32.partialorder %v3231_v21, 0.0  ;;  %v3493_v14 = vmul.f32 0.2, %v3231_v21  ;;  %v3733_v38 = vpack.c.bf16 %v3545_v8, %v3544_v3 }
 0x314   :  { %v2948_v56 = vpop.f32.mrf.mxu0  ;;  %v3235_v44 = vpop.f32.mrf.mxu1  ;;  %4793 = vmatpush1.bf16.msra.mxu0 %v3734_v2 }
 0x315   :  { %v9170_v58 = vsel %vm3429_vm1, %v3231_v21, %v3493_v14  ;;  %v9174_v53 = vadd.f32 %v3235_v44, %v2947_v30  ;;  %4794 = vmatprep.subr.bf16.mxu0 %v10178_v57 }
 0x316   :  { %v9172_v59 = vpop.f32.mrf.mxu0  ;;  %v3739_v42 = vpack.c.bf16 %v9170_v58, %v9168_v50  ;;  %v3237_v37 = vpop.f32.mrf.mxu1  ;;  %v6550_v50 = vld [vmem:[%s10108_s6 + $0x24] ss:$16 sps:$4 sm:$0xff]  }
 0x317   :  { %vm3430_vm3 = vcmp.gt.f32.partialorder %v9174_v53, 0.0 }
 0x318   :  { %v2951_v23 = vpop.f32.mrf.mxu0  ;;  %v9180_v7 = vpop.f32.mrf.mxu1  ;;  %4795 = vmatpush1.bf16.msra.mxu0 %v3733_v38 }
 0x319   :  { %4796 = vmatprep.subr.bf16.mxu0 %v10178_v57 }
 0x31a   :  { %v9183_v41 = vpop.f32.mrf.mxu0  ;;  %v3240_v29 = vpop.f32.mrf.mxu1 }
 0x31c   :  { %v2956_v48 = vpop.f32.mrf.mxu0  ;;  %v9186_v0 = vpop.f32.mrf.mxu1  ;;  %4797 = vmatpush1.bf16.msra.mxu0 %v3732_v22 }
 0x31d   :  { %4798 = vmatprep.subr.bf16.mxu0 %v10178_v57 }
 0x31e   :  { %v2957_v46 = vpop.f32.mrf.mxu0  ;;  %v3245_v17 = vpop.f32.mrf.mxu1 }
 0x320   :  { %v2959_v63 = vpop.f32.mrf.mxu0  ;;  %v9189_v4 = vpop.f32.mrf.mxu1  ;;  %4799 = vmatpush1.bf16.msra.mxu0 %v10306_v11 }
 0x321   :  { %4800 = vmatprep.subr.bf16.mxu0 %v10178_v57 }
 0x322   :  { %v9194_v33 = vpop.f32.mrf.mxu0  ;;  %v3248_v20 = vpop.f32.mrf.mxu1 }
 0x324   :  { %v2964_v61 = vpop.f32.mrf.mxu0  ;;  %v9197_v32 = vpop.f32.mrf.mxu1  ;;  %4801 = vmatpush1.bf16.msra.mxu0 %v10307_v25 }
 0x325   :  { %4802 = vmatprep.subr.bf16.mxu0 %v10178_v57 }
 0x326   :  { %v2965_v45 = vpop.f32.mrf.mxu0  ;;  %v3253_v16 = vpop.f32.mrf.mxu1 }
 0x328   :  { %v2967_v6 = vpop.f32.mrf.mxu0  ;;  %v3254_v10 = vpop.f32.mrf.mxu1 }
 0x32a   :  { %v2970_v13 = vpop.f32.mrf.mxu0  ;;  %v3256_v24 = vpop.f32.mrf.mxu1 }
 0x32b   :  { %v2971_v25 = vadd.f32 %v2970_v13, %v8368_v27 }
 0x32c   :  { %v2972_v54 = vpop.f32.mrf.mxu0  ;;  %v3259_v15 = vpop.f32.mrf.mxu1 }
 0x32e   :  { %v2973_v18 = vpop.f32.mrf.mxu0  ;;  %v3261_v60 = vpop.f32.mrf.mxu1 }
 0x32f   :  { %v2974_v17 = vadd.f32 %v2973_v18, %v8360_v9  ;;  %v10308_v60 = vld [vmem:[#allocation7_spill] sm:$0xff]  ;;  %v3260_v18 = vadd.f32 %v3259_v15, %v2971_v25 }
 0x330   :  { %v2975_v34 = vpop.f32.mrf.mxu0  ;;  %v3262_v31 = vpop.f32.mrf.mxu1  ;;  %v2966_v9 = vadd.f32 %v2965_v45, %v10308_v60  ;;  %v10311_v15 = vld [vmem:[#allocation67_spill] sm:$0xff] }
 0x331   :  { %v3263_v16 = vadd.f32 %v3262_v31, %v2974_v17  ;;  %v10309_v31 = vld [vmem:[#allocation28_spill] sm:$0xff]  ;;  %vm3436_vm9 = vcmp.gt.f32.partialorder %v3260_v18, 0.0 }
 0x332   :  { %v2978_v21 = vpop.f32.mrf.mxu0  ;;  %v3264_v35 = vpop.f32.mrf.mxu1 }
 0x333   :  { %v2979_v1 = vadd.f32 %v2978_v21, %v8384_v5  ;;  %vm3437_vm8 = vcmp.gt.f32.partialorder %v3263_v16, 0.0 }
 0x334   :  { %v2980_v2 = vpop.f32.mrf.mxu0  ;;  %v3267_v43 = vpop.f32.mrf.mxu1 }
 0x335   :  { %v3268_v11 = vadd.f32 %v3267_v43, %v2979_v1  ;;  %v2963_v43 = vadd.f32 %v9194_v33, %v10309_v31  ;;  %v3500_v33 = vmul.f32 0.2, %v3260_v18 }
 0x336   :  { %v2981_v55 = vpop.f32.mrf.mxu0  ;;  %v3269_v19 = vpop.f32.mrf.mxu1 }
 0x337   :  { %v2982_v38 = vadd.f32 %v2981_v55, %v8379_v26  ;;  %v3502_v21 = vmul.f32 0.2, %v3268_v11  ;;  %v3255_v55 = vadd.f32 %v3254_v10, %v2966_v9  ;;  %vm3438_vm7 = vcmp.gt.f32.partialorder %v3268_v11, 0.0 }
 0x338   :  { %v2983_v8 = vpop.f32.mrf.mxu0  ;;  %v3270_v30 = vpop.f32.mrf.mxu1 }
 0x339   :  { %v3271_v22 = vadd.f32 %v3270_v30, %v2982_v38  ;;  %v3501_v8 = vmul.f32 0.2, %v3263_v16  ;;  %v3566_v10 = vsel %vm3438_vm7, %v3268_v11, %v3502_v21  ;;  %vm3435_vm12 = vcmp.gt.f32.partialorder %v3255_v55, 0.0 }
 0x33a   :  { %v2986_v14 = vpop.f32.mrf.mxu0  ;;  %v3272_v56 = vpop.f32.mrf.mxu1 }
 0x33b   :  { %v2987_v36 = vadd.f32 %v2986_v14, %v8409_v12  ;;  %v3503_v6 = vmul.f32 0.2, %v3271_v22  ;;  %vm3439_vm6 = vcmp.gt.f32.partialorder %v3271_v22, 0.0  ;;  %v2955_v14 = vadd.f32 %v9183_v41, %v10311_v15 }
 0x33c   :  { %v2988_v44 = vpop.f32.mrf.mxu0  ;;  %v3275_v3 = vpop.f32.mrf.mxu1  ;;  %v3565_v41 = vsel %vm3437_vm8, %v3263_v16, %v3501_v8 }
 0x33d   :  { %v3276_v52 = vadd.f32 %v3275_v3, %v2987_v36  ;;  %v3567_v30 = vsel %vm3439_vm6, %v3271_v22, %v3503_v6  ;;  %v3252_v36 = vadd.f32 %v9197_v32, %v2963_v43  ;;  %v10312_v22 = vld [vmem:[#allocation6_spill] sm:$0xff] }
 0x33e   :  { %v2989_v37 = vpop.f32.mrf.mxu0  ;;  %v3277_v23 = vpop.f32.mrf.mxu1 }
 0x33f   :  { %v2990_v29 = vadd.f32 %v2989_v37, %v8404_v39  ;;  %v3504_v20 = vmul.f32 0.2, %v3276_v52  ;;  %vm3440_vm4 = vcmp.gt.f32.partialorder %v3276_v52, 0.0  ;;  %v2958_v39 = vadd.f32 %v2957_v46, %v8316_v47  ;;  %v10310_v47 = vld [vmem:[#allocation46_spill] sm:$0xff] }
 0x340   :  { %v2991_v48 = vpop.f32.mrf.mxu0  ;;  %v3278_v63 = vpop.f32.mrf.mxu1  ;;  %v3744_v23 = vpack.c.bf16 %v3567_v30, %v3566_v10  ;;  %v3498_v11 = vmul.f32 0.2, %v3252_v36  ;;  %vm3434_vm13 = vcmp.gt.f32.partialorder %v3252_v36, 0.0  ;;  %v3494_v30 = vmul.f32 0.2, %v9174_v53 }
 0x341   :  { %v3279_v12 = vadd.f32 %v3278_v63, %v2990_v29  ;;  %v3568_v35 = vsel %vm3440_vm4, %v3276_v52, %v3504_v20  ;;  %v3247_v56 = vadd.f32 %v9189_v4, %v2958_v39  ;;  %v3499_v52 = vmul.f32 0.2, %v3255_v55  ;;  %v10313_v48 = vld [vmem:[#allocation47_spill] sm:$0xff]  ;;  %v10314_v39 = vld [vmem:[#allocation66_spill] sm:$0xff] }
 0x342   :  { %v2994_v61 = vpop.f32.mrf.mxu0  ;;  %v3280_v26 = vpop.f32.mrf.mxu1  ;;  %v2950_v17 = vadd.f32 %v9172_v59, %v10313_v48  ;;  %v3244_v63 = vadd.f32 %v9186_v0, %v2955_v14  ;;  %v3562_v21 = vsel %vm3434_vm13, %v3252_v36, %v3498_v11  ;;  %v6545_v11 = vld [vmem:[%s10108_s6] ss:$16 sps:$4 sm:$0xff]  }
 0x343   :  { %v2995_v24 = vadd.f32 %v2994_v61, %v8431_v28  ;;  %vm3441_vm5 = vcmp.gt.f32.partialorder %v3279_v12, 0.0  ;;  %v3505_v5 = vmul.f32 0.2, %v3279_v12  ;;  %v3564_v61 = vsel %vm3436_vm9, %v3260_v18, %v3500_v33 }
 0x344   :  { %v2996_v54 = vpop.f32.mrf.mxu0  ;;  %v3283_v34 = vpop.f32.mrf.mxu1  ;;  %v3239_v6 = vadd.f32 %v9180_v7, %v2950_v17  ;;  %vm3433_vm14 = vcmp.gt.f32.partialorder %v3247_v56, 0.0  ;;  %vm3432_vm15 = vcmp.gt.f32.partialorder %v3244_v63, 0.0 }
 0x345   :  { %v3569_v2 = vsel %vm3441_vm5, %v3279_v12, %v3505_v5  ;;  %v3284_v13 = vadd.f32 %v3283_v34, %v2995_v24  ;;  %v3743_v24 = vpack.c.bf16 %v3565_v41, %v3564_v61  ;;  %v3497_v5 = vmul.f32 0.2, %v3247_v56 }
 0x346   :  { %v2997_v27 = vpop.f32.mrf.mxu0  ;;  %v3745_v28 = vpack.c.bf16 %v3569_v2, %v3568_v35  ;;  %v3285_v19 = vpop.f32.mrf.mxu1  ;;  %v3563_v54 = vsel %vm3435_vm12, %v3255_v55, %v3499_v52  ;;  %v3496_v34 = vmul.f32 0.2, %v3244_v63  ;;  %v3495_v7 = vmul.f32 0.2, %v3239_v6  ;;  %v10315_v55 = vld [vmem:[#allocation45_spill] sm:$0xff] }
 0x347   :  { %v2998_v46 = vadd.f32 %v2997_v27, %v10310_v47  ;;  %v3506_v3 = vmul.f32 0.2, %v3284_v13  ;;  %vm3442_vm10 = vcmp.gt.f32.partialorder %v3284_v13, 0.0  ;;  %v3561_v43 = vsel %vm3433_vm14, %v3247_v56, %v3497_v5 }
 0x348   :  { %v2999_v45 = vpop.f32.mrf.mxu0  ;;  %v3286_v44 = vpop.f32.mrf.mxu1  ;;  %4803 = vmatpush2.bf16.msra.mxu0 %v3745_v28  ;;  %vm3431_vm2 = vcmp.gt.f32.partialorder %v3239_v6, 0.0 }
 0x349   :  { %v3287_v37 = vadd.f32 %v3286_v44, %v2998_v46  ;;  %4804 = vmatprep.subr.bf16.mxu0 %v10178_v57  ;;  %v9224_v12 = vsel %vm3442_vm10, %v3284_v13, %v3506_v3  ;;  %v3742_v13 = vpack.c.bf16 %v3563_v54, %v3562_v21  ;;  %v3560_v46 = vsel %vm3432_vm15, %v3244_v63, %v3496_v34  ;;  %v6551_v21 = vld [vmem:[%s10108_s6 + $0x40] ss:$16 sps:$4 sm:$0xff]  }
 0x34a   :  { %v3002_v38 = vpop.f32.mrf.mxu0  ;;  %v3288_v1 = vpop.f32.mrf.mxu1  ;;  %v3741_v56 = vpack.c.bf16 %v3561_v43, %v3560_v46  ;;  %v3559_v10 = vsel %vm3431_vm2, %v3239_v6, %v3495_v7  ;;  %v6559_v46 = vld [vmem:[%s10108_s6 + $0x84] ss:$16 sps:$4 sm:$0xff]  }
 0x34b   :  { %v3003_v4 = vadd.f32 %v3002_v38, %v10312_v22  ;;  %vm3443_vm11 = vcmp.gt.f32.partialorder %v3287_v37, 0.0  ;;  %v3507_v32 = vmul.f32 0.2, %v3287_v37 }
 0x34c   :  { %v3004_v29 = vpop.f32.mrf.mxu0  ;;  %v3291_v20 = vpop.f32.mrf.mxu1  ;;  %4805 = vmatpush2.bf16.msra.mxu0 %v3744_v23 }
 0x34d   :  { %v9226_v25 = vsel %vm3443_vm11, %v3287_v37, %v3507_v32  ;;  %v3292_v26 = vadd.f32 %v3291_v20, %v3003_v4  ;;  %4806 = vmatprep.subr.bf16.mxu0 %v10178_v57  ;;  %v3558_v37 = vsel %vm3430_vm3, %v9174_v53, %v3494_v30  ;;  %v6554_v30 = vld [vmem:[%s10108_s6 + $0x60] ss:$16 sps:$4 sm:$0xff]  }
 0x34e   :  { %v3005_v16 = vpop.f32.mrf.mxu0  ;;  %v3746_v59 = vpack.c.bf16 %v9226_v25, %v9224_v12  ;;  %v3293_v0 = vpop.f32.mrf.mxu1  ;;  %v3740_v23 = vpack.c.bf16 %v3559_v10, %v3558_v37  ;;  %v6572_v12 = vld [vmem:[%s10108_s6 + $0x120] ss:$16 sps:$4 sm:$0xff]  }
 0x34f   :  { %v3006_v60 = vadd.f32 %v3005_v16, %v10314_v39  ;;  %v3508_v35 = vmul.f32 0.2, %v3292_v26  ;;  %vm3444_vm0 = vcmp.gt.f32.partialorder %v3292_v26, 0.0  ;;  %v6553_v0 = vld [vmem:[%s10108_s6 + $0x44] ss:$16 sps:$4 sm:$0xff]  }
 0x350   :  { %v3007_v9 = vpop.f32.mrf.mxu0  ;;  %v3294_v18 = vpop.f32.mrf.mxu1  ;;  %4807 = vmatpush2.bf16.msra.mxu0 %v3743_v24 }
 0x351   :  { %v3295_v27 = vadd.f32 %v3294_v18, %v3006_v60  ;;  %4808 = vmatprep.subr.bf16.mxu0 %v10178_v57  ;;  %v9236_v45 = vsel %vm3444_vm0, %v3292_v26, %v3508_v35 }
 0x352   :  { %v3010_v2 = vpop.f32.mrf.mxu0  ;;  %v3296_v31 = vpop.f32.mrf.mxu1 }
 0x353   :  { %v3011_v28 = vadd.f32 %v3010_v2, %v10315_v55  ;;  %vm3445_vm1 = vcmp.gt.f32.partialorder %v3295_v27, 0.0  ;;  %v3509_v19 = vmul.f32 0.2, %v3295_v27  ;;  %v6556_v2 = vld [vmem:[%s10108_s6 + $0x64] ss:$16 sps:$4 sm:$0xff]  }
 0x354   :  { %v3012_v8 = vpop.f32.mrf.mxu0  ;;  %v3299_v47 = vpop.f32.mrf.mxu1  ;;  %4809 = vmatpush2.bf16.msra.mxu0 %v3742_v13 }
 0x355   :  { %v9238_v15 = vsel %vm3445_vm1, %v3295_v27, %v3509_v19  ;;  %v9242_v36 = vadd.f32 %v3299_v47, %v3011_v28  ;;  %4810 = vmatprep.subr.bf16.mxu0 %v10178_v57  ;;  %v10316_v28 = vld [vmem:[#allocation26_spill] sm:$0xff] }
 0x356   :  { %v9240_v14 = vpop.f32.mrf.mxu0  ;;  %v3747_v44 = vpack.c.bf16 %v9238_v15, %v9236_v45  ;;  %v3301_v33 = vpop.f32.mrf.mxu1  ;;  %v6574_v45 = vld [vmem:[%s10108_s6 + $0x124] ss:$16 sps:$4 sm:$0xff]  }
 0x357   :  { %vm3446_vm3 = vcmp.gt.f32.partialorder %v9242_v36, 0.0 }
 0x358   :  { %v3015_v3 = vpop.f32.mrf.mxu0  ;;  %v9248_v38 = vpop.f32.mrf.mxu1  ;;  %4811 = vmatpush2.bf16.msra.mxu0 %v3741_v56  ;;  %v10317_v56 = vld [vmem:[#allocation62_spill] sm:$0xff] }
 0x359   :  { %4812 = vmatprep.subr.bf16.mxu0 %v10178_v57 }
 0x35a   :  { %v9251_v52 = vpop.f32.mrf.mxu0  ;;  %v3304_v1 = vpop.f32.mrf.mxu1 }
 0x35c   :  { %v3020_v41 = vpop.f32.mrf.mxu0  ;;  %v9254_v22 = vpop.f32.mrf.mxu1  ;;  %4813 = vmatpush2.bf16.msra.mxu0 %v3740_v23  ;;  %v10318_v23 = vld [vmem:[#allocation64_spill] sm:$0xff] }
 0x35d   :  { %4814 = vmatprep.subr.bf16.mxu0 %v10178_v57 }
 0x35e   :  { %v9256_v4 = vpop.f32.mrf.mxu0  ;;  %v3309_v32 = vpop.f32.mrf.mxu1 }
 0x35f   :  { %v10319_v32 = vld [vmem:[#allocation24_spill] sm:$0xff] }
 0x360   :  { %v3023_v29 = vpop.f32.mrf.mxu0  ;;  %v9259_v48 = vpop.f32.mrf.mxu1  ;;  %4815 = vmatpush2.bf16.msra.mxu0 %v3739_v42  ;;  %v6598_v42 = vld [vmem:[%s10108_s6 + $0xc] ss:$16 sps:$4 sm:$0xff]  }
 0x361   :  { %4816 = vmatprep.subr.bf16.mxu0 %v10178_v57  ;;  %5107 = vmatprep.mubr.bf16.mxu1 %v6598_v42 }
 0x362   :  { %v9264_v53 = vpop.f32.mrf.mxu0  ;;  %v3312_v17 = vpop.f32.mrf.mxu1 }
 0x364   :  { %v3028_v63 = vpop.f32.mrf.mxu0  ;;  %v9270_v20 = vpop.f32.mrf.mxu1  ;;  %4817 = vmatpush2.bf16.msra.mxu0 %v3738_v40  ;;  %v6548_v40 = vld [vmem:[%s10108_s6 + $0x20] ss:$16 sps:$4 sm:$0xff]  }
 0x365   :  { %v10320_v63 = vld [vmem:[#allocation44_spill] sm:$0xff] }
 0x366   :  { %v9278_v58 = vpop.f32.mrf.mxu0  ;;  %v3317_v61 = vpop.f32.mrf.mxu1 }
 0x367   :  { %4819 = vmatmul.mubr.bf16.vlgmr.msra.gmra.mxu0 %v6545_v11 }
 0x368   :  { %v3031_v16 = vpop.f32.mrf.mxu0  ;;  %v9283_v26 = vpop.f32.mrf.mxu1  ;;  %4826 = vmatprep.mubr.bf16.mxu0 %v6550_v50 }
 0x36a   :  { %v3034_v6 = vpop.f32.mrf.mxu0  ;;  %v3320_v62 = vpop.f32.mrf.mxu1 }
 0x36c   :  { %v3036_v51 = vpop.f32.mrf.mxu0  ;;  %v3323_v24 = vpop.f32.mrf.mxu1 }
 0x36d   :  { %v10321_v51 = vld [vmem:[#allocation25_spill] sm:$0xff] }
 0x36e   :  { %v3037_v5 = vpop.f32.mrf.mxu0  ;;  %v3325_v54 = vpop.f32.mrf.mxu1 }
 0x36f   :  { %4827 = vmatmul.mubr.bf16.gmra.mxu0 %v6548_v40  ;;  %v3038_v11 = vadd.f32 %v3037_v5, %v10320_v63  ;;  %v3035_v40 = vadd.f32 %v3034_v6, %v10321_v51 }
 0x370   :  { %v3039_v39 = vpop.f32.mrf.mxu0  ;;  %v3326_v60 = vpop.f32.mrf.mxu1  ;;  %4834 = vmatprep.mubr.bf16.mxu0 %v6553_v0 }
 0x371   :  { %v3327_v0 = vadd.f32 %v3326_v60, %v3038_v11  ;;  %v6557_v39 = vld [vmem:[%s10108_s6 + $0x80] ss:$16 sps:$4 sm:$0xff]   ;;  %v3324_v6 = vadd.f32 %v3323_v24, %v3035_v40 }
 0x372   :  { %v3042_v9 = vpop.f32.mrf.mxu0  ;;  %v3328_v18 = vpop.f32.mrf.mxu1 }
 0x373   :  { %v3043_v1 = vadd.f32 %v3042_v9, %v10318_v23  ;;  %v10322_v18 = vld [vmem:[#allocation22_spill] sm:$0xff]  ;;  %v3517_v24 = vmul.f32 0.2, %v3327_v0  ;;  %vm3453_vm8 = vcmp.gt.f32.partialorder %v3327_v0, 0.0  ;;  %vm3452_vm9 = vcmp.gt.f32.partialorder %v3324_v6, 0.0 }
 0x374   :  { %v3044_v34 = vpop.f32.mrf.mxu0  ;;  %v3331_v35 = vpop.f32.mrf.mxu1 }
 0x375   :  { %v3332_v42 = vadd.f32 %v3331_v35, %v3043_v1 }
 0x376   :  { %v3045_v27 = vpop.f32.mrf.mxu0  ;;  %v3333_v7 = vpop.f32.mrf.mxu1 }
 0x377   :  { %4835 = vmatmul.mubr.bf16.gmra.mxu0 %v6551_v21  ;;  %v3046_v33 = vadd.f32 %v3045_v27, %v10317_v56  ;;  %v10324_v27 = vld [vmem:[#allocation23_spill] sm:$0xff]  ;;  %vm3454_vm7 = vcmp.gt.f32.partialorder %v3332_v42, 0.0 }
 0x378   :  { %v3047_v13 = vpop.f32.mrf.mxu0  ;;  %v3334_v31 = vpop.f32.mrf.mxu1  ;;  %4842 = vmatprep.mubr.bf16.mxu0 %v6556_v2  ;;  %v10323_v2 = vld [vmem:[#allocation8_spill] sm:$0xff]  ;;  %v3030_v7 = vadd.f32 %v9278_v58, %v10324_v27  ;;  %v10326_v56 = vld [vmem:[#allocation39_spill] sm:$0xff] }
 0x379   :  { %v3335_v41 = vadd.f32 %v3334_v31, %v3046_v33  ;;  %v3022_v35 = vadd.f32 %v9256_v4, %v10323_v2  ;;  %v6562_v13 = vld [vmem:[%s10108_s6 + $0xa4] ss:$16 sps:$4 sm:$0xff]   ;;  %v3518_v31 = vmul.f32 0.2, %v3332_v42 }
 0x37a   :  { %v3050_v43 = vpop.f32.mrf.mxu0  ;;  %v3336_v55 = vpop.f32.mrf.mxu1  ;;  %v3319_v4 = vadd.f32 %v9283_v26, %v3030_v7  ;;  %v3516_v26 = vmul.f32 0.2, %v3324_v6 }
 0x37b   :  { %v3051_v19 = vadd.f32 %v3050_v43, %v10316_v28  ;;  %v3519_v9 = vmul.f32 0.2, %v3335_v41  ;;  %vm3455_vm6 = vcmp.gt.f32.partialorder %v3335_v41, 0.0  ;;  %v3311_v23 = vadd.f32 %v9259_v48, %v3022_v35 }
 0x37c   :  { %v3052_v8 = vpop.f32.mrf.mxu0  ;;  %v3339_v47 = vpop.f32.mrf.mxu1  ;;  %v3515_v63 = vmul.f32 0.2, %v3319_v4  ;;  %v3581_v48 = vsel %vm3453_vm8, %v3327_v0, %v3517_v24  ;;  %vm3451_vm12 = vcmp.gt.f32.partialorder %v3319_v4, 0.0  ;;  %v6565_v0 = vld [vmem:[%s10108_s6 + $0xc4] ss:$16 sps:$4 sm:$0xff]  }
 0x37d   :  { %v3340_v3 = vadd.f32 %v3339_v47, %v3051_v19  ;;  %v10325_v8 = vld [vmem:[#allocation63_spill] sm:$0xff]  ;;  %v3513_v27 = vmul.f32 0.2, %v3311_v23  ;;  %vm3449_vm14 = vcmp.gt.f32.partialorder %v3311_v23, 0.0 }
 0x37e   :  { %v3053_v10 = vpop.f32.mrf.mxu0  ;;  %v3341_v37 = vpop.f32.mrf.mxu1  ;;  %v3579_v7 = vsel %vm3451_vm12, %v3319_v4, %v3515_v63 }
 0x37f   :  { %v3054_v29 = vadd.f32 %v3053_v10, %v10319_v32  ;;  %4843 = vmatmul.mubr.bf16.gmra.mxu0 %v6554_v30  ;;  %v3520_v61 = vmul.f32 0.2, %v3340_v3  ;;  %vm3456_vm4 = vcmp.gt.f32.partialorder %v3340_v3, 0.0  ;;  %v3027_v30 = vadd.f32 %v9264_v53, %v10325_v8  ;;  %v10327_v37 = vld [vmem:[#allocation65_spill] sm:$0xff] }
 0x380   :  { %v3055_v17 = vpop.f32.mrf.mxu0  ;;  %v3342_v50 = vpop.f32.mrf.mxu1  ;;  %4850 = vmatprep.mubr.bf16.mxu0 %v6559_v46  ;;  %v3583_v46 = vsel %vm3455_vm6, %v3335_v41, %v3519_v9  ;;  %v3582_v32 = vsel %vm3454_vm7, %v3332_v42, %v3518_v31  ;;  %v6560_v42 = vld [vmem:[%s10108_s6 + $0xa0] ss:$16 sps:$4 sm:$0xff]   ;;  %v3580_v9 = vsel %vm3452_vm9, %v3324_v6, %v3516_v26 }
 0x381   :  { %v3343_v62 = vadd.f32 %v3342_v50, %v3054_v29  ;;  %v3584_v43 = vsel %vm3456_vm4, %v3340_v3, %v3520_v61  ;;  %v3019_v3 = vadd.f32 %v9251_v52, %v10327_v37  ;;  %v3316_v1 = vadd.f32 %v9270_v20, %v3027_v30  ;;  %v10328_v50 = vld [vmem:[#allocation57_spill] sm:$0xff]  ;;  %v10330_v6 = vld [vmem:[#allocation56_spill] sm:$0xff] }
 0x382   :  { %v3058_v16 = vpop.f32.mrf.mxu0  ;;  %v3344_v54 = vpop.f32.mrf.mxu1  ;;  %v3752_v11 = vpack.c.bf16 %v3583_v46, %v3582_v32 }
 0x383   :  { %v3059_v34 = vadd.f32 %v3058_v16, %v10322_v18  ;;  %vm3457_vm5 = vcmp.gt.f32.partialorder %v3343_v62, 0.0  ;;  %v3521_v5 = vmul.f32 0.2, %v3343_v62  ;;  %v3308_v40 = vadd.f32 %v9254_v22, %v3019_v3  ;;  %v6568_v3 = vld [vmem:[%s10108_s6 + $0xe4] ss:$16 sps:$4 sm:$0xff]  }
 0x384   :  { %v3060_v21 = vpop.f32.mrf.mxu0  ;;  %v3347_v60 = vpop.f32.mrf.mxu1  ;;  %v3514_v54 = vmul.f32 0.2, %v3316_v1  ;;  %vm3450_vm13 = vcmp.gt.f32.partialorder %v3316_v1, 0.0  ;;  %v3751_v22 = vpack.c.bf16 %v3581_v48, %v3580_v9 }
 0x385   :  { %v3585_v55 = vsel %vm3457_vm5, %v3343_v62, %v3521_v5  ;;  %v3348_v19 = vadd.f32 %v3347_v60, %v3059_v34  ;;  %v10329_v62 = vld [vmem:[#allocation27_spill] sm:$0xff]  ;;  %vm3448_vm15 = vcmp.gt.f32.partialorder %v3308_v40, 0.0 }
 0x386   :  { %v3061_v28 = vpop.f32.mrf.mxu0  ;;  %v3753_v47 = vpack.c.bf16 %v3585_v55, %v3584_v43  ;;  %v3349_v58 = vpop.f32.mrf.mxu1  ;;  %v3014_v51 = vadd.f32 %v9240_v14, %v10329_v62  ;;  %v3512_v43 = vmul.f32 0.2, %v3308_v40  ;;  %v3578_v55 = vsel %vm3450_vm13, %v3316_v1, %v3514_v54 }
 0x387   :  { %v3062_v33 = vadd.f32 %v3061_v28, %v10326_v56  ;;  %4851 = vmatmul.mubr.bf16.gmra.mxu0 %v6557_v39  ;;  %v3522_v29 = vmul.f32 0.2, %v3348_v19  ;;  %vm3458_vm10 = vcmp.gt.f32.partialorder %v3348_v19, 0.0  ;;  %v3750_v30 = vpack.c.bf16 %v3579_v7, %v3578_v55  ;;  %v10331_v58 = vld [vmem:[#allocation19_spill] sm:$0xff] }
 0x388   :  { %v3063_v10 = vpop.f32.mrf.mxu0  ;;  %v3350_v53 = vpop.f32.mrf.mxu1  ;;  %5076 = vmatpush1.bf16.msra.mxu1 %v3753_v47  ;;  %4858 = vmatprep.mubr.bf16.mxu0 %v6562_v13  ;;  %v3303_v14 = vadd.f32 %v9248_v38, %v3014_v51  ;;  %v3577_v47 = vsel %vm3449_vm14, %v3311_v23, %v3513_v27  ;;  %v3576_v1 = vsel %vm3448_vm15, %v3308_v40, %v3512_v43  ;;  %v6571_v51 = vld [vmem:[%s10108_s6 + $0x104] ss:$16 sps:$4 sm:$0xff]  }
 0x389   :  { %v3351_v17 = vadd.f32 %v3350_v53, %v3062_v33  ;;  %5077 = vmatprep.subr.bf16.mxu1 %v10178_v57  ;;  %v9342_v18 = vsel %vm3458_vm10, %v3348_v19, %v3522_v29  ;;  %v6563_v33 = vld [vmem:[%s10108_s6 + $0xc0] ss:$16 sps:$4 sm:$0xff]   ;;  %v3510_v10 = vmul.f32 0.2, %v9242_v36  ;;  %v3749_v29 = vpack.c.bf16 %v3577_v47, %v3576_v1 }
 0x38a   :  { %v3066_v41 = vpop.f32.mrf.mxu0  ;;  %v3352_v52 = vpop.f32.mrf.mxu1  ;;  %v3511_v8 = vmul.f32 0.2, %v3303_v14  ;;  %vm3447_vm2 = vcmp.gt.f32.partialorder %v3303_v14, 0.0 }
 0x38b   :  { %v3067_v20 = vadd.f32 %v3066_v41, %v10328_v50  ;;  %vm3459_vm11 = vcmp.gt.f32.partialorder %v3351_v17, 0.0  ;;  %v3523_v61 = vmul.f32 0.2, %v3351_v17  ;;  %v3574_v48 = vsel %vm3446_vm3, %v9242_v36, %v3510_v10 }
 0x38c   :  { %v3068_v16 = vpop.f32.mrf.mxu0  ;;  %v3355_v39 = vpop.f32.mrf.mxu1  ;;  %5078 = vmatpush1.bf16.msra.mxu1 %v3752_v11  ;;  %v3575_v63 = vsel %vm3447_vm2, %v3303_v14, %v3511_v8 }
 0x38d   :  { %v9344_v34 = vsel %vm3459_vm11, %v3351_v17, %v3523_v61  ;;  %v3356_v21 = vadd.f32 %v3355_v39, %v3067_v20  ;;  %5079 = vmatprep.subr.bf16.mxu1 %v10178_v57  ;;  %v3748_v20 = vpack.c.bf16 %v3575_v63, %v3574_v48 }
 0x38e   :  { %v3069_v5 = vpop.f32.mrf.mxu0  ;;  %v3754_v2 = vpack.c.bf16 %v9344_v34, %v9342_v18  ;;  %v3357_v35 = vpop.f32.mrf.mxu1  ;;  %v6602_v18 = vld [vmem:[%s10108_s6 + $0x28] ss:$16 sps:$4 sm:$0xff]   ;;  %v6607_v34 = vld [vmem:[%s10108_s6 + $0x244] ss:$16 sps:$4 sm:$0xff]  }
 0x38f   :  { %v3070_v60 = vadd.f32 %v3069_v5, %v10330_v6  ;;  %4859 = vmatmul.mubr.bf16.gmra.mxu0 %v6560_v42  ;;  %v3524_v38 = vmul.f32 0.2, %v3356_v21  ;;  %vm3460_vm0 = vcmp.gt.f32.partialorder %v3356_v21, 0.0  ;;  %v6566_v42 = vld [vmem:[%s10108_s6 + $0xe0] ss:$16 sps:$4 sm:$0xff]  }
 0x390   :  { %v3071_v13 = vpop.f32.mrf.mxu0  ;;  %v3358_v31 = vpop.f32.mrf.mxu1  ;;  %5080 = vmatpush1.bf16.msra.mxu1 %v3751_v22  ;;  %4866 = vmatprep.mubr.bf16.mxu0 %v6565_v0 }
 0x391   :  { %v3359_v19 = vadd.f32 %v3358_v31, %v3070_v60  ;;  %5081 = vmatprep.subr.bf16.mxu1 %v10178_v57  ;;  %v9361_v23 = vsel %vm3460_vm0, %v3356_v21, %v3524_v38  ;;  %v6569_v21 = vld [vmem:[%s10108_s6 + $0x100] ss:$16 sps:$4 sm:$0xff]  }
 0x392   :  { %v3074_v28 = vpop.f32.mrf.mxu0  ;;  %v3360_v4 = vpop.f32.mrf.mxu1 }
 0x393   :  { %v3075_v24 = vadd.f32 %v3074_v28, %v10331_v58  ;;  %vm3461_vm1 = vcmp.gt.f32.partialorder %v3359_v19, 0.0  ;;  %v3525_v46 = vmul.f32 0.2, %v3359_v19 }
 0x394   :  { %v3076_v56 = vpop.f32.mrf.mxu0  ;;  %v3363_v37 = vpop.f32.mrf.mxu1  ;;  %5082 = vmatpush1.bf16.msra.mxu1 %v3750_v30  ;;  %v6580_v30 = vld [vmem:[%s10108_s6 + $0x164] ss:$16 sps:$4 sm:$0xff]  }
 0x395   :  { %v9363_v53 = vsel %vm3461_vm1, %v3359_v19, %v3525_v46  ;;  %v9367_v32 = vadd.f32 %v3363_v37, %v3075_v24  ;;  %5083 = vmatprep.subr.bf16.mxu1 %v10178_v57  ;;  %v6575_v19 = vld [vmem:[%s10108_s6 + $0x140] ss:$16 sps:$4 sm:$0xff]  }
 0x396   :  { %v9365_v26 = vpop.f32.mrf.mxu0  ;;  %v3755_v41 = vpack.c.bf16 %v9363_v53, %v9361_v23  ;;  %v3365_v17 = vpop.f32.mrf.mxu1  ;;  %v6601_v23 = vld [vmem:[%s10108_s6 + $0x224] ss:$16 sps:$4 sm:$0xff]   ;;  %v6599_v53 = vld [vmem:[%s10108_s6 + $0x220] ss:$16 sps:$4 sm:$0xff]  }
 0x397   :  { %4867 = vmatmul.mubr.bf16.gmra.mxu0 %v6563_v33  ;;  %v10332_v33 = vld [vmem:[#allocation61_spill] sm:$0xff]  ;;  %v10333_v17 = vld [vmem:[#allocation42_spill] sm:$0xff]  ;;  %vm3462_vm15 = vcmp.gt.f32.partialorder %v9367_v32, 0.0 }
 0x398   :  { %v3079_v11 = vpop.f32.mrf.mxu0  ;;  %v9373_v52 = vpop.f32.mrf.mxu1  ;;  %5084 = vmatpush1.bf16.msra.mxu1 %v3749_v29  ;;  %4874 = vmatprep.mubr.bf16.mxu0 %v6568_v3  ;;  %v6578_v3 = vld [vmem:[%s10108_s6 + $0x160] ss:$16 sps:$4 sm:$0xff]   ;;  %v6583_v29 = vld [vmem:[%s10108_s6 + $0x184] ss:$16 sps:$4 sm:$0xff]  }
 0x399   :  { %5085 = vmatprep.subr.bf16.mxu1 %v10178_v57 }
 0x39a   :  { %v9376_v50 = vpop.f32.mrf.mxu0  ;;  %v3368_v61 = vpop.f32.mrf.mxu1 }
 0x39b   :  { %v10334_v61 = vld [vmem:[#allocation43_spill] sm:$0xff] }
 0x39c   :  { %v3084_v16 = vpop.f32.mrf.mxu0  ;;  %v9382_v62 = vpop.f32.mrf.mxu1  ;;  %5086 = vmatpush1.bf16.msra.mxu1 %v3748_v20 }
 0x39d   :  { %5087 = vmatprep.subr.bf16.mxu1 %v10178_v57 }
 0x39e   :  { %v9387_v40 = vpop.f32.mrf.mxu0  ;;  %v3373_v36 = vpop.f32.mrf.mxu1 }
 0x39f   :  { %4875 = vmatmul.mubr.bf16.gmra.mxu0 %v6566_v42 }
 0x3a0   :  { %v3087_v54 = vpop.f32.mrf.mxu0  ;;  %v9390_v39 = vpop.f32.mrf.mxu1  ;;  %5088 = vmatpush1.bf16.msra.mxu1 %v3747_v44  ;;  %4882 = vmatprep.mubr.bf16.mxu0 %v6571_v51  ;;  %v10335_v51 = vld [vmem:[#allocation60_spill] sm:$0xff] }
 0x3a1   :  { %5089 = vmatprep.subr.bf16.mxu1 %v10178_v57 }
 0x3a2   :  { %v9395_v0 = vpop.f32.mrf.mxu0  ;;  %v3376_v9 = vpop.f32.mrf.mxu1 }
 0x3a4   :  { %v3092_v5 = vpop.f32.mrf.mxu0  ;;  %v9401_v14 = vpop.f32.mrf.mxu1  ;;  %5090 = vmatpush1.bf16.msra.mxu1 %v3746_v59  ;;  %v6577_v59 = vld [vmem:[%s10108_s6 + $0x144] ss:$16 sps:$4 sm:$0xff]  }
 0x3a5   :  { %5091 = vmatprep.subr.bf16.mxu1 %v10178_v57  ;;  %v10336_v5 = vld [vmem:[#allocation20_spill] sm:$0xff] }
 0x3a6   :  { %v3093_v15 = vpop.f32.mrf.mxu0  ;;  %v3381_v44 = vpop.f32.mrf.mxu1 }
 0x3a7   :  { %4883 = vmatmul.mubr.bf16.gmra.mxu0 %v6569_v21 }
 0x3a8   :  { %v3095_v22 = vpop.f32.mrf.mxu0  ;;  %v9410_v35 = vpop.f32.mrf.mxu1  ;;  %4890 = vmatprep.mubr.bf16.mxu0 %v6574_v45 }
 0x3aa   :  { %v3098_v27 = vpop.f32.mrf.mxu0  ;;  %v3384_v7 = vpop.f32.mrf.mxu1 }
 0x3ab   :  { %v10337_v7 = vld [vmem:[#allocation21_spill] sm:$0xff] }
 0x3ac   :  { %v3100_v6 = vpop.f32.mrf.mxu0  ;;  %v3387_v25 = vpop.f32.mrf.mxu1 }
 0x3ad   :  { %v3099_v6 = vadd.f32 %v3098_v27, %v10337_v7  ;;  %v6590_v7 = vld [vmem:[%s10108_s6 + $0x1e0] ss:$16 sps:$4 sm:$0xff]  }
 0x3ae   :  { %v3101_v60 = vpop.f32.mrf.mxu0  ;;  %v3389_v13 = vpop.f32.mrf.mxu1 }
 0x3af   :  { %4891 = vmatmul.mubr.bf16.gmra.mxu0 %v6572_v12  ;;  %v3102_v21 = vadd.f32 %v3101_v60, %v10336_v5  ;;  %v6581_v12 = vld [vmem:[%s10108_s6 + $0x180] ss:$16 sps:$4 sm:$0xff]   ;;  %v6586_v60 = vld [vmem:[%s10108_s6 + $0x1a4] ss:$16 sps:$4 sm:$0xff]  }
 0x3b0   :  { %v3103_v31 = vpop.f32.mrf.mxu0  ;;  %v3390_v43 = vpop.f32.mrf.mxu1  ;;  %4898 = vmatprep.mubr.bf16.mxu0 %v6577_v59 }
 0x3b1   :  { %v3391_v13 = vadd.f32 %v3390_v43, %v3102_v21 }
 0x3b2   :  { %v3106_v55 = vpop.f32.mrf.mxu0  ;;  %v3392_v38 = vpop.f32.mrf.mxu1 }
 0x3b3   :  { %v3107_v16 = vadd.f32 %v3106_v55, %v10334_v61  ;;  %v10338_v38 = vld [vmem:[#allocation58_spill] sm:$0xff]  ;;  %vm3469_vm8 = vcmp.gt.f32.partialorder %v3391_v13, 0.0 }
 0x3b4   :  { %v3108_v28 = vpop.f32.mrf.mxu0  ;;  %v3395_v8 = vpop.f32.mrf.mxu1 }
 0x3b5   :  { %v3396_v45 = vadd.f32 %v3395_v8, %v3107_v16  ;;  %v3094_v28 = vadd.f32 %v3093_v15, %v10338_v38  ;;  %v10340_v15 = vld [vmem:[#allocation40_spill] sm:$0xff] }
 0x3b6   :  { %v3109_v4 = vpop.f32.mrf.mxu0  ;;  %v3397_v47 = vpop.f32.mrf.mxu1  ;;  %v6614_v38 = vld [vmem:[%s10108_s6 + $0x68] ss:$16 sps:$4 sm:$0xff]  }
 0x3b7   :  { %4899 = vmatmul.mubr.bf16.gmra.mxu0 %v6575_v19  ;;  %v3110_v63 = vadd.f32 %v3109_v4, %v10333_v17  ;;  %v3388_v19 = vadd.f32 %v3387_v25, %v3099_v6  ;;  %v3534_v8 = vmul.f32 0.2, %v3396_v45  ;;  %vm3470_vm7 = vcmp.gt.f32.partialorder %v3396_v45, 0.0  ;;  %v10339_v47 = vld [vmem:[#allocation59_spill] sm:$0xff]  ;;  %v6595_v6 = vld [vmem:[%s10108_s6 + $0x204] ss:$16 sps:$4 sm:$0xff]  }
 0x3b8   :  { %v3111_v58 = vpop.f32.mrf.mxu0  ;;  %v3398_v24 = vpop.f32.mrf.mxu1  ;;  %4906 = vmatprep.mubr.bf16.mxu0 %v6580_v30  ;;  %v3383_v43 = vadd.f32 %v9410_v35, %v3094_v28  ;;  %v6584_v17 = vld [vmem:[%s10108_s6 + $0x1a0] ss:$16 sps:$4 sm:$0xff]   ;;  %v6619_v28 = vld [vmem:[%s10108_s6 + $0x284] ss:$16 sps:$4 sm:$0xff]  }
 0x3b9   :  { %v3399_v42 = vadd.f32 %v3398_v24, %v3110_v63  ;;  %v3091_v58 = vadd.f32 %v9395_v0, %v10339_v47  ;;  %v3533_v24 = vmul.f32 0.2, %v3391_v13  ;;  %vm3468_vm9 = vcmp.gt.f32.partialorder %v3388_v19, 0.0  ;;  %v10341_v0 = vld [vmem:[#allocation41_spill] sm:$0xff] }
 0x3ba   :  { %v3114_v46 = vpop.f32.mrf.mxu0  ;;  %v3400_v56 = vpop.f32.mrf.mxu1  ;;  %v3083_v35 = vadd.f32 %v9376_v50, %v10341_v0  ;;  %vm3467_vm10 = vcmp.gt.f32.partialorder %v3383_v43, 0.0  ;;  %v6626_v47 = vld [vmem:[%s10108_s6 + $0xa8] ss:$16 sps:$4 sm:$0xff]   ;;  %v6641_v0 = vld [vmem:[%s10108_s6 + $0x300] ss:$16 sps:$4 sm:$0xff]  }
 0x3bb   :  { %v3115_v10 = vadd.f32 %v3114_v46, %v10332_v33  ;;  %v3535_v31 = vmul.f32 0.2, %v3399_v42  ;;  %vm3471_vm6 = vcmp.gt.f32.partialorder %v3399_v42, 0.0  ;;  %v3086_v56 = vadd.f32 %v9387_v40, %v10340_v15  ;;  %v6589_v40 = vld [vmem:[%s10108_s6 + $0x1c4] ss:$16 sps:$4 sm:$0xff]  }
 0x3bc   :  { %v3116_v37 = vpop.f32.mrf.mxu0  ;;  %v3403_v1 = vpop.f32.mrf.mxu1  ;;  %v3380_v25 = vadd.f32 %v9401_v14, %v3091_v58  ;;  %v3532_v33 = vmul.f32 0.2, %v3388_v19  ;;  %v10342_v14 = vld [vmem:[#allocation18_spill] sm:$0xff] }
 0x3bd   :  { %v3404_v48 = vadd.f32 %v3403_v1, %v3115_v10  ;;  %v3599_v46 = vsel %vm3471_vm6, %v3399_v42, %v3535_v31  ;;  %v3598_v10 = vsel %vm3470_vm7, %v3396_v45, %v3534_v8  ;;  %v3531_v1 = vmul.f32 0.2, %v3383_v43  ;;  %v6616_v31 = vld [vmem:[%s10108_s6 + $0x6c] ss:$16 sps:$4 sm:$0xff]   ;;  %v6620_v8 = vld [vmem:[%s10108_s6 + $0x88] ss:$16 sps:$4 sm:$0xff]  }
 0x3be   :  { %v3117_v11 = vpop.f32.mrf.mxu0  ;;  %v3405_v20 = vpop.f32.mrf.mxu1  ;;  %v3760_v37 = vpack.c.bf16 %v3599_v46, %v3598_v10  ;;  %v3078_v63 = vadd.f32 %v9365_v26, %v10342_v14  ;;  %v3530_v50 = vmul.f32 0.2, %v3380_v25  ;;  %vm3466_vm11 = vcmp.gt.f32.partialorder %v3380_v25, 0.0  ;;  %v6631_v58 = vld [vmem:[%s10108_s6 + $0x2c4] ss:$16 sps:$4 sm:$0xff]  }
 0x3bf   :  { %v3118_v36 = vadd.f32 %v3117_v11, %v10335_v51  ;;  %4907 = vmatmul.mubr.bf16.gmra.mxu0 %v6578_v3  ;;  %v3536_v44 = vmul.f32 0.2, %v3404_v48  ;;  %vm3472_vm4 = vcmp.gt.f32.partialorder %v3404_v48, 0.0  ;;  %v3375_v3 = vadd.f32 %v9390_v39, %v3086_v56  ;;  %v6632_v46 = vld [vmem:[%s10108_s6 + $0xc8] ss:$16 sps:$4 sm:$0xff]  }
 0x3c0   :  { %v3119_v54 = vpop.f32.mrf.mxu0  ;;  %v3406_v9 = vpop.f32.mrf.mxu1  ;;  %4914 = vmatprep.mubr.bf16.mxu0 %v6583_v29  ;;  %v3597_v29 = vsel %vm3469_vm8, %v3391_v13, %v3533_v24  ;;  %v3372_v11 = vadd.f32 %v9382_v62, %v3083_v35  ;;  %v3367_v20 = vadd.f32 %v9373_v52, %v3078_v63  ;;  %v3595_v16 = vsel %vm3467_vm10, %v3383_v43, %v3531_v1  ;;  %v6592_v52 = vld [vmem:[%s10108_s6 + $0x1e4] ss:$16 sps:$4 sm:$0xff]   ;;  %v6634_v43 = vld [vmem:[%s10108_s6 + $0xcc] ss:$16 sps:$4 sm:$0xff]   ;;  %v6629_v24 = vld [vmem:[%s10108_s6 + $0x2c0] ss:$16 sps:$4 sm:$0xff]  }
 0x3c1   :  { %v3407_v22 = vadd.f32 %v3406_v9, %v3118_v36  ;;  %v3600_v27 = vsel %vm3472_vm4, %v3404_v48, %v3536_v44  ;;  %v3596_v48 = vsel %vm3468_vm9, %v3388_v19, %v3532_v33  ;;  %v3529_v61 = vmul.f32 0.2, %v3375_v3  ;;  %v6587_v54 = vld [vmem:[%s10108_s6 + $0x1c0] ss:$16 sps:$4 sm:$0xff]   ;;  %v6613_v13 = vld [vmem:[%s10108_s6 + $0x264] ss:$16 sps:$4 sm:$0xff]  }
 0x3c2   :  { %v3408_v59 = vpop.f32.mrf.mxu1  ;;  %v3759_v39 = vpack.c.bf16 %v3597_v29, %v3596_v48  ;;  %vm3465_vm12 = vcmp.gt.f32.partialorder %v3375_v3, 0.0  ;;  %v3528_v42 = vmul.f32 0.2, %v3372_v11  ;;  %v3594_v51 = vsel %vm3466_vm11, %v3380_v25, %v3530_v50  ;;  %v6617_v19 = vld [vmem:[%s10108_s6 + $0x280] ss:$16 sps:$4 sm:$0xff]  }
 0x3c3   :  { %vm3473_vm5 = vcmp.gt.f32.partialorder %v3407_v22, 0.0  ;;  %v3537_v55 = vmul.f32 0.2, %v3407_v22  ;;  %vm3464_vm13 = vcmp.gt.f32.partialorder %v3372_v11, 0.0  ;;  %v3758_v26 = vpack.c.bf16 %v3595_v16, %v3594_v51  ;;  %v6608_v59 = vld [vmem:[%s10108_s6 + $0x48] ss:$16 sps:$4 sm:$0xff]  }
 0x3c4   :  { %v3527_v62 = vmul.f32 0.2, %v3367_v20  ;;  %v3593_v36 = vsel %vm3465_vm12, %v3375_v3, %v3529_v61  ;;  %vm3463_vm14 = vcmp.gt.f32.partialorder %v3367_v20, 0.0  ;;  %v3526_v9 = vmul.f32 0.2, %v9367_v32 }
 0x3c5   :  { %v3601_v30 = vsel %vm3473_vm5, %v3407_v22, %v3537_v55  ;;  %v3592_v5 = vsel %vm3464_vm13, %v3372_v11, %v3528_v42  ;;  %v6611_v55 = vld [vmem:[%s10108_s6 + $0x260] ss:$16 sps:$4 sm:$0xff]   ;;  %v6637_v15 = vld [vmem:[%s10108_s6 + $0x2e4] ss:$16 sps:$4 sm:$0xff]   ;;  %v6640_v56 = vld [vmem:[%s10108_s6 + $0xec] ss:$16 sps:$4 sm:$0xff]  }
 0x3c6   :  { %v3761_v4 = vpack.c.bf16 %v3601_v30, %v3600_v27  ;;  %v3757_v21 = vpack.c.bf16 %v3593_v36, %v3592_v5  ;;  %v3591_v45 = vsel %vm3463_vm14, %v3367_v20, %v3527_v62  ;;  %v3590_v44 = vsel %vm3462_vm15, %v9367_v32, %v3526_v9  ;;  %v6593_v32 = vld [vmem:[%s10108_s6 + $0x200] ss:$16 sps:$4 sm:$0xff]   ;;  %v6625_v27 = vld [vmem:[%s10108_s6 + $0x2a4] ss:$16 sps:$4 sm:$0xff]   ;;  %v6628_v30 = vld [vmem:[%s10108_s6 + $0xac] ss:$16 sps:$4 sm:$0xff]  }
 0x3c7   :  { %4915 = vmatmul.mubr.bf16.gmra.mxu0 %v6581_v12  ;;  %v3756_v22 = vpack.c.bf16 %v3591_v45, %v3590_v44  ;;  %v6596_v12 = vld [vmem:[%s10108_s6 + $0x8] ss:$16 sps:$4 sm:$0xff]   ;;  %v6635_v25 = vld [vmem:[%s10108_s6 + $0x2e0] ss:$16 sps:$4 sm:$0xff]   ;;  %v6643_v10 = vld [vmem:[%s10108_s6 + $0x304] ss:$16 sps:$4 sm:$0xff]  }
 0x3c8   :  { %5092 = vmatpush2.bf16.msra.mxu1 %v3761_v4  ;;  %4922 = vmatprep.mubr.bf16.mxu0 %v6586_v60  ;;  %v6622_v60 = vld [vmem:[%s10108_s6 + $0x8c] ss:$16 sps:$4 sm:$0xff]   ;;  %v6623_v4 = vld [vmem:[%s10108_s6 + $0x2a0] ss:$16 sps:$4 sm:$0xff]   ;;  %v6638_v33 = vld [vmem:[%s10108_s6 + $0xe8] ss:$16 sps:$4 sm:$0xff]  }
 0x3c9   :  { %5093 = vmatprep.subr.bf16.mxu1 %v10178_v57  ;;  %v6644_v35 = vld [vmem:[%s10108_s6 + $0x108] ss:$16 sps:$4 sm:$0xff]   ;;  %v6649_v3 = vld [vmem:[%s10108_s6 + $0x324] ss:$16 sps:$4 sm:$0xff]   ;;  %v6652_v1 = vld [vmem:[%s10108_s6 + $0x12c] ss:$16 sps:$4 sm:$0xff]  }
 0x3ca   :  { %v6647_v14 = vld [vmem:[%s10108_s6 + $0x320] ss:$16 sps:$4 sm:$0xff]   ;;  %v6650_v63 = vld [vmem:[%s10108_s6 + $0x128] ss:$16 sps:$4 sm:$0xff]   ;;  %v6655_v11 = vld [vmem:[%s10108_s6 + $0x344] ss:$16 sps:$4 sm:$0xff]  }
 0x3cb   :  { %v6658_v50 = vld [vmem:[%s10108_s6 + $0x14c] ss:$16 sps:$4 sm:$0xff]   ;;  %v6653_v16 = vld [vmem:[%s10108_s6 + $0x340] ss:$16 sps:$4 sm:$0xff]   ;;  %v6656_v42 = vld [vmem:[%s10108_s6 + $0x148] ss:$16 sps:$4 sm:$0xff]  }
 0x3cc   :  { %5094 = vmatpush2.bf16.msra.mxu1 %v3760_v37  ;;  %v6646_v37 = vld [vmem:[%s10108_s6 + $0x10c] ss:$16 sps:$4 sm:$0xff]   ;;  %v6661_v51 = vld [vmem:[%s10108_s6 + $0x364] ss:$16 sps:$4 sm:$0xff]   ;;  %v6659_v9 = vld [vmem:[%s10108_s6 + $0x360] ss:$16 sps:$4 sm:$0xff]  }
 0x3cd   :  { %5095 = vmatprep.subr.bf16.mxu1 %v10178_v57  ;;  %v6662_v5 = vld [vmem:[%s10108_s6 + $0x168] ss:$16 sps:$4 sm:$0xff]   ;;  %v6670_v45 = vld [vmem:[%s10108_s6 + $0x18c] ss:$16 sps:$4 sm:$0xff]  }
 0x3cf   :  { %4923 = vmatmul.mubr.bf16.gmra.mxu0 %v6584_v17 }
 0x3d0   :  { %5096 = vmatpush2.bf16.msra.mxu1 %v3759_v39  ;;  %4930 = vmatprep.mubr.bf16.mxu0 %v6589_v40 }
 0x3d1   :  { %5097 = vmatprep.subr.bf16.mxu1 %v10178_v57 }
 0x3d4   :  { %5098 = vmatpush2.bf16.msra.mxu1 %v3758_v26  ;;  %v6664_v26 = vld [vmem:[%s10108_s6 + $0x16c] ss:$16 sps:$4 sm:$0xff]  }
 0x3d5   :  { %5099 = vmatprep.subr.bf16.mxu1 %v10178_v57 }
 0x3d7   :  { %4931 = vmatmul.mubr.bf16.gmra.mxu0 %v6587_v54 }
 0x3d8   :  { %5100 = vmatpush2.bf16.msra.mxu1 %v3757_v21  ;;  %4938 = vmatprep.mubr.bf16.mxu0 %v6592_v52  ;;  %v6667_v21 = vld [vmem:[%s10108_s6 + $0x384] ss:$16 sps:$4 sm:$0xff]  }
 0x3d9   :  { %5101 = vmatprep.subr.bf16.mxu1 %v10178_v57 }
 0x3dc   :  { %5102 = vmatpush2.bf16.msra.mxu1 %v3756_v22 }
 0x3dd   :  { %5103 = vmatprep.subr.bf16.mxu1 %v10178_v57 }
 0x3df   :  { %4939 = vmatmul.mubr.bf16.gmra.mxu0 %v6590_v7 }
 0x3e0   :  { %5104 = vmatpush2.bf16.msra.mxu1 %v3755_v41  ;;  %4946 = vmatprep.mubr.bf16.mxu0 %v6595_v6  ;;  %v6605_v41 = vld [vmem:[%s10108_s6 + $0x240] ss:$16 sps:$4 sm:$0xff]  }
 0x3e1   :  { %5105 = vmatprep.subr.bf16.mxu1 %v10178_v57  ;;  %v6604_v57 = vld [vmem:[%s10108_s6 + $0x2c] ss:$16 sps:$4 sm:$0xff]  }
 0x3e4   :  { %5106 = vmatpush2.bf16.msra.mxu1 %v3754_v2  ;;  %v6610_v2 = vld [vmem:[%s10108_s6 + $0x4c] ss:$16 sps:$4 sm:$0xff]  }
 0x3e7   :  { %4947 = vmatmul.mubr.bf16.gmra.mxu0 %v6593_v32  ;;  %5108 = vmatmul.mubr.bf16.vlgmr.msra.gmra.mxu1 %v6596_v12  ;;  %v6665_v32 = vld [vmem:[%s10108_s6 + $0x380] ss:$16 sps:$4 sm:$0xff]   ;;  %v6668_v12 = vld [vmem:[%s10108_s6 + $0x188] ss:$16 sps:$4 sm:$0xff]  }
 0x3e8   :  { %4954 = vmatprep.mubr.bf16.mxu0 %v6601_v23  ;;  %5115 = vmatprep.mubr.bf16.mxu1 %v6604_v57  ;;  %v6673_v23 = vld [vmem:[%s10108_s6 + $0x3a4] ss:$16 sps:$4 sm:$0xff]   ;;  %v6676_v57 = vld [vmem:[%s10108_s6 + $0x1ac] ss:$16 sps:$4 sm:$0xff]  }
 0x3ef   :  { %4955 = vmatmul.mubr.bf16.gmra.mxu0 %v6599_v53  ;;  %5116 = vmatmul.mubr.bf16.gmra.mxu1 %v6602_v18 }
 0x3f0   :  { %4962 = vmatprep.mubr.bf16.mxu0 %v6607_v34  ;;  %5123 = vmatprep.mubr.bf16.mxu1 %v6610_v2  ;;  %v9664_v34 = vpop.permute.xlu0 %3978 }
 0x3f7   :  { %4963 = vmatmul.mubr.bf16.gmra.mxu0 %v6605_v41  ;;  %5124 = vmatmul.mubr.bf16.gmra.mxu1 %v6608_v59  ;;  %v9666_v41 = vpop.permute.xlu1 %3983 }
 0x3f8   :  { %4970 = vmatprep.mubr.bf16.mxu0 %v6613_v13  ;;  %5131 = vmatprep.mubr.bf16.mxu1 %v6616_v31  ;;  %v6671_v13 = vld [vmem:[%s10108_s6 + $0x3a0] ss:$16 sps:$4 sm:$0xff]   ;;  %v6674_v31 = vld [vmem:[%s10108_s6 + $0x1a8] ss:$16 sps:$4 sm:$0xff]  }
 0x3ff   :  { %4971 = vmatmul.mubr.bf16.gmra.mxu0 %v6611_v55  ;;  %5132 = vmatmul.mubr.bf16.gmra.mxu1 %v6614_v38  ;;  %v6679_v55 = vld [vmem:[%s10108_s6 + $0x3c4] ss:$16 sps:$4 sm:$0xff]   ;;  %v6682_v38 = vld [vmem:[%s10108_s6 + $0x1cc] ss:$16 sps:$4 sm:$0xff]  }
 0x400   :  { %4978 = vmatprep.mubr.bf16.mxu0 %v6619_v28  ;;  %5139 = vmatprep.mubr.bf16.mxu1 %v6622_v60  ;;  %v9682_v60 = vpop.permute.xlu0 %3988 }
 0x407   :  { %4979 = vmatmul.mubr.bf16.gmra.mxu0 %v6617_v19  ;;  %5140 = vmatmul.mubr.bf16.gmra.mxu1 %v6620_v8  ;;  %v9686_v8 = vpop.permute.xlu1 %3993 }
 0x408   :  { %4986 = vmatprep.mubr.bf16.mxu0 %v6625_v27  ;;  %5147 = vmatprep.mubr.bf16.mxu1 %v6628_v30 }
 0x40f   :  { %4987 = vmatmul.mubr.bf16.gmra.mxu0 %v6623_v4  ;;  %5148 = vmatmul.mubr.bf16.gmra.mxu1 %v6626_v47  ;;  %v6677_v4 = vld [vmem:[%s10108_s6 + $0x3c0] ss:$16 sps:$4 sm:$0xff]   ;;  %v6680_v47 = vld [vmem:[%s10108_s6 + $0x1c8] ss:$16 sps:$4 sm:$0xff]  }
 0x410   :  { %4994 = vmatprep.mubr.bf16.mxu0 %v6631_v58  ;;  %5155 = vmatprep.mubr.bf16.mxu1 %v6634_v43  ;;  %v9696_v58 = vpop.permute.xlu0 %3998  ;;  %v6685_v43 = vld [vmem:[%s10108_s6 + $0x3e4] ss:$16 sps:$4 sm:$0xff]  }
 0x417   :  { %4995 = vmatmul.mubr.bf16.gmra.mxu0 %v6629_v24  ;;  %5156 = vmatmul.mubr.bf16.gmra.mxu1 %v6632_v46  ;;  %v6688_v24 = vld [vmem:[%s10108_s6 + $0x1ec] ss:$16 sps:$4 sm:$0xff]  }
 0x418   :  { %5002 = vmatprep.mubr.bf16.mxu0 %v6637_v15  ;;  %5163 = vmatprep.mubr.bf16.mxu1 %v6640_v56  ;;  %v9704_v15 = vpop.permute.xlu1 %4003 }
 0x41f   :  { %5003 = vmatmul.mubr.bf16.gmra.mxu0 %v6635_v25  ;;  %5164 = vmatmul.mubr.bf16.gmra.mxu1 %v6638_v33  ;;  %v9708_v33 = vpop.permute.xlu0 %4008 }
 0x420   :  { %5010 = vmatprep.mubr.bf16.mxu0 %v6643_v10  ;;  %5171 = vmatprep.mubr.bf16.mxu1 %v6646_v37  ;;  %v6683_v37 = vld [vmem:[%s10108_s6 + $0x3e0] ss:$16 sps:$4 sm:$0xff]  }
 0x427   :  { %v9598_v29 = vpop.f32.mrf.mxu0  ;;  %5011 = vmatmul.mubr.bf16.gmra.mxu0 %v6641_v0  ;;  %5172 = vmatmul.mubr.bf16.gmra.mxu1 %v6644_v35  ;;  %v6686_v0 = vld [vmem:[%s10108_s6 + $0x1e8] ss:$16 sps:$4 sm:$0xff]   ;;  %v9718_v35 = vpop.permute.xlu1 %4013 }
 0x428   :  { %5018 = vmatprep.mubr.bf16.mxu0 %v6649_v3  ;;  %5179 = vmatprep.mubr.bf16.mxu1 %v6652_v1  ;;  %v6691_v3 = vld [vmem:[%s10108_s6 + $0x20c] ss:$16 sps:$4 sm:$0xff]  }
 0x429   :  { %v4822_v17 = vpop.f32.mrf.mxu0 }
 0x42b   :  { %v9600_v40 = vpop.f32.mrf.mxu0 }
 0x42d   :  { %v4825_v48 = vpop.f32.mrf.mxu0 }
 0x42e   :  { %v6689_v48 = vld [vmem:[%s10108_s6 + $0x208] ss:$16 sps:$4 sm:$0xff]  }
 0x42f   :  { %v9614_v39 = vpop.f32.mrf.mxu0  ;;  %5019 = vmatmul.mubr.bf16.gmra.mxu0 %v6647_v14  ;;  %5180 = vmatmul.mubr.bf16.gmra.mxu1 %v6650_v63  ;;  %v9725_v14 = vpop.permute.xlu0 %4018 }
 0x430   :  { %5026 = vmatprep.mubr.bf16.mxu0 %v6655_v11  ;;  %5187 = vmatprep.mubr.bf16.mxu1 %v6658_v50  ;;  %v9727_v11 = vpop.permute.xlu1 %4023 }
 0x431   :  { %v4830_v20 = vpop.f32.mrf.mxu0 }
 0x432   :  { %v6694_v20 = vld [vmem:[%s10108_s6 + $0x22c] ss:$16 sps:$4 sm:$0xff]  }
 0x433   :  { %v9616_v61 = vpop.f32.mrf.mxu0 }
 0x435   :  { %v4833_v62 = vpop.f32.mrf.mxu0 }
 0x437   :  { %v9630_v36 = vpop.f32.mrf.mxu0  ;;  %5027 = vmatmul.mubr.bf16.gmra.mxu0 %v6653_v16  ;;  %5188 = vmatmul.mubr.bf16.gmra.mxu1 %v6656_v42  ;;  %v9737_v42 = vpop.permute.xlu0 %4028 }
 0x438   :  { %5034 = vmatprep.mubr.bf16.mxu0 %v6661_v51  ;;  %5195 = vmatprep.mubr.bf16.mxu1 %v6664_v26  ;;  %10343 = vst [vmem:[#allocation7_spill] sm:$0xff] %v9737_v42  ;;  %v9741_v26 = vpop.permute.xlu1 %4033 }
 0x439   :  { %v4838_v54 = vpop.f32.mrf.mxu0  ;;  %10344 = vst [vmem:[#allocation28_spill] sm:$0xff] %v9741_v26 }
 0x43b   :  { %v9632_v52 = vpop.f32.mrf.mxu0 }
 0x43d   :  { %v4841_v44 = vpop.f32.mrf.mxu0 }
 0x43e   :  { %v9753_v44 = vpop.permute.xlu1 %4043 }
 0x43f   :  { %v9646_v22 = vpop.f32.mrf.mxu0  ;;  %5035 = vmatmul.mubr.bf16.gmra.mxu0 %v6659_v9  ;;  %5196 = vmatmul.mubr.bf16.gmra.mxu1 %v6662_v5  ;;  %v6692_v9 = vld [vmem:[%s10108_s6 + $0x228] ss:$16 sps:$4 sm:$0xff]   ;;  %v9748_v5 = vpop.permute.xlu0 %4038  ;;  %10346 = vst [vmem:[#allocation67_spill] sm:$0xff] %v9753_v44 }
 0x440   :  { %5042 = vmatprep.mubr.bf16.mxu0 %v6667_v21  ;;  %5203 = vmatprep.mubr.bf16.mxu1 %v6670_v45  ;;  %10345 = vst [vmem:[#allocation46_spill] sm:$0xff] %v9748_v5  ;;  %v6697_v21 = vld [vmem:[%s10108_s6 + $0x24c] ss:$16 sps:$4 sm:$0xff]  }
 0x441   :  { %v4846_v7 = vpop.f32.mrf.mxu0 }
 0x443   :  { %v9648_v6 = vpop.f32.mrf.mxu0 }
 0x445   :  { %v4849_v53 = vpop.f32.mrf.mxu0 }
 0x446   :  { %v9764_v53 = vpop.permute.xlu1 %4053 }
 0x447   :  { %v9662_v18 = vpop.f32.mrf.mxu0  ;;  %5043 = vmatmul.mubr.bf16.gmra.mxu0 %v6665_v32  ;;  %5204 = vmatmul.mubr.bf16.gmra.mxu1 %v6668_v12  ;;  %v9757_v12 = vpop.permute.xlu0 %4048  ;;  %10348 = vst [vmem:[#allocation47_spill] sm:$0xff] %v9764_v53 }
 0x448   :  { %5050 = vmatprep.mubr.bf16.mxu0 %v6673_v23  ;;  %5211 = vmatprep.mubr.bf16.mxu1 %v6676_v57  ;;  %10347 = vst [vmem:[#allocation6_spill] sm:$0xff] %v9757_v12  ;;  %v6695_v57 = vld [vmem:[%s10108_s6 + $0x248] ss:$16 sps:$4 sm:$0xff]  }
 0x449   :  { %v4854_v2 = vpop.f32.mrf.mxu0 }
 0x44a   :  { %v6700_v2 = vld [vmem:[%s10108_s6 + $0x26c] ss:$16 sps:$4 sm:$0xff]  }
 0x44b   :  { %v9668_v59 = vpop.f32.mrf.mxu0 }
 0x44d   :  { %v4857_v28 = vpop.f32.mrf.mxu0 }
 0x44e   :  { %v9773_v28 = vpop.permute.xlu1 %4063 }
 0x44f   :  { %v9684_v19 = vpop.f32.mrf.mxu0  ;;  %5051 = vmatmul.mubr.bf16.gmra.mxu0 %v6671_v13  ;;  %5212 = vmatmul.mubr.bf16.gmra.mxu1 %v6674_v31  ;;  %10350 = vst [vmem:[#allocation45_spill] sm:$0xff] %v9773_v28 }
 0x450   :  { %5058 = vmatprep.mubr.bf16.mxu0 %v6679_v55  ;;  %5219 = vmatprep.mubr.bf16.mxu1 %v6682_v38  ;;  %v9771_v55 = vpop.permute.xlu0 %4058 }
 0x451   :  { %v4862_v27 = vpop.f32.mrf.mxu0  ;;  %10349 = vst [vmem:[#allocation66_spill] sm:$0xff] %v9771_v55 }
 0x453   :  { %v9688_v30 = vpop.f32.mrf.mxu0 }
 0x455   :  { %v4865_v46 = vpop.f32.mrf.mxu0 }
 0x457   :  { %v9706_v56 = vpop.f32.mrf.mxu0  ;;  %5059 = vmatmul.mubr.bf16.gmra.mxu0 %v6677_v4  ;;  %5220 = vmatmul.mubr.bf16.gmra.mxu1 %v6680_v47  ;;  %v6698_v4 = vld [vmem:[%s10108_s6 + $0x268] ss:$16 sps:$4 sm:$0xff]   ;;  %v6703_v47 = vld [vmem:[%s10108_s6 + $0x28c] ss:$16 sps:$4 sm:$0xff]  }
 0x458   :  { %5066 = vmatprep.mubr.bf16.mxu0 %v6685_v43  ;;  %5227 = vmatprep.mubr.bf16.mxu1 %v6688_v24  ;;  %v9783_v24 = vpop.permute.xlu0 %4068 }
 0x459   :  { %v4870_v25 = vpop.f32.mrf.mxu0  ;;  %10351 = vst [vmem:[#allocation26_spill] sm:$0xff] %v9783_v24 }
 0x45a   :  { %v9787_v25 = vpop.permute.xlu1 %4073 }
 0x45b   :  { %v9710_v10 = vpop.f32.mrf.mxu0  ;;  %10352 = vst [vmem:[#allocation62_spill] sm:$0xff] %v9787_v25 }
 0x45d   :  { %v4873_v1 = vpop.f32.mrf.mxu0 }
 0x45e   :  { %v9794_v1 = vpop.permute.xlu0 %4078 }
 0x45f   :  { %v9723_v17 = vpop.f32.mrf.mxu0  ;;  %5067 = vmatmul.mubr.bf16.gmra.mxu0 %v6683_v37  ;;  %5228 = vmatmul.mubr.bf16.gmra.mxu1 %v6686_v0  ;;  %10353 = vst [vmem:[#allocation64_spill] sm:$0xff] %v9794_v1 }
 0x460   :  { %5235 = vmatprep.mubr.bf16.mxu1 %v6691_v3  ;;  %v6701_v3 = vld [vmem:[%s10108_s6 + $0x288] ss:$16 sps:$4 sm:$0xff]  }
 0x461   :  { %v4878_v63 = vpop.f32.mrf.mxu0 }
 0x462   :  { %v6706_v63 = vld [vmem:[%s10108_s6 + $0x2ac] ss:$16 sps:$4 sm:$0xff]  }
 0x463   :  { %v9729_v50 = vpop.f32.mrf.mxu0 }
 0x465   :  { %v4881_v16 = vpop.f32.mrf.mxu0 }
 0x467   :  { %v9739_v51 = vpop.f32.mrf.mxu0  ;;  %5236 = vmatmul.mubr.bf16.gmra.mxu1 %v6689_v48 }
 0x468   :  { %5243 = vmatprep.mubr.bf16.mxu1 %v6694_v20  ;;  %v9799_v20 = vpop.permute.xlu1 %4083 }
 0x469   :  { %v4886_v62 = vpop.f32.mrf.mxu0  ;;  %10354 = vst [vmem:[#allocation24_spill] sm:$0xff] %v9799_v20 }
 0x46b   :  { %v9743_v54 = vpop.f32.mrf.mxu0 }
 0x46d   :  { %v4889_v45 = vpop.f32.mrf.mxu0 }
 0x46e   :  { %v6704_v45 = vld [vmem:[%s10108_s6 + $0x2a8] ss:$16 sps:$4 sm:$0xff]  }
 0x46f   :  { %v9755_v7 = vpop.f32.mrf.mxu0  ;;  %5244 = vmatmul.mubr.bf16.gmra.mxu1 %v6692_v9  ;;  %v9803_v9 = vpop.permute.xlu0 %4088 }
 0x470   :  { %5251 = vmatprep.mubr.bf16.mxu1 %v6697_v21  ;;  %10355 = vst [vmem:[#allocation44_spill] sm:$0xff] %v9803_v9  ;;  %v10365_v9 = vld [vmem:[#allocation38_spill] sm:$0xff] }
 0x471   :  { %v4894_v32 = vpop.f32.mrf.mxu0 }
 0x472   :  { %v9810_v32 = vpop.permute.xlu1 %4093 }
 0x473   :  { %v9759_v23 = vpop.f32.mrf.mxu0  ;;  %10356 = vst [vmem:[#allocation25_spill] sm:$0xff] %v9810_v32 }
 0x475   :  { %v4897_v13 = vpop.f32.mrf.mxu0 }
 0x477   :  { %v9769_v31 = vpop.f32.mrf.mxu0  ;;  %5252 = vmatmul.mubr.bf16.gmra.mxu1 %v6695_v57  ;;  %v6709_v57 = vld [vmem:[%s10108_s6 + $0x2cc] ss:$16 sps:$4 sm:$0xff]  }
 0x478   :  { %5259 = vmatprep.mubr.bf16.mxu1 %v6700_v2 }
 0x479   :  { %v4902_v38 = vpop.f32.mrf.mxu0 }
 0x47a   :  { %v9817_v38 = vpop.permute.xlu0 %4098 }
 0x47b   :  { %v9775_v27 = vpop.f32.mrf.mxu0  ;;  %10357 = vst [vmem:[#allocation22_spill] sm:$0xff] %v9817_v38 }
 0x47d   :  { %v4905_v43 = vpop.f32.mrf.mxu0 }
 0x47f   :  { %v9785_v46 = vpop.f32.mrf.mxu0  ;;  %5260 = vmatmul.mubr.bf16.gmra.mxu1 %v6698_v4 }
 0x480   :  { %5267 = vmatprep.mubr.bf16.mxu1 %v6703_v47  ;;  %v9819_v47 = vpop.permute.xlu1 %4103 }
 0x481   :  { %v4910_v37 = vpop.f32.mrf.mxu0  ;;  %10358 = vst [vmem:[#allocation8_spill] sm:$0xff] %v9819_v47 }
 0x482   :  { %v6707_v37 = vld [vmem:[%s10108_s6 + $0x2c8] ss:$16 sps:$4 sm:$0xff]  }
 0x483   :  { %v9789_v0 = vpop.f32.mrf.mxu0 }
 0x485   :  { %v4913_v48 = vpop.f32.mrf.mxu0 }
 0x486   :  { %v9829_v48 = vpop.permute.xlu0 %4108 }
 0x487   :  { %v9801_v16 = vpop.f32.mrf.mxu0  ;;  %5268 = vmatmul.mubr.bf16.gmra.mxu1 %v6701_v3  ;;  %v6712_v3 = vld [vmem:[%s10108_s6 + $0x2ec] ss:$16 sps:$4 sm:$0xff]   ;;  %10359 = vst [vmem:[#allocation23_spill] sm:$0xff] %v9829_v48 }
 0x488   :  { %5275 = vmatprep.mubr.bf16.mxu1 %v6706_v63 }
 0x489   :  { %v4918_v62 = vpop.f32.mrf.mxu0 }
 0x48a   :  { %v9840_v47 = vpop.permute.xlu0 %4118 }
 0x48b   :  { %v9805_v21 = vpop.f32.mrf.mxu0  ;;  %10361 = vst [vmem:[#allocation39_spill] sm:$0xff] %v9840_v47  ;;  %v6713_v47 = vld [vmem:[%s10108_s6 + $0x308] ss:$16 sps:$4 sm:$0xff]  }
 0x48d   :  { %v4921_v2 = vpop.f32.mrf.mxu0 }
 0x48f   :  { %v9815_v13 = vpop.f32.mrf.mxu0  ;;  %5276 = vmatmul.mubr.bf16.gmra.mxu1 %v6704_v45  ;;  %v9833_v45 = vpop.permute.xlu1 %4113 }
 0x490   :  { %5283 = vmatprep.mubr.bf16.mxu1 %v6709_v57  ;;  %10360 = vst [vmem:[#allocation63_spill] sm:$0xff] %v9833_v45 }
 0x491   :  { %v4926_v4 = vpop.f32.mrf.mxu0 }
 0x492   :  { %v6710_v4 = vld [vmem:[%s10108_s6 + $0x2e8] ss:$16 sps:$4 sm:$0xff]  }
 0x493   :  { %v9821_v43 = vpop.f32.mrf.mxu0  ;;  %v9845_v38 = vpop.permute.xlu1 %4123 }
 0x494   :  { %10362 = vst [vmem:[#allocation65_spill] sm:$0xff] %v9845_v38 }
 0x495   :  { %v4929_v63 = vpop.f32.mrf.mxu0 }
 0x496   :  { %v6715_v63 = vld [vmem:[%s10108_s6 + $0x30c] ss:$16 sps:$4 sm:$0xff]  }
 0x497   :  { %v9831_v62 = vpop.f32.mrf.mxu0  ;;  %5284 = vmatmul.mubr.bf16.gmra.mxu1 %v6707_v37  ;;  %v9856_v32 = vpop.permute.xlu1 %4133 }
 0x498   :  { %5291 = vmatprep.mubr.bf16.mxu1 %v6712_v3  ;;  %10364 = vst [vmem:[#allocation27_spill] sm:$0xff] %v9856_v32  ;;  %v10368_v32 = vld [vmem:[#allocation17_spill] sm:$0xff] }
 0x499   :  { %v4934_v57 = vpop.f32.mrf.mxu0  ;;  %v4824_v28 = vadd.f32 %v9600_v40, %v10368_v32 }
 0x49a   :  { %v9849_v57 = vpop.permute.xlu0 %4128 }
 0x49b   :  { %v9835_v2 = vpop.f32.mrf.mxu0  ;;  %10363 = vst [vmem:[#allocation57_spill] sm:$0xff] %v9849_v57  ;;  %v9867_v24 = vpop.permute.xlu1 %4143 }
 0x49c   :  { %10367 = vst [vmem:[#allocation19_spill] sm:$0xff] %v9867_v24 }
 0x49d   :  { %v4937_v48 = vpop.f32.mrf.mxu0 }
 0x49e   :  { %v6718_v48 = vld [vmem:[%s10108_s6 + $0x32c] ss:$16 sps:$4 sm:$0xff]   ;;  %v9865_v57 = vpop.permute.xlu0 %4138 }
 0x49f   :  { %v9847_v37 = vpop.f32.mrf.mxu0  ;;  %5292 = vmatmul.mubr.bf16.gmra.mxu1 %v6710_v4  ;;  %v4821_v4 = vadd.f32 %v9598_v29, %v10365_v9  ;;  %10366 = vst [vmem:[#allocation56_spill] sm:$0xff] %v9865_v57  ;;  %v6716_v9 = vld [vmem:[%s10108_s6 + $0x328] ss:$16 sps:$4 sm:$0xff]   ;;  %v5628_v12 = vpop.permute.xlu1 %5627 }
 0x4a0   :  { %5299 = vmatprep.mubr.bf16.mxu1 %v6715_v63 }
 0x4a1   :  { %v4942_v3 = vpop.f32.mrf.mxu0 }
 0x4a3   :  { %v9851_v45 = vpop.f32.mrf.mxu0 }
 0x4a5   :  { %v4945_v38 = vpop.f32.mrf.mxu0 }
 0x4a7   :  { %v9863_v63 = vpop.f32.mrf.mxu0  ;;  %v5109_v3 = vpop.f32.mrf.mxu1  ;;  %5300 = vmatmul.mubr.bf16.gmra.mxu1 %v6713_v47 }
 0x4a8   :  { %v5110_v20 = vadd.f32 %v5109_v3, %v4821_v4  ;;  %5307 = vmatprep.mubr.bf16.mxu1 %v6718_v48  ;;  %v5623_v4 = vpop.permute.xlu0 %5622  ;;  %v10369_v3 = vld [vmem:[#allocation16_spill] sm:$0xff] }
 0x4a9   :  { %v4950_v1 = vpop.f32.mrf.mxu0  ;;  %v5111_v25 = vpop.f32.mrf.mxu1  ;;  %v4829_v40 = vadd.f32 %v9614_v39, %v10369_v3 }
 0x4aa   :  { %v5428_v55 = vmul.f32 0.2, %v5110_v20  ;;  %vm5364_vm0 = vcmp.gt.f32.partialorder %v5110_v20, 0.0  ;;  %v6721_v1 = vld [vmem:[%s10108_s6 + $0x34c] ss:$16 sps:$4 sm:$0xff]  }
 0x4ab   :  { %v9871_v38 = vpop.f32.mrf.mxu0  ;;  %v5112_v29 = vpop.f32.mrf.mxu1 }
 0x4ac   :  { %v5113_v47 = vadd.f32 %v5112_v29, %v4824_v28  ;;  %v5492_v32 = vsel %vm5364_vm0, %v5110_v20, %v5428_v55 }
 0x4ad   :  { %v4953_v25 = vpop.f32.mrf.mxu0  ;;  %v5114_v48 = vpop.f32.mrf.mxu1  ;;  %v5940_v29 = vmul.f32 %v5623_v4, %v5492_v32 }
 0x4ae   :  { %vm5365_vm1 = vcmp.gt.f32.partialorder %v5113_v47, 0.0  ;;  %v5429_v24 = vmul.f32 0.2, %v5113_v47  ;;  %v10370_v48 = vld [vmem:[#allocation55_spill] sm:$0xff] }
 0x4af   :  { %v9881_v57 = vpop.f32.mrf.mxu0  ;;  %v5117_v53 = vpop.f32.mrf.mxu1  ;;  %5308 = vmatmul.mubr.bf16.gmra.mxu1 %v6716_v9  ;;  %v4832_v42 = vadd.f32 %v9616_v61, %v10370_v48  ;;  %v6719_v9 = vld [vmem:[%s10108_s6 + $0x348] ss:$16 sps:$4 sm:$0xff]  }
 0x4b0   :  { %v5493_v44 = vsel %vm5365_vm1, %v5113_v47, %v5429_v24  ;;  %v5118_v28 = vadd.f32 %v5117_v53, %v4829_v40  ;;  %5315 = vmatprep.mubr.bf16.mxu1 %v6721_v1  ;;  %v5633_v24 = vpop.permute.xlu0 %5632  ;;  %v10371_v1 = vld [vmem:[#allocation54_spill] sm:$0xff] }
 0x4b1   :  { %v5941_v5 = vmul.f32 %v5628_v12, %v5493_v44  ;;  %v4958_v26 = vpop.f32.mrf.mxu0  ;;  %v5119_v25 = vpop.f32.mrf.mxu1 }
 0x4b2   :  { %vm5366_vm2 = vcmp.gt.f32.partialorder %v5118_v28, 0.0  ;;  %v5430_v39 = vmul.f32 0.2, %v5118_v28  ;;  %v6724_v26 = vld [vmem:[%s10108_s6 + $0x36c] ss:$16 sps:$4 sm:$0xff]   ;;  %v5638_v25 = vpop.permute.xlu1 %5637 }
 0x4b3   :  { %v6004_v55 = vadd.f32 %v5941_v5, %v5940_v29  ;;  %v9885_v20 = vpop.f32.mrf.mxu0  ;;  %v5120_v3 = vpop.f32.mrf.mxu1  ;;  %v4837_v5 = vadd.f32 %v9630_v36, %v10371_v1 }
 0x4b4   :  { %v5494_v53 = vsel %vm5366_vm2, %v5118_v28, %v5430_v39  ;;  %v5121_v47 = vadd.f32 %v5120_v3, %v4832_v42 }
 0x4b5   :  { %v5942_v44 = vmul.f32 %v5633_v24, %v5494_v53  ;;  %v4961_v12 = vpop.f32.mrf.mxu0  ;;  %v5122_v61 = vpop.f32.mrf.mxu1  ;;  %v10372_v24 = vld [vmem:[#allocation37_spill] sm:$0xff] }
 0x4b6   :  { %vm5367_vm3 = vcmp.gt.f32.partialorder %v5121_v47, 0.0  ;;  %v5431_v4 = vmul.f32 0.2, %v5121_v47  ;;  %v4840_v53 = vadd.f32 %v9632_v52, %v10372_v24 }
 0x4b7   :  { %v6005_v40 = vadd.f32 %v6004_v55, %v5942_v44  ;;  %v9895_v32 = vpop.f32.mrf.mxu0  ;;  %v5125_v29 = vpop.f32.mrf.mxu1  ;;  %5316 = vmatmul.mubr.bf16.gmra.mxu1 %v6719_v9  ;;  %v6722_v9 = vld [vmem:[%s10108_s6 + $0x368] ss:$16 sps:$4 sm:$0xff]  }
 0x4b8   :  { %v5495_v28 = vsel %vm5367_vm3, %v5121_v47, %v5431_v4  ;;  %v5126_v42 = vadd.f32 %v5125_v29, %v4837_v5  ;;  %5323 = vmatprep.mubr.bf16.mxu1 %v6724_v26  ;;  %v5643_v44 = vpop.permute.xlu0 %5642  ;;  %v6727_v26 = vld [vmem:[%s10108_s6 + $0x38c] ss:$16 sps:$4 sm:$0xff]   ;;  %v10373_v29 = vld [vmem:[#allocation36_spill] sm:$0xff] }
 0x4b9   :  { %v5943_v48 = vmul.f32 %v5638_v25, %v5495_v28  ;;  %v4966_v39 = vpop.f32.mrf.mxu0  ;;  %v5127_v3 = vpop.f32.mrf.mxu1 }
 0x4ba   :  { %vm5368_vm4 = vcmp.gt.f32.partialorder %v5126_v42, 0.0  ;;  %v5432_v12 = vmul.f32 0.2, %v5126_v42  ;;  %v5648_v3 = vpop.permute.xlu1 %5647 }
 0x4bb   :  { %v6006_v36 = vadd.f32 %v6005_v40, %v5943_v48  ;;  %v9899_v61 = vpop.f32.mrf.mxu0  ;;  %v5128_v55 = vpop.f32.mrf.mxu1  ;;  %v4845_v40 = vadd.f32 %v9646_v22, %v10373_v29 }
 0x4bc   :  { %v5496_v47 = vsel %vm5368_vm4, %v5126_v42, %v5432_v12  ;;  %v5129_v1 = vadd.f32 %v5128_v55, %v4840_v53 }
 0x4bd   :  { %v5944_v5 = vmul.f32 %v5643_v44, %v5496_v47  ;;  %v4969_v4 = vpop.f32.mrf.mxu0  ;;  %v5130_v52 = vpop.f32.mrf.mxu1  ;;  %v10374_v44 = vld [vmem:[#allocation15_spill] sm:$0xff] }
 0x4be   :  { %vm5369_vm5 = vcmp.gt.f32.partialorder %v5129_v1, 0.0  ;;  %v5433_v25 = vmul.f32 0.2, %v5129_v1  ;;  %v4848_v47 = vadd.f32 %v9648_v6, %v10374_v44 }
 0x4bf   :  { %v6007_v28 = vadd.f32 %v6006_v36, %v5944_v5  ;;  %v9909_v48 = vpop.f32.mrf.mxu0  ;;  %v5133_v39 = vpop.f32.mrf.mxu1  ;;  %5324 = vmatmul.mubr.bf16.gmra.mxu1 %v6722_v9  ;;  %v6725_v9 = vld [vmem:[%s10108_s6 + $0x388] ss:$16 sps:$4 sm:$0xff]  }
 0x4c0   :  { %v5497_v42 = vsel %vm5369_vm5, %v5129_v1, %v5433_v25  ;;  %v5134_v24 = vadd.f32 %v5133_v39, %v4845_v40  ;;  %5331 = vmatprep.mubr.bf16.mxu1 %v6727_v26  ;;  %v5653_v5 = vpop.permute.xlu0 %5652  ;;  %v6730_v26 = vld [vmem:[%s10108_s6 + $0x3ac] ss:$16 sps:$4 sm:$0xff]   ;;  %v10375_v39 = vld [vmem:[#allocation14_spill] sm:$0xff] }
 0x4c1   :  { %v5945_v53 = vmul.f32 %v5648_v3, %v5497_v42  ;;  %v4974_v12 = vpop.f32.mrf.mxu0  ;;  %v5135_v55 = vpop.f32.mrf.mxu1 }
 0x4c2   :  { %vm5370_vm6 = vcmp.gt.f32.partialorder %v5134_v24, 0.0  ;;  %v5434_v4 = vmul.f32 0.2, %v5134_v24  ;;  %v5658_v55 = vpop.permute.xlu1 %5657 }
 0x4c3   :  { %v6008_v22 = vadd.f32 %v6007_v28, %v5945_v53  ;;  %v9913_v52 = vpop.f32.mrf.mxu0  ;;  %v5136_v36 = vpop.f32.mrf.mxu1  ;;  %v4853_v28 = vadd.f32 %v9662_v18, %v10375_v39 }
 0x4c4   :  { %v5498_v1 = vsel %vm5370_vm6, %v5134_v24, %v5434_v4  ;;  %v5137_v29 = vadd.f32 %v5136_v36, %v4848_v47 }
 0x4c5   :  { %v5946_v40 = vmul.f32 %v5653_v5, %v5498_v1  ;;  %v4977_v25 = vpop.f32.mrf.mxu0  ;;  %v5138_v6 = vpop.f32.mrf.mxu1  ;;  %v10376_v5 = vld [vmem:[#allocation53_spill] sm:$0xff] }
 0x4c6   :  { %vm5371_vm7 = vcmp.gt.f32.partialorder %v5137_v29, 0.0  ;;  %v5435_v3 = vmul.f32 0.2, %v5137_v29  ;;  %v4856_v1 = vadd.f32 %v9668_v59, %v10376_v5 }
 0x4c7   :  { %v6009_v42 = vadd.f32 %v6008_v22, %v5946_v40  ;;  %v9923_v53 = vpop.f32.mrf.mxu0  ;;  %v5141_v12 = vpop.f32.mrf.mxu1  ;;  %5332 = vmatmul.mubr.bf16.gmra.mxu1 %v6725_v9  ;;  %v6728_v9 = vld [vmem:[%s10108_s6 + $0x3a8] ss:$16 sps:$4 sm:$0xff]  }
 0x4c8   :  { %v5499_v24 = vsel %vm5371_vm7, %v5137_v29, %v5435_v3  ;;  %v5142_v44 = vadd.f32 %v5141_v12, %v4853_v28  ;;  %5339 = vmatprep.mubr.bf16.mxu1 %v6730_v26  ;;  %v5663_v40 = vpop.permute.xlu0 %5662  ;;  %v6733_v26 = vld [vmem:[%s10108_s6 + $0x3cc] ss:$16 sps:$4 sm:$0xff]   ;;  %v10377_v12 = vld [vmem:[#allocation52_spill] sm:$0xff] }
 0x4c9   :  { %v5947_v47 = vmul.f32 %v5658_v55, %v5499_v24  ;;  %v4982_v4 = vpop.f32.mrf.mxu0  ;;  %v5143_v36 = vpop.f32.mrf.mxu1 }
 0x4ca   :  { %vm5372_vm8 = vcmp.gt.f32.partialorder %v5142_v44, 0.0  ;;  %v5436_v25 = vmul.f32 0.2, %v5142_v44  ;;  %v5668_v36 = vpop.permute.xlu1 %5667 }
 0x4cb   :  { %v6010_v18 = vadd.f32 %v6009_v42, %v5947_v47  ;;  %v9927_v6 = vpop.f32.mrf.mxu0  ;;  %v5144_v22 = vpop.f32.mrf.mxu1  ;;  %v4861_v42 = vadd.f32 %v9684_v19, %v10377_v12 }
 0x4cc   :  { %v5500_v29 = vsel %vm5372_vm8, %v5142_v44, %v5436_v25  ;;  %v5145_v39 = vadd.f32 %v5144_v22, %v4856_v1 }
 0x4cd   :  { %v5948_v28 = vmul.f32 %v5663_v40, %v5500_v29  ;;  %v4985_v3 = vpop.f32.mrf.mxu0  ;;  %v5146_v59 = vpop.f32.mrf.mxu1  ;;  %v10378_v40 = vld [vmem:[#allocation35_spill] sm:$0xff] }
 0x4ce   :  { %vm5373_vm9 = vcmp.gt.f32.partialorder %v5145_v39, 0.0  ;;  %v5437_v55 = vmul.f32 0.2, %v5145_v39  ;;  %v4864_v29 = vadd.f32 %v9688_v30, %v10378_v40 }
 0x4cf   :  { %v6011_v24 = vadd.f32 %v6010_v18, %v5948_v28  ;;  %v9937_v47 = vpop.f32.mrf.mxu0  ;;  %v5149_v4 = vpop.f32.mrf.mxu1  ;;  %5340 = vmatmul.mubr.bf16.gmra.mxu1 %v6728_v9  ;;  %v6731_v9 = vld [vmem:[%s10108_s6 + $0x3c8] ss:$16 sps:$4 sm:$0xff]  }
 0x4d0   :  { %v5501_v44 = vsel %vm5373_vm9, %v5145_v39, %v5437_v55  ;;  %v5150_v5 = vadd.f32 %v5149_v4, %v4861_v42  ;;  %5347 = vmatprep.mubr.bf16.mxu1 %v6733_v26  ;;  %v5673_v28 = vpop.permute.xlu0 %5672  ;;  %v6736_v26 = vld [vmem:[%s10108_s6 + $0x3ec] ss:$16 sps:$4 sm:$0xff]   ;;  %v10379_v4 = vld [vmem:[#allocation34_spill] sm:$0xff] }
 0x4d1   :  { %v5949_v1 = vmul.f32 %v5668_v36, %v5501_v44  ;;  %v4990_v25 = vpop.f32.mrf.mxu0  ;;  %v5151_v22 = vpop.f32.mrf.mxu1 }
 0x4d2   :  { %vm5374_vm10 = vcmp.gt.f32.partialorder %v5150_v5, 0.0  ;;  %v5438_v3 = vmul.f32 0.2, %v5150_v5  ;;  %v5678_v22 = vpop.permute.xlu1 %5677 }
 0x4d3   :  { %v6012_v19 = vadd.f32 %v6011_v24, %v5949_v1  ;;  %v9941_v59 = vpop.f32.mrf.mxu0  ;;  %v5152_v18 = vpop.f32.mrf.mxu1  ;;  %v4869_v24 = vadd.f32 %v9706_v56, %v10379_v4 }
 0x4d4   :  { %v5502_v39 = vsel %vm5374_vm10, %v5150_v5, %v5438_v3  ;;  %v5153_v12 = vadd.f32 %v5152_v18, %v4864_v29 }
 0x4d5   :  { %v5950_v42 = vmul.f32 %v5673_v28, %v5502_v39  ;;  %v4993_v55 = vpop.f32.mrf.mxu0  ;;  %v5154_v30 = vpop.f32.mrf.mxu1  ;;  %v10381_v28 = vld [vmem:[#allocation13_spill] sm:$0xff] }
 0x4d6   :  { %vm5375_vm11 = vcmp.gt.f32.partialorder %v5153_v12, 0.0  ;;  %v5439_v36 = vmul.f32 0.2, %v5153_v12  ;;  %v4872_v39 = vadd.f32 %v9710_v10, %v10381_v28 }
 0x4d7   :  { %v6013_v44 = vadd.f32 %v6012_v19, %v5950_v42  ;;  %v9951_v1 = vpop.f32.mrf.mxu0  ;;  %v5157_v25 = vpop.f32.mrf.mxu1  ;;  %5348 = vmatmul.mubr.bf16.gmra.mxu1 %v6731_v9  ;;  %v6734_v9 = vld [vmem:[%s10108_s6 + $0x3e8] ss:$16 sps:$4 sm:$0xff]  }
 0x4d8   :  { %10380 = vst [vmem:[#allocation61_spill] sm:$0xff] %v9951_v1  ;;  %v5503_v5 = vsel %vm5375_vm11, %v5153_v12, %v5439_v36  ;;  %v5158_v40 = vadd.f32 %v5157_v25, %v4869_v24  ;;  %5355 = vmatprep.mubr.bf16.mxu1 %v6736_v26  ;;  %v5683_v42 = vpop.permute.xlu0 %5682  ;;  %v10383_v25 = vld [vmem:[#allocation12_spill] sm:$0xff] }
 0x4d9   :  { %v5951_v29 = vmul.f32 %v5678_v22, %v5503_v5  ;;  %v4998_v3 = vpop.f32.mrf.mxu0  ;;  %v5159_v18 = vpop.f32.mrf.mxu1  ;;  %v4877_v22 = vadd.f32 %v9723_v17, %v10383_v25 }
 0x4da   :  { %vm5376_vm12 = vcmp.gt.f32.partialorder %v5158_v40, 0.0  ;;  %v5440_v55 = vmul.f32 0.2, %v5158_v40  ;;  %v5688_v3 = vpop.permute.xlu1 %5687 }
 0x4db   :  { %v6014_v56 = vadd.f32 %v6013_v44, %v5951_v29  ;;  %v9955_v30 = vpop.f32.mrf.mxu0  ;;  %v5160_v19 = vpop.f32.mrf.mxu1 }
 0x4dc   :  { %10382 = vst [vmem:[#allocation42_spill] sm:$0xff] %v9955_v30  ;;  %v5504_v12 = vsel %vm5376_vm12, %v5158_v40, %v5440_v55  ;;  %v5161_v4 = vadd.f32 %v5160_v19, %v4872_v39  ;;  %v10384_v39 = vld [vmem:[#allocation51_spill] sm:$0xff] }
 0x4dd   :  { %v5952_v26 = vmul.f32 %v5683_v42, %v5504_v12  ;;  %v5001_v24 = vpop.f32.mrf.mxu0  ;;  %v5162_v36 = vpop.f32.mrf.mxu1  ;;  %v4880_v55 = vadd.f32 %v9729_v50, %v10384_v39 }
 0x4de   :  { %vm5377_vm13 = vcmp.gt.f32.partialorder %v5161_v4, 0.0  ;;  %v5441_v10 = vmul.f32 0.2, %v5161_v4 }
 0x4df   :  { %v6015_v5 = vadd.f32 %v6014_v56, %v5952_v26  ;;  %v9962_v44 = vpop.f32.mrf.mxu0  ;;  %v5165_v29 = vpop.f32.mrf.mxu1  ;;  %5356 = vmatmul.mubr.bf16.gmra.mxu1 %v6734_v9 }
 0x4e0   :  { %v5505_v18 = vsel %vm5377_vm13, %v5161_v4, %v5441_v10  ;;  %v5166_v28 = vadd.f32 %v5165_v29, %v4877_v22  ;;  %v5693_v56 = vpop.permute.xlu0 %5692  ;;  %v10385_v4 = vld [vmem:[#allocation50_spill] sm:$0xff] }
 0x4e1   :  { %v5953_v30 = vmul.f32 %v5688_v3, %v5505_v18  ;;  %v5006_v1 = vpop.f32.mrf.mxu0  ;;  %v5167_v40 = vpop.f32.mrf.mxu1  ;;  %v4885_v22 = vadd.f32 %v9739_v51, %v10385_v4 }
 0x4e2   :  { %vm5378_vm14 = vcmp.gt.f32.partialorder %v5166_v28, 0.0  ;;  %v5442_v19 = vmul.f32 0.2, %v5166_v28  ;;  %v5698_v3 = vpop.permute.xlu1 %5697 }
 0x4e3   :  { %v6016_v42 = vadd.f32 %v6015_v5, %v5953_v30  ;;  %v9966_v17 = vpop.f32.mrf.mxu0  ;;  %v5168_v12 = vpop.f32.mrf.mxu1 }
 0x4e4   :  { %v5506_v26 = vsel %vm5378_vm14, %v5166_v28, %v5442_v19  ;;  %v5169_v24 = vadd.f32 %v5168_v12, %v4880_v55  ;;  %v10386_v28 = vld [vmem:[#allocation33_spill] sm:$0xff] }
 0x4e5   :  { %v5954_v36 = vmul.f32 %v5693_v56, %v5506_v26  ;;  %v5009_v9 = vpop.f32.mrf.mxu0  ;;  %v5170_v25 = vpop.f32.mrf.mxu1  ;;  %v4888_v55 = vadd.f32 %v9743_v54, %v10386_v28 }
 0x4e6   :  { %vm5379_vm15 = vcmp.gt.f32.partialorder %v5169_v24, 0.0  ;;  %v5443_v1 = vmul.f32 0.2, %v5169_v24  ;;  %v5703_v26 = vpop.permute.xlu0 %5702 }
 0x4e7   :  { %v6017_v10 = vadd.f32 %v6016_v42, %v5954_v36  ;;  %v9970_v29 = vpop.f32.mrf.mxu0  ;;  %v5173_v50 = vpop.f32.mrf.mxu1 }
 0x4e8   :  { %v5507_v30 = vsel %vm5379_vm15, %v5169_v24, %v5443_v1  ;;  %v5174_v5 = vadd.f32 %v5173_v50, %v4885_v22  ;;  %v10387_v24 = vld [vmem:[#allocation31_spill] sm:$0xff] }
 0x4e9   :  { %v5955_v18 = vmul.f32 %v5698_v3, %v5507_v30  ;;  %v5014_v40 = vpop.f32.mrf.mxu0  ;;  %v5175_v39 = vpop.f32.mrf.mxu1  ;;  %v4893_v22 = vadd.f32 %v9755_v7, %v10387_v24 }
 0x4ea   :  { %vm5380_vm0 = vcmp.gt.f32.partialorder %v5174_v5, 0.0  ;;  %v5444_v19 = vmul.f32 0.2, %v5174_v5  ;;  %v5708_v30 = vpop.permute.xlu1 %5707 }
 0x4eb   :  { %v6018_v12 = vadd.f32 %v6017_v10, %v5955_v18  ;;  %v9974_v56 = vpop.f32.mrf.mxu0  ;;  %v5176_v51 = vpop.f32.mrf.mxu1 }
 0x4ec   :  { %v5508_v42 = vsel %vm5380_vm0, %v5174_v5, %v5444_v19  ;;  %v5177_v36 = vadd.f32 %v5176_v51, %v4888_v55  ;;  %v10388_v5 = vld [vmem:[#allocation11_spill] sm:$0xff] }
 0x4ed   :  { %v5956_v9 = vmul.f32 %v5703_v26, %v5508_v42  ;;  %v5017_v25 = vpop.f32.mrf.mxu0  ;;  %v5178_v4 = vpop.f32.mrf.mxu1  ;;  %v4896_v55 = vadd.f32 %v9759_v23, %v10388_v5 }
 0x4ee   :  { %vm5381_vm1 = vcmp.gt.f32.partialorder %v5177_v36, 0.0  ;;  %v5445_v1 = vmul.f32 0.2, %v5177_v36  ;;  %v5713_v42 = vpop.permute.xlu0 %5712 }
 0x4ef   :  { %v6019_v50 = vadd.f32 %v6018_v12, %v5956_v9  ;;  %v9978_v3 = vpop.f32.mrf.mxu0  ;;  %v5181_v54 = vpop.f32.mrf.mxu1 }
 0x4f0   :  { %v5509_v10 = vsel %vm5381_vm1, %v5177_v36, %v5445_v1  ;;  %v5182_v18 = vadd.f32 %v5181_v54, %v4893_v22  ;;  %v10389_v36 = vld [vmem:[#allocation48_spill] sm:$0xff] }
 0x4f1   :  { %v5957_v40 = vmul.f32 %v5708_v30, %v5509_v10  ;;  %v5022_v39 = vpop.f32.mrf.mxu0  ;;  %v5183_v28 = vpop.f32.mrf.mxu1  ;;  %v4901_v22 = vadd.f32 %v9769_v31, %v10389_v36 }
 0x4f2   :  { %vm5382_vm2 = vcmp.gt.f32.partialorder %v5182_v18, 0.0  ;;  %v5446_v19 = vmul.f32 0.2, %v5182_v18  ;;  %v5718_v10 = vpop.permute.xlu1 %5717 }
 0x4f3   :  { %v6020_v51 = vadd.f32 %v6019_v50, %v5957_v40  ;;  %v9982_v26 = vpop.f32.mrf.mxu0  ;;  %v5184_v7 = vpop.f32.mrf.mxu1 }
 0x4f4   :  { %v5510_v12 = vsel %vm5382_vm2, %v5182_v18, %v5446_v19  ;;  %v5185_v9 = vadd.f32 %v5184_v7, %v4896_v55  ;;  %v10390_v18 = vld [vmem:[#allocation32_spill] sm:$0xff] }
 0x4f5   :  { %v5958_v25 = vmul.f32 %v5713_v42, %v5510_v12  ;;  %v5025_v4 = vpop.f32.mrf.mxu0  ;;  %v5186_v24 = vpop.f32.mrf.mxu1  ;;  %v4904_v55 = vadd.f32 %v9775_v27, %v10390_v18 }
 0x4f6   :  { %vm5383_vm3 = vcmp.gt.f32.partialorder %v5185_v9, 0.0  ;;  %v5447_v1 = vmul.f32 0.2, %v5185_v9  ;;  %v5723_v12 = vpop.permute.xlu0 %5722 }
 0x4f7   :  { %v6021_v54 = vadd.f32 %v6020_v51, %v5958_v25  ;;  %v9986_v30 = vpop.f32.mrf.mxu0  ;;  %v5189_v23 = vpop.f32.mrf.mxu1 }
 0x4f8   :  { %v5511_v50 = vsel %vm5383_vm3, %v5185_v9, %v5447_v1  ;;  %v5190_v40 = vadd.f32 %v5189_v23, %v4901_v22  ;;  %v10391_v9 = vld [vmem:[#allocation49_spill] sm:$0xff] }
 0x4f9   :  { %v5959_v39 = vmul.f32 %v5718_v10, %v5511_v50  ;;  %v5030_v28 = vpop.f32.mrf.mxu0  ;;  %v5191_v5 = vpop.f32.mrf.mxu1  ;;  %v4909_v22 = vadd.f32 %v9785_v46, %v10391_v9 }
 0x4fa   :  { %vm5384_vm4 = vcmp.gt.f32.partialorder %v5190_v40, 0.0  ;;  %v5448_v19 = vmul.f32 0.2, %v5190_v40  ;;  %v5728_v50 = vpop.permute.xlu1 %5727 }
 0x4fb   :  { %v6022_v7 = vadd.f32 %v6021_v54, %v5959_v39  ;;  %v9990_v42 = vpop.f32.mrf.mxu0  ;;  %v5192_v31 = vpop.f32.mrf.mxu1 }
 0x4fc   :  { %v5512_v51 = vsel %vm5384_vm4, %v5190_v40, %v5448_v19  ;;  %v5193_v25 = vadd.f32 %v5192_v31, %v4904_v55  ;;  %v10392_v40 = vld [vmem:[#allocation9_spill] sm:$0xff] }
 0x4fd   :  { %v5960_v4 = vmul.f32 %v5723_v12, %v5512_v51  ;;  %v5033_v24 = vpop.f32.mrf.mxu0  ;;  %v5194_v36 = vpop.f32.mrf.mxu1  ;;  %v4912_v55 = vadd.f32 %v9789_v0, %v10392_v40 }
 0x4fe   :  { %vm5385_vm5 = vcmp.gt.f32.partialorder %v5193_v25, 0.0  ;;  %v5449_v1 = vmul.f32 0.2, %v5193_v25  ;;  %v5733_v51 = vpop.permute.xlu0 %5732 }
 0x4ff   :  { %v6023_v23 = vadd.f32 %v6022_v7, %v5960_v4  ;;  %v9994_v10 = vpop.f32.mrf.mxu0  ;;  %v5197_v27 = vpop.f32.mrf.mxu1 }
 0x500   :  { %v5513_v54 = vsel %vm5385_vm5, %v5193_v25, %v5449_v1  ;;  %v5198_v39 = vadd.f32 %v5197_v27, %v4909_v22  ;;  %v10393_v25 = vld [vmem:[#allocation68_spill] sm:$0xff] }
 0x501   :  { %v5961_v28 = vmul.f32 %v5728_v50, %v5513_v54  ;;  %v5038_v5 = vpop.f32.mrf.mxu0  ;;  %v5199_v18 = vpop.f32.mrf.mxu1  ;;  %v4917_v22 = vadd.f32 %v9801_v16, %v10393_v25 }
 0x502   :  { %vm5386_vm6 = vcmp.gt.f32.partialorder %v5198_v39, 0.0  ;;  %v5450_v19 = vmul.f32 0.2, %v5198_v39  ;;  %v5738_v54 = vpop.permute.xlu1 %5737 }
 0x503   :  { %v6024_v31 = vadd.f32 %v6023_v23, %v5961_v28  ;;  %v9998_v12 = vpop.f32.mrf.mxu0  ;;  %v5200_v46 = vpop.f32.mrf.mxu1 }
 0x504   :  { %v5514_v7 = vsel %vm5386_vm6, %v5198_v39, %v5450_v19  ;;  %v5201_v4 = vadd.f32 %v5200_v46, %v4912_v55  ;;  %v10394_v39 = vld [vmem:[#allocation10_spill] sm:$0xff] }
 0x505   :  { %v5962_v24 = vmul.f32 %v5733_v51, %v5514_v7  ;;  %v5041_v36 = vpop.f32.mrf.mxu0  ;;  %v5202_v9 = vpop.f32.mrf.mxu1  ;;  %v4920_v55 = vadd.f32 %v9805_v21, %v10394_v39 }
 0x506   :  { %vm5387_vm7 = vcmp.gt.f32.partialorder %v5201_v4, 0.0  ;;  %v5451_v1 = vmul.f32 0.2, %v5201_v4  ;;  %v5743_v7 = vpop.permute.xlu0 %5742 }
 0x507   :  { %v6025_v27 = vadd.f32 %v6024_v31, %v5962_v24  ;;  %v10002_v50 = vpop.f32.mrf.mxu0  ;;  %v5205_v0 = vpop.f32.mrf.mxu1 }
 0x508   :  { %v5515_v23 = vsel %vm5387_vm7, %v5201_v4, %v5451_v1  ;;  %v5206_v28 = vadd.f32 %v5205_v0, %v4917_v22  ;;  %v10395_v4 = vld [vmem:[#allocation30_spill] sm:$0xff] }
 0x509   :  { %v5963_v5 = vmul.f32 %v5738_v54, %v5515_v23  ;;  %v5046_v18 = vpop.f32.mrf.mxu0  ;;  %v5207_v40 = vpop.f32.mrf.mxu1  ;;  %v4925_v22 = vadd.f32 %v9815_v13, %v10395_v4 }
 0x50a   :  { %vm5388_vm8 = vcmp.gt.f32.partialorder %v5206_v28, 0.0  ;;  %v5452_v19 = vmul.f32 0.2, %v5206_v28  ;;  %v5748_v23 = vpop.permute.xlu1 %5747 }
 0x50b   :  { %v6026_v46 = vadd.f32 %v6025_v27, %v5963_v5  ;;  %v10006_v51 = vpop.f32.mrf.mxu0  ;;  %v5208_v16 = vpop.f32.mrf.mxu1 }
 0x50c   :  { %v5516_v31 = vsel %vm5388_vm8, %v5206_v28, %v5452_v19  ;;  %v5209_v24 = vadd.f32 %v5208_v16, %v4920_v55  ;;  %v10396_v28 = vld [vmem:[#allocation29_spill] sm:$0xff] }
 0x50d   :  { %v5964_v36 = vmul.f32 %v5743_v7, %v5516_v31  ;;  %v5049_v9 = vpop.f32.mrf.mxu0  ;;  %v5210_v25 = vpop.f32.mrf.mxu1  ;;  %v4928_v55 = vadd.f32 %v9821_v43, %v10396_v28 }
 0x50e   :  { %vm5389_vm9 = vcmp.gt.f32.partialorder %v5209_v24, 0.0  ;;  %v5453_v1 = vmul.f32 0.2, %v5209_v24  ;;  %v5753_v31 = vpop.permute.xlu0 %5752 }
 0x50f   :  { %v6027_v0 = vadd.f32 %v6026_v46, %v5964_v36  ;;  %v10010_v54 = vpop.f32.mrf.mxu0  ;;  %v5213_v21 = vpop.f32.mrf.mxu1 }
 0x510   :  { %v5517_v27 = vsel %vm5389_vm9, %v5209_v24, %v5453_v1  ;;  %v5214_v5 = vadd.f32 %v5213_v21, %v4925_v22  ;;  %v4933_v24 = vadd.f32 %v9831_v62, %v9129_v49 }
 0x511   :  { %v5965_v18 = vmul.f32 %v5748_v23, %v5517_v27  ;;  %v5054_v40 = vpop.f32.mrf.mxu0  ;;  %v5215_v39 = vpop.f32.mrf.mxu1 }
 0x512   :  { %vm5390_vm10 = vcmp.gt.f32.partialorder %v5214_v5, 0.0  ;;  %v5454_v19 = vmul.f32 0.2, %v5214_v5  ;;  %v5758_v23 = vpop.permute.xlu1 %5757  ;;  %v5763_v62 = vpop.permute.xlu0 %5762 }
 0x513   :  { %v6028_v16 = vadd.f32 %v6027_v0, %v5965_v18  ;;  %v10014_v7 = vpop.f32.mrf.mxu0  ;;  %v5216_v13 = vpop.f32.mrf.mxu1 }
 0x514   :  { %v5518_v46 = vsel %vm5390_vm10, %v5214_v5, %v5454_v19  ;;  %v5217_v36 = vadd.f32 %v5216_v13, %v4928_v55  ;;  %v10397_v5 = vld [vmem:[#allocation69_spill] sm:$0xff] }
 0x515   :  { %v5966_v9 = vmul.f32 %v5753_v31, %v5518_v46  ;;  %v5057_v25 = vpop.f32.mrf.mxu0  ;;  %v5218_v4 = vpop.f32.mrf.mxu1  ;;  %v4936_v28 = vadd.f32 %v9835_v2, %v10397_v5 }
 0x516   :  { %vm5391_vm11 = vcmp.gt.f32.partialorder %v5217_v36, 0.0  ;;  %v5455_v22 = vmul.f32 0.2, %v5217_v36 }
 0x517   :  { %v6029_v1 = vadd.f32 %v6028_v16, %v5966_v9  ;;  %v10018_v21 = vpop.f32.mrf.mxu0  ;;  %v5221_v43 = vpop.f32.mrf.mxu1 }
 0x518   :  { %v5519_v0 = vsel %vm5391_vm11, %v5217_v36, %v5455_v22  ;;  %v5222_v27 = vadd.f32 %v5221_v43, %v4933_v24  ;;  %v4941_v36 = vadd.f32 %v9847_v37, %v9664_v34  ;;  %v5768_v43 = vpop.permute.xlu1 %5767  ;;  %v5773_v37 = vpop.permute.xlu0 %5772 }
 0x519   :  { %v5967_v18 = vmul.f32 %v5758_v23, %v5519_v0  ;;  %v5062_v40 = vpop.f32.mrf.mxu0  ;;  %v5223_v39 = vpop.f32.mrf.mxu1 }
 0x51a   :  { %vm5392_vm12 = vcmp.gt.f32.partialorder %v5222_v27, 0.0  ;;  %v5456_v55 = vmul.f32 0.2, %v5222_v27 }
 0x51b   :  { %v6030_v19 = vadd.f32 %v6029_v1, %v5967_v18  ;;  %v10022_v13 = vpop.f32.mrf.mxu0  ;;  %v5224_v49 = vpop.f32.mrf.mxu1 }
 0x51c   :  { %v5520_v16 = vsel %vm5392_vm12, %v5222_v27, %v5456_v55  ;;  %v5225_v31 = vadd.f32 %v5224_v49, %v4936_v28  ;;  %v4944_v27 = vadd.f32 %v9851_v45, %v9666_v41  ;;  %v5778_v41 = vpop.permute.xlu1 %5777 }
 0x51d   :  { %v5968_v46 = vmul.f32 %v5763_v62, %v5520_v16  ;;  %v5065_v9 = vpop.f32.mrf.mxu0  ;;  %v5226_v25 = vpop.f32.mrf.mxu1 }
 0x51e   :  { %vm5393_vm13 = vcmp.gt.f32.partialorder %v5225_v31, 0.0  ;;  %v5457_v4 = vmul.f32 0.2, %v5225_v31 }
 0x51f   :  { %v6031_v24 = vadd.f32 %v6030_v19, %v5968_v46  ;;  %v10026_v22 = vpop.f32.mrf.mxu0  ;;  %v5229_v2 = vpop.f32.mrf.mxu1 }
 0x520   :  { %v5521_v1 = vsel %vm5393_vm13, %v5225_v31, %v5457_v4  ;;  %v5230_v23 = vadd.f32 %v5229_v2, %v4941_v36  ;;  %v4949_v31 = vadd.f32 %v9863_v63, %v9682_v60  ;;  %v4952_v2 = vadd.f32 %v9871_v38, %v9686_v8 }
 0x521   :  { %v5969_v0 = vmul.f32 %v5768_v43, %v5521_v1  ;;  %v5070_v18 = vpop.f32.mrf.mxu0  ;;  %v5231_v40 = vpop.f32.mrf.mxu1 }
 0x522   :  { %vm5394_vm14 = vcmp.gt.f32.partialorder %v5230_v23, 0.0  ;;  %v5458_v39 = vmul.f32 0.2, %v5230_v23 }
 0x523   :  { %v6032_v5 = vadd.f32 %v6031_v24, %v5969_v0  ;;  %v10030_v28 = vpop.f32.mrf.mxu0  ;;  %v5232_v34 = vpop.f32.mrf.mxu1 }
 0x524   :  { %v5522_v55 = vsel %vm5394_vm14, %v5230_v23, %v5458_v39  ;;  %v5233_v19 = vadd.f32 %v5232_v34, %v4944_v27  ;;  %v5783_v0 = vpop.permute.xlu0 %5782  ;;  %v4957_v27 = vadd.f32 %v9881_v57, %v9696_v58 }
 0x525   :  { %v5970_v49 = vmul.f32 %v5773_v37, %v5522_v55  ;;  %v5234_v62 = vpop.f32.mrf.mxu1  ;;  %v5073_v16 = vpop.f32.mrf.mxu0 }
 0x526   :  { %vm5395_vm15 = vcmp.gt.f32.partialorder %v5233_v19, 0.0  ;;  %v5459_v46 = vmul.f32 0.2, %v5233_v19  ;;  %v5788_v37 = vpop.permute.xlu1 %5787 }
 0x527   :  { %v6033_v9 = vadd.f32 %v6032_v5, %v5970_v49  ;;  %v5237_v25 = vpop.f32.mrf.mxu1  ;;  %v4960_v49 = vadd.f32 %v9885_v20, %v9704_v15 }
 0x528   :  { %v5523_v45 = vsel %vm5395_vm15, %v5233_v19, %v5459_v46  ;;  %v5238_v36 = vadd.f32 %v5237_v25, %v4949_v31  ;;  %v5793_v46 = vpop.permute.xlu0 %5792 }
 0x529   :  { %v5971_v4 = vmul.f32 %v5778_v41, %v5523_v45  ;;  %v5239_v24 = vpop.f32.mrf.mxu1  ;;  %v4965_v41 = vadd.f32 %v9895_v32, %v9708_v33 }
 0x52a   :  { %vm5396_vm0 = vcmp.gt.f32.partialorder %v5238_v36, 0.0  ;;  %v5460_v43 = vmul.f32 0.2, %v5238_v36  ;;  %v5798_v24 = vpop.permute.xlu1 %5797 }
 0x52b   :  { %v6034_v1 = vadd.f32 %v6033_v9, %v5971_v4  ;;  %v5240_v23 = vpop.f32.mrf.mxu1 }
 0x52c   :  { %v5524_v18 = vsel %vm5396_vm0, %v5238_v36, %v5460_v43  ;;  %v5241_v40 = vadd.f32 %v5240_v23, %v4952_v2 }
 0x52d   :  { %v5972_v60 = vmul.f32 %v5783_v0, %v5524_v18  ;;  %v5242_v63 = vpop.f32.mrf.mxu1 }
 0x52e   :  { %vm5397_vm1 = vcmp.gt.f32.partialorder %v5241_v40, 0.0  ;;  %v5461_v39 = vmul.f32 0.2, %v5241_v40 }
 0x52f   :  { %v6035_v5 = vadd.f32 %v6034_v1, %v5972_v60  ;;  %v5245_v34 = vpop.f32.mrf.mxu1  ;;  %v4968_v1 = vadd.f32 %v9899_v61, %v9718_v35 }
 0x530   :  { %v5525_v55 = vsel %vm5397_vm1, %v5241_v40, %v5461_v39  ;;  %v5246_v19 = vadd.f32 %v5245_v34, %v4957_v27  ;;  %v5803_v40 = vpop.permute.xlu0 %5802  ;;  %v4973_v27 = vadd.f32 %v9909_v48, %v9725_v14 }
 0x531   :  { %v5973_v8 = vmul.f32 %v5788_v37, %v5525_v55  ;;  %v5247_v38 = vpop.f32.mrf.mxu1  ;;  %v5808_v37 = vpop.permute.xlu1 %5807 }
 0x532   :  { %vm5398_vm2 = vcmp.gt.f32.partialorder %v5246_v19, 0.0  ;;  %v5462_v62 = vmul.f32 0.2, %v5246_v19 }
 0x533   :  { %v6036_v16 = vadd.f32 %v6035_v5, %v5973_v8  ;;  %v5248_v31 = vpop.f32.mrf.mxu1  ;;  %v4976_v8 = vadd.f32 %v9913_v52, %v9727_v11 }
 0x534   :  { %v5526_v9 = vsel %vm5398_vm2, %v5246_v19, %v5462_v62  ;;  %v5249_v25 = vadd.f32 %v5248_v31, %v4960_v49 }
 0x535   :  { %v5974_v58 = vmul.f32 %v5793_v46, %v5526_v9  ;;  %v5250_v57 = vpop.f32.mrf.mxu1  ;;  %v10398_v9 = vld [vmem:[#allocation7_spill] sm:$0xff] }
 0x536   :  { %vm5399_vm3 = vcmp.gt.f32.partialorder %v5249_v25, 0.0  ;;  %v5463_v45 = vmul.f32 0.2, %v5249_v25 }
 0x537   :  { %v6037_v36 = vadd.f32 %v6036_v16, %v5974_v58  ;;  %v5253_v4 = vpop.f32.mrf.mxu1  ;;  %v5813_v16 = vpop.permute.xlu0 %5812 }
 0x538   :  { %v5527_v2 = vsel %vm5399_vm3, %v5249_v25, %v5463_v45  ;;  %v5254_v43 = vadd.f32 %v5253_v4, %v4965_v41  ;;  %v4981_v25 = vadd.f32 %v9923_v53, %v10398_v9  ;;  %v5818_v45 = vpop.permute.xlu1 %5817 }
 0x539   :  { %v5975_v15 = vmul.f32 %v5798_v24, %v5527_v2  ;;  %v5255_v20 = vpop.f32.mrf.mxu1  ;;  %v10399_v24 = vld [vmem:[#allocation28_spill] sm:$0xff] }
 0x53a   :  { %vm5400_vm4 = vcmp.gt.f32.partialorder %v5254_v43, 0.0  ;;  %v5464_v23 = vmul.f32 0.2, %v5254_v43  ;;  %v4984_v2 = vadd.f32 %v9927_v6, %v10399_v24 }
 0x53b   :  { %v6038_v0 = vadd.f32 %v6037_v36, %v5975_v15  ;;  %v5256_v18 = vpop.f32.mrf.mxu1 }
 0x53c   :  { %v5528_v60 = vsel %vm5400_vm4, %v5254_v43, %v5464_v23  ;;  %v5257_v63 = vadd.f32 %v5256_v18, %v4968_v1  ;;  %v5823_v1 = vpop.permute.xlu0 %5822 }
 0x53d   :  { %v5976_v33 = vmul.f32 %v5803_v40, %v5528_v60  ;;  %v5258_v32 = vpop.f32.mrf.mxu1  ;;  %v10400_v40 = vld [vmem:[#allocation46_spill] sm:$0xff] }
 0x53e   :  { %vm5401_vm5 = vcmp.gt.f32.partialorder %v5257_v63, 0.0  ;;  %v5465_v39 = vmul.f32 0.2, %v5257_v63  ;;  %v4989_v60 = vadd.f32 %v9937_v47, %v10400_v40 }
 0x53f   :  { %v6039_v5 = vadd.f32 %v6038_v0, %v5976_v33  ;;  %v5261_v34 = vpop.f32.mrf.mxu1 }
 0x540   :  { %v5529_v55 = vsel %vm5401_vm5, %v5257_v63, %v5465_v39  ;;  %v5262_v19 = vadd.f32 %v5261_v34, %v4973_v27  ;;  %v5828_v27 = vpop.permute.xlu1 %5827 }
 0x541   :  { %v5977_v35 = vmul.f32 %v5808_v37, %v5529_v55  ;;  %v5263_v61 = vpop.f32.mrf.mxu1  ;;  %v10401_v37 = vld [vmem:[#allocation67_spill] sm:$0xff] }
 0x542   :  { %vm5402_vm6 = vcmp.gt.f32.partialorder %v5262_v19, 0.0  ;;  %v5466_v38 = vmul.f32 0.2, %v5262_v19  ;;  %v4992_v55 = vadd.f32 %v9941_v59, %v10401_v37 }
 0x543   :  { %v6040_v49 = vadd.f32 %v6039_v5, %v5977_v35  ;;  %v5264_v62 = vpop.f32.mrf.mxu1 }
 0x544   :  { %v5530_v31 = vsel %vm5402_vm6, %v5262_v19, %v5466_v38  ;;  %v5265_v46 = vadd.f32 %v5264_v62, %v4976_v8  ;;  %v5833_v8 = vpop.permute.xlu0 %5832 }
 0x545   :  { %v5978_v14 = vmul.f32 %v5813_v16, %v5530_v31  ;;  %v5266_v48 = vpop.f32.mrf.mxu1  ;;  %v10402_v16 = vld [vmem:[#allocation6_spill] sm:$0xff]  ;;  %v10403_v31 = vld [vmem:[#allocation61_spill] sm:$0xff] }
 0x546   :  { %vm5403_vm7 = vcmp.gt.f32.partialorder %v5265_v46, 0.0  ;;  %v5467_v58 = vmul.f32 0.2, %v5265_v46 }
 0x547   :  { %v6041_v57 = vadd.f32 %v6040_v49, %v5978_v14  ;;  %v5269_v41 = vpop.f32.mrf.mxu1 }
 0x548   :  { %v5531_v36 = vsel %vm5403_vm7, %v5265_v46, %v5467_v58  ;;  %v5270_v4 = vadd.f32 %v5269_v41, %v4981_v25  ;;  %v4997_v46 = vadd.f32 %v10403_v31, %v10402_v16  ;;  %v5838_v25 = vpop.permute.xlu1 %5837 }
 0x549   :  { %v5979_v11 = vmul.f32 %v5818_v45, %v5531_v36  ;;  %v5271_v52 = vpop.f32.mrf.mxu1  ;;  %v10404_v45 = vld [vmem:[#allocation47_spill] sm:$0xff]  ;;  %v10405_v36 = vld [vmem:[#allocation42_spill] sm:$0xff] }
 0x54a   :  { %vm5404_vm8 = vcmp.gt.f32.partialorder %v5270_v4, 0.0  ;;  %v5468_v43 = vmul.f32 0.2, %v5270_v4 }
 0x54b   :  { %v6042_v15 = vadd.f32 %v6041_v57, %v5979_v11  ;;  %v5272_v20 = vpop.f32.mrf.mxu1 }
 0x54c   :  { %v5532_v23 = vsel %vm5404_vm8, %v5270_v4, %v5468_v43  ;;  %v5273_v0 = vadd.f32 %v5272_v20, %v4984_v2  ;;  %v5000_v4 = vadd.f32 %v10405_v36, %v10404_v45  ;;  %v5843_v2 = vpop.permute.xlu0 %5842 }
 0x54d   :  { %v5980_v53 = vmul.f32 %v5823_v1, %v5532_v23  ;;  %v5274_v18 = vpop.f32.mrf.mxu1  ;;  %v10406_v23 = vld [vmem:[#allocation66_spill] sm:$0xff] }
 0x54e   :  { %vm5405_vm9 = vcmp.gt.f32.partialorder %v5273_v0, 0.0  ;;  %v5469_v63 = vmul.f32 0.2, %v5273_v0 }
 0x54f   :  { %v6043_v33 = vadd.f32 %v6042_v15, %v5980_v53  ;;  %v5277_v32 = vpop.f32.mrf.mxu1 }
 0x550   :  { %v5533_v39 = vsel %vm5405_vm9, %v5273_v0, %v5469_v63  ;;  %v5278_v5 = vadd.f32 %v5277_v32, %v4989_v60  ;;  %v5005_v0 = vadd.f32 %v9962_v44, %v10406_v23  ;;  %v5848_v60 = vpop.permute.xlu1 %5847  ;;  %v10411_v23 = vld [vmem:[#allocation24_spill] sm:$0xff] }
 0x551   :  { %v5981_v6 = vmul.f32 %v5828_v27, %v5533_v39  ;;  %v5279_v34 = vpop.f32.mrf.mxu1  ;;  %v10407_v39 = vld [vmem:[#allocation45_spill] sm:$0xff] }
 0x552   :  { %vm5406_vm10 = vcmp.gt.f32.partialorder %v5278_v5, 0.0  ;;  %v5470_v19 = vmul.f32 0.2, %v5278_v5 }
 0x553   :  { %v6044_v35 = vadd.f32 %v6043_v33, %v5981_v6  ;;  %v5280_v61 = vpop.f32.mrf.mxu1 }
 0x554   :  { %v5534_v38 = vsel %vm5406_vm10, %v5278_v5, %v5470_v19  ;;  %v5281_v49 = vadd.f32 %v5280_v61, %v4992_v55  ;;  %v5008_v5 = vadd.f32 %v9966_v17, %v10407_v39  ;;  %v5853_v55 = vpop.permute.xlu0 %5852  ;;  %v5858_v16 = vpop.permute.xlu1 %5857 }
 0x555   :  { %v5982_v47 = vmul.f32 %v5833_v8, %v5534_v38  ;;  %v5282_v62 = vpop.f32.mrf.mxu1  ;;  %v10408_v8 = vld [vmem:[#allocation26_spill] sm:$0xff] }
 0x556   :  { %vm5407_vm11 = vcmp.gt.f32.partialorder %v5281_v49, 0.0  ;;  %v5471_v14 = vmul.f32 0.2, %v5281_v49  ;;  %v5013_v38 = vadd.f32 %v9970_v29, %v10408_v8 }
 0x557   :  { %v6045_v48 = vadd.f32 %v6044_v35, %v5982_v47  ;;  %v5285_v9 = vpop.f32.mrf.mxu1 }
 0x558   :  { %v5535_v58 = vsel %vm5407_vm11, %v5281_v49, %v5471_v14  ;;  %v5286_v57 = vadd.f32 %v5285_v9, %v4997_v46 }
 0x559   :  { %v5983_v59 = vmul.f32 %v5838_v25, %v5535_v58  ;;  %v5287_v41 = vpop.f32.mrf.mxu1 }
 0x55a   :  { %vm5408_vm12 = vcmp.gt.f32.partialorder %v5286_v57, 0.0  ;;  %v5472_v11 = vmul.f32 0.2, %v5286_v57 }
 0x55b   :  { %v6046_v52 = vadd.f32 %v6045_v48, %v5983_v59  ;;  %v5288_v24 = vpop.f32.mrf.mxu1  ;;  %v10409_v48 = vld [vmem:[#allocation62_spill] sm:$0xff]  ;;  %v5863_v59 = vpop.permute.xlu0 %5862 }
 0x55c   :  { %v5536_v43 = vsel %vm5408_vm12, %v5286_v57, %v5472_v11  ;;  %v5289_v15 = vadd.f32 %v5288_v24, %v5000_v4  ;;  %v5016_v9 = vadd.f32 %v9974_v56, %v10409_v48  ;;  %v10410_v4 = vld [vmem:[#allocation64_spill] sm:$0xff] }
 0x55d   :  { %v5984_v20 = vmul.f32 %v5843_v2, %v5536_v43  ;;  %v5290_v1 = vpop.f32.mrf.mxu1  ;;  %v5021_v11 = vadd.f32 %v9978_v3, %v10410_v4  ;;  %v5868_v43 = vpop.permute.xlu1 %5867 }
 0x55e   :  { %vm5409_vm13 = vcmp.gt.f32.partialorder %v5289_v15, 0.0  ;;  %v5473_v53 = vmul.f32 0.2, %v5289_v15 }
 0x55f   :  { %v6047_v18 = vadd.f32 %v6046_v52, %v5984_v20  ;;  %v5293_v40 = vpop.f32.mrf.mxu1 }
 0x560   :  { %v5537_v63 = vsel %vm5409_vm13, %v5289_v15, %v5473_v53  ;;  %v5294_v33 = vadd.f32 %v5293_v40, %v5005_v0  ;;  %v5024_v0 = vadd.f32 %v9982_v26, %v10411_v23 }
 0x561   :  { %v5985_v32 = vmul.f32 %v5848_v60, %v5537_v63  ;;  %v5295_v27 = vpop.f32.mrf.mxu1  ;;  %v5873_v60 = vpop.permute.xlu0 %5872 }
 0x562   :  { %vm5410_vm14 = vcmp.gt.f32.partialorder %v5294_v33, 0.0  ;;  %v5474_v6 = vmul.f32 0.2, %v5294_v33  ;;  %v10412_v27 = vld [vmem:[#allocation44_spill] sm:$0xff] }
 0x563   :  { %v6048_v34 = vadd.f32 %v6047_v18, %v5985_v32  ;;  %v5296_v37 = vpop.f32.mrf.mxu1  ;;  %v5029_v39 = vadd.f32 %v9986_v30, %v10412_v27 }
 0x564   :  { %v5538_v19 = vsel %vm5410_vm14, %v5294_v33, %v5474_v6  ;;  %v5297_v35 = vadd.f32 %v5296_v37, %v5008_v5  ;;  %v5878_v37 = vpop.permute.xlu1 %5877 }
 0x565   :  { %v5986_v44 = vmul.f32 %v5853_v55, %v5538_v19  ;;  %v5298_v61 = vpop.f32.mrf.mxu1 }
 0x566   :  { %vm5411_vm15 = vcmp.gt.f32.partialorder %v5297_v35, 0.0  ;;  %v5475_v49 = vmul.f32 0.2, %v5297_v35 }
 0x567   :  { %v6049_v47 = vadd.f32 %v6048_v34, %v5986_v44  ;;  %v5301_v62 = vpop.f32.mrf.mxu1  ;;  %v10413_v44 = vld [vmem:[#allocation25_spill] sm:$0xff] }
 0x568   :  { %v5539_v31 = vsel %vm5411_vm15, %v5297_v35, %v5475_v49  ;;  %v5302_v46 = vadd.f32 %v5301_v62, %v5013_v38  ;;  %v5032_v61 = vadd.f32 %v9990_v42, %v10413_v44 }
 0x569   :  { %v5987_v17 = vmul.f32 %v5858_v16, %v5539_v31  ;;  %v5303_v14 = vpop.f32.mrf.mxu1 }
 0x56a   :  { %vm5412_vm0 = vcmp.gt.f32.partialorder %v5302_v46, 0.0  ;;  %v5476_v25 = vmul.f32 0.2, %v5302_v46 }
 0x56b   :  { %v6050_v58 = vadd.f32 %v6049_v47, %v5987_v17  ;;  %v5304_v57 = vpop.f32.mrf.mxu1  ;;  %v5883_v47 = vpop.permute.xlu0 %5882 }
 0x56c   :  { %v5540_v41 = vsel %vm5412_vm0, %v5302_v46, %v5476_v25  ;;  %v5305_v45 = vadd.f32 %v5304_v57, %v5016_v9  ;;  %v10414_v46 = vld [vmem:[#allocation22_spill] sm:$0xff]  ;;  %v5888_v25 = vpop.permute.xlu1 %5887 }
 0x56d   :  { %v5988_v29 = vmul.f32 %v5863_v59, %v5540_v41  ;;  %v5306_v36 = vpop.f32.mrf.mxu1  ;;  %v5037_v17 = vadd.f32 %v9994_v10, %v10414_v46  ;;  %v10415_v41 = vld [vmem:[#allocation8_spill] sm:$0xff] }
 0x56e   :  { %vm5413_vm1 = vcmp.gt.f32.partialorder %v5305_v45, 0.0  ;;  %v5477_v52 = vmul.f32 0.2, %v5305_v45 }
 0x56f   :  { %v6051_v24 = vadd.f32 %v6050_v58, %v5988_v29  ;;  %v5309_v2 = vpop.f32.mrf.mxu1 }
 0x570   :  { %v5541_v15 = vsel %vm5413_vm1, %v5305_v45, %v5477_v52  ;;  %v5310_v20 = vadd.f32 %v5309_v2, %v5021_v11  ;;  %v5040_v45 = vadd.f32 %v9998_v12, %v10415_v41  ;;  %v5893_v11 = vpop.permute.xlu0 %5892  ;;  %v5898_v23 = vpop.permute.xlu1 %5897  ;;  %v10421_v41 = vld [vmem:[#allocation27_spill] sm:$0xff] }
 0x571   :  { %v5989_v56 = vmul.f32 %v5868_v43, %v5541_v15  ;;  %v5311_v1 = vpop.f32.mrf.mxu1  ;;  %v10416_v43 = vld [vmem:[#allocation23_spill] sm:$0xff] }
 0x572   :  { %vm5414_vm2 = vcmp.gt.f32.partialorder %v5310_v20, 0.0  ;;  %v5478_v53 = vmul.f32 0.2, %v5310_v20  ;;  %v5045_v15 = vadd.f32 %v10002_v50, %v10416_v43 }
 0x573   :  { %v6052_v18 = vadd.f32 %v6051_v24, %v5989_v56  ;;  %v5312_v40 = vpop.f32.mrf.mxu1 }
 0x574   :  { %v5542_v63 = vsel %vm5414_vm2, %v5310_v20, %v5478_v53  ;;  %v5313_v33 = vadd.f32 %v5312_v40, %v5024_v0  ;;  %v10417_v40 = vld [vmem:[#allocation63_spill] sm:$0xff] }
 0x575   :  { %v5990_v3 = vmul.f32 %v5873_v60, %v5542_v63  ;;  %v5314_v32 = vpop.f32.mrf.mxu1  ;;  %v5048_v60 = vadd.f32 %v10006_v51, %v10417_v40 }
 0x576   :  { %vm5415_vm3 = vcmp.gt.f32.partialorder %v5313_v33, 0.0  ;;  %v5479_v5 = vmul.f32 0.2, %v5313_v33  ;;  %v5903_v32 = vpop.permute.xlu0 %5902 }
 0x577   :  { %v6053_v6 = vadd.f32 %v6052_v18, %v5990_v3  ;;  %v5317_v34 = vpop.f32.mrf.mxu1 }
 0x578   :  { %v5543_v55 = vsel %vm5415_vm3, %v5313_v33, %v5479_v5  ;;  %v5318_v19 = vadd.f32 %v5317_v34, %v5029_v39 }
 0x579   :  { %v5991_v26 = vmul.f32 %v5878_v37, %v5543_v55  ;;  %v5319_v35 = vpop.f32.mrf.mxu1 }
 0x57a   :  { %vm5416_vm4 = vcmp.gt.f32.partialorder %v5318_v19, 0.0  ;;  %v5480_v8 = vmul.f32 0.2, %v5318_v19 }
 0x57b   :  { %v6054_v38 = vadd.f32 %v6053_v6, %v5991_v26  ;;  %v5320_v49 = vpop.f32.mrf.mxu1  ;;  %v10418_v6 = vld [vmem:[#allocation39_spill] sm:$0xff]  ;;  %v5908_v26 = vpop.permute.xlu1 %5907 }
 0x57c   :  { %v5544_v62 = vsel %vm5416_vm4, %v5318_v19, %v5480_v8  ;;  %v5321_v16 = vadd.f32 %v5320_v49, %v5032_v61  ;;  %v5053_v34 = vadd.f32 %v10010_v54, %v10418_v6  ;;  %v10419_v8 = vld [vmem:[#allocation65_spill] sm:$0xff] }
 0x57d   :  { %v5992_v30 = vmul.f32 %v5883_v47, %v5544_v62  ;;  %v5322_v31 = vpop.f32.mrf.mxu1 }
 0x57e   :  { %vm5417_vm5 = vcmp.gt.f32.partialorder %v5321_v16, 0.0  ;;  %v5481_v14 = vmul.f32 0.2, %v5321_v16 }
 0x57f   :  { %v6055_v48 = vadd.f32 %v6054_v38, %v5992_v30  ;;  %v5325_v9 = vpop.f32.mrf.mxu1  ;;  %v5056_v38 = vadd.f32 %v10014_v7, %v10419_v8 }
 0x580   :  { %v5545_v58 = vsel %vm5417_vm5, %v5321_v16, %v5481_v14  ;;  %v5326_v57 = vadd.f32 %v5325_v9, %v5037_v17  ;;  %v5913_v16 = vpop.permute.xlu0 %5912  ;;  %v10420_v17 = vld [vmem:[#allocation57_spill] sm:$0xff] }
 0x581   :  { %v5993_v42 = vmul.f32 %v5888_v25, %v5545_v58  ;;  %v5327_v59 = vpop.f32.mrf.mxu1  ;;  %v5061_v14 = vadd.f32 %v10018_v21, %v10420_v17  ;;  %v5918_v58 = vpop.permute.xlu1 %5917 }
 0x582   :  { %vm5418_vm6 = vcmp.gt.f32.partialorder %v5326_v57, 0.0  ;;  %v5482_v29 = vmul.f32 0.2, %v5326_v57 }
 0x583   :  { %v6056_v36 = vadd.f32 %v6055_v48, %v5993_v42  ;;  %v5328_v4 = vpop.f32.mrf.mxu1 }
 0x584   :  { %v5546_v52 = vsel %vm5418_vm6, %v5326_v57, %v5482_v29  ;;  %v5329_v24 = vadd.f32 %v5328_v4, %v5040_v45  ;;  %v5064_v45 = vadd.f32 %v10022_v13, %v10421_v41 }
 0x585   :  { %v5994_v10 = vmul.f32 %v5893_v11, %v5546_v52  ;;  %v5330_v2 = vpop.f32.mrf.mxu1  ;;  %v5923_v11 = vpop.permute.xlu0 %5922 }
 0x586   :  { %vm5419_vm7 = vcmp.gt.f32.partialorder %v5329_v24, 0.0  ;;  %v5483_v20 = vmul.f32 0.2, %v5329_v24  ;;  %v10422_v2 = vld [vmem:[#allocation56_spill] sm:$0xff] }
 0x587   :  { %v6057_v56 = vadd.f32 %v6056_v36, %v5994_v10  ;;  %v5333_v1 = vpop.f32.mrf.mxu1  ;;  %v5069_v43 = vadd.f32 %v10026_v22, %v10422_v2 }
 0x588   :  { %v5547_v0 = vsel %vm5419_vm7, %v5329_v24, %v5483_v20  ;;  %v5334_v53 = vadd.f32 %v5333_v1, %v5045_v15  ;;  %v5928_v1 = vpop.permute.xlu1 %5927 }
 0x589   :  { %v5995_v12 = vmul.f32 %v5898_v23, %v5547_v0  ;;  %v5335_v18 = vpop.f32.mrf.mxu1 }
 0x58a   :  { %vm5420_vm8 = vcmp.gt.f32.partialorder %v5334_v53, 0.0  ;;  %v5484_v63 = vmul.f32 0.2, %v5334_v53 }
 0x58b   :  { %v6058_v33 = vadd.f32 %v6057_v56, %v5995_v12  ;;  %v5336_v3 = vpop.f32.mrf.mxu1  ;;  %v10423_v12 = vld [vmem:[#allocation19_spill] sm:$0xff] }
 0x58c   :  { %v5548_v27 = vsel %vm5420_vm8, %v5334_v53, %v5484_v63  ;;  %v5337_v39 = vadd.f32 %v5336_v3, %v5048_v60  ;;  %v5072_v18 = vadd.f32 %v10030_v28, %v10423_v12 }
 0x58d   :  { %v5996_v50 = vmul.f32 %v5903_v32, %v5548_v27  ;;  %v5338_v5 = vpop.f32.mrf.mxu1 }
 0x58e   :  { %vm5421_vm9 = vcmp.gt.f32.partialorder %v5337_v39, 0.0  ;;  %v5485_v37 = vmul.f32 0.2, %v5337_v39  ;;  %v5938_v5 = vpop.permute.xlu1 %5937 }
 0x58f   :  { %v6059_v55 = vadd.f32 %v6058_v33, %v5996_v50  ;;  %v5341_v19 = vpop.f32.mrf.mxu1  ;;  %v5933_v33 = vpop.permute.xlu0 %5932 }
 0x590   :  { %v5549_v35 = vsel %vm5421_vm9, %v5337_v39, %v5485_v37  ;;  %v5342_v44 = vadd.f32 %v5341_v19, %v5053_v34 }
 0x591   :  { %v5997_v51 = vmul.f32 %v5908_v26, %v5549_v35  ;;  %v5343_v61 = vpop.f32.mrf.mxu1 }
 0x592   :  { %vm5422_vm10 = vcmp.gt.f32.partialorder %v5342_v44, 0.0  ;;  %v5486_v49 = vmul.f32 0.2, %v5342_v44 }
 0x593   :  { %v6060_v47 = vadd.f32 %v6059_v55, %v5997_v51  ;;  %v5344_v62 = vpop.f32.mrf.mxu1 }
 0x594   :  { %v5550_v30 = vsel %vm5422_vm10, %v5342_v44, %v5486_v49  ;;  %v5345_v31 = vadd.f32 %v5344_v62, %v5056_v38  ;;  %v6074_v44 = vstv %s10111_s9 }
 0x595   :  { %v5998_v54 = vmul.f32 %v5913_v16, %v5550_v30  ;;  %v5346_v46 = vpop.f32.mrf.mxu1 }
 0x596   :  { %vm5423_vm11 = vcmp.gt.f32.partialorder %v5345_v31, 0.0  ;;  %v5487_v48 = vmul.f32 0.2, %v5345_v31 }
 0x597   :  { %v6061_v9 = vadd.f32 %v6060_v47, %v5998_v54  ;;  %v5349_v25 = vpop.f32.mrf.mxu1 }
 0x598   :  { %v5551_v57 = vsel %vm5423_vm11, %v5345_v31, %v5487_v48  ;;  %v5350_v42 = vadd.f32 %v5349_v25, %v5061_v14 }
 0x599   :  { %v5999_v7 = vmul.f32 %v5918_v58, %v5551_v57  ;;  %v5351_v59 = vpop.f32.mrf.mxu1 }
 0x59a   :  { %vm5424_vm12 = vcmp.gt.f32.partialorder %v5350_v42, 0.0  ;;  %v5488_v29 = vmul.f32 0.2, %v5350_v42 }
 0x59b   :  { %v6062_v36 = vadd.f32 %v6061_v9, %v5999_v7  ;;  %v5352_v4 = vpop.f32.mrf.mxu1 }
 0x59c   :  { %v5552_v52 = vsel %vm5424_vm12, %v5350_v42, %v5488_v29  ;;  %v5353_v24 = vadd.f32 %v5352_v4, %v5064_v45 }
 0x59d   :  { %v6000_v21 = vmul.f32 %v5923_v11, %v5552_v52  ;;  %v5354_v10 = vpop.f32.mrf.mxu1 }
 0x59e   :  { %vm5425_vm13 = vcmp.gt.f32.partialorder %v5353_v24, 0.0  ;;  %v5489_v15 = vmul.f32 0.2, %v5353_v24 }
 0x59f   :  { %v6063_v20 = vadd.f32 %v6062_v36, %v6000_v21  ;;  %v5357_v56 = vpop.f32.mrf.mxu1 }
 0x5a0   :  { %v5553_v23 = vsel %vm5425_vm13, %v5353_v24, %v5489_v15  ;;  %v5358_v0 = vadd.f32 %v5357_v56, %v5069_v43 }
 0x5a1   :  { %v6001_v13 = vmul.f32 %v5928_v1, %v5553_v23  ;;  %v5359_v53 = vpop.f32.mrf.mxu1 }
 0x5a2   :  { %vm5426_vm14 = vcmp.gt.f32.partialorder %v5358_v0, 0.0  ;;  %v5490_v40 = vmul.f32 0.2, %v5358_v0 }
 0x5a3   :  { %v6064_v60 = vadd.f32 %v6063_v20, %v6001_v13  ;;  %v5360_v63 = vpop.f32.mrf.mxu1 }
 0x5a4   :  { %v5554_v3 = vsel %vm5426_vm14, %v5358_v0, %v5490_v40  ;;  %v5361_v32 = vadd.f32 %v5360_v63, %v5072_v18 }
 0x5a5   :  { %v6002_v22 = vmul.f32 %v5933_v33, %v5554_v3  ;;  %v5362_v27 = vpop.f32.mrf.mxu1 }
 0x5a6   :  { %vm5427_vm15 = vcmp.gt.f32.partialorder %v5361_v32, 0.0  ;;  %v5491_v39 = vmul.f32 0.2, %v5361_v32 }
 0x5a7   :  { %v6065_v50 = vadd.f32 %v6064_v60, %v6002_v22 }
 0x5a8   :  { %v5555_v6 = vsel %vm5427_vm15, %v5361_v32, %v5491_v39 }
 0x5a9   :  { %v6003_v34 = vmul.f32 %v5938_v5, %v5555_v6 }
 0x5ab   :  { %v6066_v37 = vadd.f32 %v6065_v50, %v6003_v34 }
 0x5ad   :  { %v6067_v55 = vrot.slane %v6066_v37, 4 }
 0x5af   :  { %v6068_v19 = vadd.f32 %v6067_v55, %v6066_v37 }
 0x5b1   :  { %v6069_v26 = vrot.slane %v6068_v19, 2 }
 0x5b3   :  { %v6070_v28 = vadd.f32 %v6069_v26, %v6068_v19 }
 0x5b5   :  { %v6071_v35 = vrot.slane %v6070_v28, 1 }
 0x5b7   :  { %v6072_v51 = vadd.f32 %v6071_v35, %v6070_v28 }
 0x5b9   :  { %v6075_v61 = vadd.f32 %v6074_v44, %v6072_v51 }
 0x5bb   :  { %6076 = vst [vmem:[#allocation3] sm:$0x1] %v6075_v61 }
 0x5bc   :  { %6750 = shalt.err (!%p6747_p4)
}
 0x5bd   :  { %6086 = dma.vmem_to_hbm [thread:$0]  %s6084_s5, 16, %s10112_s10, [#allocation4]  }
 0x5be   :  { %6759 = dma.done.wait [#allocation4], 16  }
 0x5bf   :  { %6760 = vsyncadd [#allocation4], 4294967280 }
 0x5c0   :  { %6090 = vsyncpa [#allocation4], 1 }

</bundles_post_ra>
